<compile_context>
chip_gen: v6e
topology: v6e:2x2x1
jax: 0.10.0
libtpu: 0.0.40
codegen_flags: <defaults>
</compile_context>

<pallas_src>
import functools

import jax
import jax.numpy as jnp
from jax.experimental import pallas as pl
from jax.experimental.pallas import tpu as pltpu


# ----------------------------------------------------------------------------------
# Single fused kernel
# ----------------------------------------------------------------------------------
def _residual_block_kernel(x_ref, t1_ref, t2_ref, pv_ref, out_ref, pad_ref,
                           *, B, H, W, C, Cp, Cr):
    HW = H * W
    M = B * HW

    def conv3x3(taps_ref):
        # 3x3 conv as a 9-tap shift-and-accumulate: each tap is one
        # (M, C) @ (C, Cp) bf16 matmul with f32 accumulation.  Shifted windows are
        # static slices of the zero-padded VMEM scratch (no concats, no im2col).
        acc = jnp.zeros((M, Cp), jnp.float32)
        for idx in range(9):
            dh, dw = idx // 3, idx % 3
            patch = pad_ref[:, dh:dh + H, dw:dw + W, :].reshape(M, C)
            acc = acc + jnp.dot(patch.astype(jnp.bfloat16), taps_ref[idx],
                                preferred_element_type=jnp.float32)
        return acc

    def batchnorm(h, gamma, beta):
        # Training-mode BN over (N,H,W) per channel; two-pass centered variance (f32).
        inv_n = 1.0 / h.shape[0]
        mean = jnp.sum(h, axis=0, keepdims=True) * inv_n        # (1, Cp)
        cen = h - mean
        var = jnp.sum(cen * cen, axis=0, keepdims=True) * inv_n
        return cen * jax.lax.rsqrt(var + 1e-5) * gamma + beta

    # Packed per-channel parameter rows (single DMA'd input).
    g1, b1 = pv_ref[0:1, :], pv_ref[1:2, :]
    g2, b2 = pv_ref[2:3, :], pv_ref[3:4, :]
    fc1_b, fc2_b = pv_ref[4:5, :], pv_ref[5:6, :]

    # Stage conv1 input into the zero-padded scratch (borders stay 0 for both convs).
    pad_ref[...] = jnp.zeros(pad_ref.shape, jnp.float32)
    x2d = x_ref[...].reshape(M, Cp)                              # (M, Cp) f32
    pad_ref[:, 1:1 + H, 1:1 + W, :] = x2d[:, :C].reshape(B, H, W, C)

    # conv1 -> BN1 -> ReLU   (everything stays in VMEM / vregs)
    h1 = jnp.maximum(batchnorm(conv3x3(t1_ref), g1, b1), 0.0)    # (M, Cp)

    # conv2 -> BN2  (restage h1's real channels into the same padded scratch)
    pad_ref[:, 1:1 + H, 1:1 + W, :] = h1[:, :C].reshape(B, H, W, C)
    h2 = batchnorm(conv3x3(t2_ref), g2, b2)                      # (M, Cp)

    # Squeeze-Excite on VPU/XLU: GAP -> fc1 -> ReLU -> fc2 -> sigmoid.
    # The FCs are ~128 MACs each; avoid MXU push/pop latency on the serial chain.
    h2b = h2.reshape(B, HW, Cp)
    pooled = jnp.sum(h2b, axis=1) * (1.0 / HW)                   # (B, Cp)
    pre = jnp.zeros((B, Cp), jnp.float32)
    for r in range(Cr):                                          # Cr is tiny & static
        w1r = pv_ref[6 + r:7 + r, :]                             # (1, Cp): fc1 row r
        w2r = pv_ref[6 + Cr + r:7 + Cr + r, :]                   # (1, Cp): fc2 col r
        zr = jnp.maximum(jnp.sum(pooled * w1r, axis=1, keepdims=True)
                         + fc1_b[:, r:r + 1], 0.0)               # (B, 1)
        pre = pre + zr * w2r                                     # (B, Cp)
    s = jax.nn.sigmoid(pre + fc2_b)                              # (B, Cp)

    # channelwise scale + identity residual + ReLU; lane-dense (Cp=128) store.
    y = h2b * s.reshape(B, 1, Cp) + x_ref[...]
    out_ref[...] = jnp.maximum(y, 0.0)


# ----------------------------------------------------------------------------------
# Wrapper: layout plumbing (NCHW <-> NHWC, channel padding to 128), one pallas_call
# ----------------------------------------------------------------------------------
@jax.jit
def residual_block_forward(x_nchw, p):
    x = jnp.transpose(x_nchw, (0, 2, 3, 1)).astype(jnp.float32)   # NCHW -> NHWC
    B, H, W, C = x.shape
    Cr = p["fc1_w"].shape[0]
    Cp = 128                                                      # lane-dense channels
    HW = H * W

    # x padded to 128 channels, flattened spatially to match the output layout.
    x_p = jnp.zeros((B, HW, Cp), jnp.float32).at[:, :, :C].set(x.reshape(B, HW, C))

    def to_taps(w_oihw):
        # (Cout, Cin, 3, 3) -> (9, Cin, Cp) bf16, tap idx = dh*3+dw; Cout padded to 128.
        t = jnp.transpose(w_oihw, (2, 3, 1, 0)).reshape(9, C, C)
        return jnp.pad(t, ((0, 0), (0, 0), (0, Cp - C))).astype(jnp.bfloat16)

    # Pack all tiny per-channel params into one (rows, Cp) array (single DMA).
    padc = lambda v: jnp.pad(v.astype(jnp.float32), (0, Cp - v.shape[0]))
    rows = [padc(p["g1"]), padc(p["b1"]), padc(p["g2"]), padc(p["b2"]),
            padc(p["fc1_b"]), padc(p["fc2_b"])]
    rows += [padc(p["fc1_w"][r]) for r in range(Cr)]       # fc1 weight rows
    rows += [padc(p["fc2_w"][:, r]) for r in range(Cr)]    # fc2 weight columns
    pvec = jnp.stack(rows, axis=0)
    pad_rows = (-pvec.shape[0]) % 8
    if pad_rows:
        pvec = jnp.pad(pvec, ((0, pad_rows), (0, 0)))

    def full(shape):
        return pl.BlockSpec(shape, lambda i: (0,) * len(shape))

    kernel = functools.partial(_residual_block_kernel,
                               B=B, H=H, W=W, C=C, Cp=Cp, Cr=Cr)
    out = pl.pallas_call(
        kernel,
        out_shape=jax.ShapeDtypeStruct((B, HW, Cp), jnp.float32),
        grid=(1,),
        in_specs=[
            full((B, HW, Cp)),                    # x (padded channels)
            full((9, C, Cp)), full((9, C, Cp)),   # conv1 / conv2 taps (bf16)
            full(pvec.shape),                     # packed per-channel params
        ],
        out_specs=full((B, HW, Cp)),
        scratch_shapes=[pltpu.VMEM((B, H + 2, W + 2, C), jnp.float32)],  # padded conv input
        compiler_params=pltpu.CompilerParams(dimension_semantics=("arbitrary",)),
    )(x_p, to_taps(p["w1"]), to_taps(p["w2"]), pvec)

    out = out[:, :, :C].reshape(B, H, W, C)
    return jnp.transpose(out, (0, 3, 1, 2))                       # NHWC -> NCHW


# ----------------------------------------------------------------------------------
# Pure-JAX reference (for validation).  The kernel feeds bf16 operands to the MXU
# (f32 accumulation); the reference mirrors that operand rounding so the comparison
# isolates structural correctness; remaining diff is accumulation-order noise.
# ----------------------------------------------------------------------------------
def residual_block_reference(x, p):
    rb = lambda t: t.astype(jnp.bfloat16).astype(jnp.float32)

    def conv(a, w):
        return jax.lax.conv_general_dilated(
            rb(a), rb(w), (1, 1), [(1, 1), (1, 1)],
            dimension_numbers=("NCHW", "OIHW", "NCHW"),
            precision=jax.lax.Precision.HIGHEST)

    def bn(a, g, b):
        mean = jnp.mean(a, axis=(0, 2, 3), keepdims=True)
        var = jnp.mean((a - mean) ** 2, axis=(0, 2, 3), keepdims=True)
        return ((a - mean) * jax.lax.rsqrt(var + 1e-5) * g[None, :, None, None]
                + b[None, :, None, None])

    h = jnp.maximum(bn(conv(x, p["w1"]), p["g1"], p["b1"]), 0.0)
    h = bn(conv(h, p["w2"]), p["g2"], p["b2"])
    pooled = jnp.mean(h, axis=(2, 3))                                  # (B, C)
    z = jnp.maximum(pooled @ p["fc1_w"].T + p["fc1_b"], 0.0)
    s = jax.nn.sigmoid(z @ p["fc2_w"].T + p["fc2_b"])
    return jnp.maximum(h * s[:, :, None, None] + x, 0.0)


if __name__ == "__main__":
    B, C, H, W = 2, 32, 8, 8          # C=32 so SE hidden = C // 16 = 2
    Cr = C // 16

    key = jax.random.PRNGKey(0)
    ks = jax.random.split(key, 9)
    params = {
        "w1": 0.1 * jax.random.normal(ks[0], (C, C, 3, 3), jnp.float32),
        "w2": 0.1 * jax.random.normal(ks[1], (C, C, 3, 3), jnp.float32),
        "g1": 1.0 + 0.1 * jax.random.normal(ks[2], (C,), jnp.float32),
        "b1": 0.1 * jax.random.normal(ks[3], (C,), jnp.float32),
        "g2": 1.0 + 0.1 * jax.random.normal(ks[4], (C,), jnp.float32),
        "b2": 0.1 * jax.random.normal(ks[5], (C,), jnp.float32),
        "fc1_w": 0.2 * jax.random.normal(ks[6], (Cr, C), jnp.float32),
        "fc1_b": jnp.zeros((Cr,), jnp.float32),
        "fc2_w": 0.2 * jax.random.normal(ks[7], (C, Cr), jnp.float32),
        "fc2_b": jnp.zeros((C,), jnp.float32),
    }
    x = jax.random.normal(ks[8], (B, C, H, W), jnp.float32)

    out = jax.block_until_ready(residual_block_forward(x, params))
    ref = jax.block_until_ready(residual_block_reference(x, params))

    assert out.shape == (B, C, H, W), out.shape
    if not bool(jnp.allclose(out, ref, rtol=2e-3, atol=2e-3)):
        err = float(jnp.max(jnp.abs(out - ref)))
        raise RuntimeError(f"Pallas output mismatch vs JAX reference (max abs err {err:.3e})")
    print("KERNEL_OK")
</pallas_src>

<mosaic_0001>
module attributes {stable_mosaic.version = 11 : i64} {
  func.func @_residual_block_kernel(%arg0: i32, %arg1: memref<2x64x128xf32, #tpu.memory_space<vmem>>, %arg2: memref<9x32x128xbf16, #tpu.memory_space<vmem>>, %arg3: memref<9x32x128xbf16, #tpu.memory_space<vmem>>, %arg4: memref<16x128xf32, #tpu.memory_space<vmem>>, %arg5: memref<2x64x128xf32, #tpu.memory_space<vmem>>, %arg6: memref<2x10x10x32xf32, #tpu.memory_space<vmem>>) attributes {dimension_semantics = [#tpu.dimension_semantics<arbitrary>], iteration_bounds = array<i64: 1>, scalar_prefetch = 0 : i64, scratch_operands = 1 : i64, tpu.core_type = #tpu.core_type<tc>, window_params = [{pipeline_mode = #tpu.pipeline_mode<synchronous>, transform_indices = @transform_0, window_bounds = array<i64: 2, 64, 128>}, {pipeline_mode = #tpu.pipeline_mode<synchronous>, transform_indices = @transform_1, window_bounds = array<i64: 9, 32, 128>}, {pipeline_mode = #tpu.pipeline_mode<synchronous>, transform_indices = @transform_2, window_bounds = array<i64: 9, 32, 128>}, {pipeline_mode = #tpu.pipeline_mode<synchronous>, transform_indices = @transform_3, window_bounds = array<i64: 16, 128>}, {pipeline_mode = #tpu.pipeline_mode<synchronous>, transform_indices = @transform_4, window_bounds = array<i64: 2, 64, 128>}]} {
    %c0 = arith.constant 0 : index
    %c0_0 = arith.constant 0 : index
    %0 = vector.load %arg4[%c0, %c0_0] : memref<16x128xf32, #tpu.memory_space<vmem>>, vector<1x128xf32>
    %c1 = arith.constant 1 : index
    %c0_1 = arith.constant 0 : index
    %1 = vector.load %arg4[%c1, %c0_1] : memref<16x128xf32, #tpu.memory_space<vmem>>, vector<1x128xf32>
    %c2 = arith.constant 2 : index
    %c0_2 = arith.constant 0 : index
    %2 = vector.load %arg4[%c2, %c0_2] : memref<16x128xf32, #tpu.memory_space<vmem>>, vector<1x128xf32>
    %c3 = arith.constant 3 : index
    %c0_3 = arith.constant 0 : index
    %3 = vector.load %arg4[%c3, %c0_3] : memref<16x128xf32, #tpu.memory_space<vmem>>, vector<1x128xf32>
    %c4 = arith.constant 4 : index
    %c0_4 = arith.constant 0 : index
    %4 = vector.load %arg4[%c4, %c0_4] : memref<16x128xf32, #tpu.memory_space<vmem>>, vector<1x128xf32>
    %c5 = arith.constant 5 : index
    %c0_5 = arith.constant 0 : index
    %5 = vector.load %arg4[%c5, %c0_5] : memref<16x128xf32, #tpu.memory_space<vmem>>, vector<1x128xf32>
    %cst = arith.constant 0.000000e+00 : f32
    %6 = vector.broadcast %cst : f32 to vector<2x10x10x32xf32>
    %c0_6 = arith.constant 0 : index
    %c0_7 = arith.constant 0 : index
    %c0_8 = arith.constant 0 : index
    %c0_9 = arith.constant 0 : index
    %7 = vector.load %arg6[%c0_6, %c0_7, %c0_8, %c0_9] : memref<2x10x10x32xf32, #tpu.memory_space<vmem>>, vector<2x10x10x32xf32>
    tpu.vector_store %arg6[%c0_6, %c0_7, %c0_8, %c0_9], %6 {strides = array<i32>} : memref<2x10x10x32xf32, #tpu.memory_space<vmem>>, vector<2x10x10x32xf32>,
    %c0_10 = arith.constant 0 : index
    %c0_11 = arith.constant 0 : index
    %c0_12 = arith.constant 0 : index
    %8 = vector.load %arg1[%c0_10, %c0_11, %c0_12] : memref<2x64x128xf32, #tpu.memory_space<vmem>>, vector<2x64x128xf32>
    %9 = vector.shape_cast %8 : vector<2x64x128xf32> to vector<128x128xf32>
    %10 = vector.extract_strided_slice %9 {offsets = [0, 0], sizes = [128, 32], strides = [1, 1]} : vector<128x128xf32> to vector<128x32xf32>
    %11 = vector.shape_cast %10 : vector<128x32xf32> to vector<2x8x8x32xf32>
    %c0_13 = arith.constant 0 : index
    %c1_14 = arith.constant 1 : index
    %c1_15 = arith.constant 1 : index
    %c0_16 = arith.constant 0 : index
    %12 = vector.load %arg6[%c0_13, %c1_14, %c1_15, %c0_16] : memref<2x10x10x32xf32, #tpu.memory_space<vmem>>, vector<2x8x8x32xf32>
    tpu.vector_store %arg6[%c0_13, %c1_14, %c1_15, %c0_16], %11 {strides = array<i32>} : memref<2x10x10x32xf32, #tpu.memory_space<vmem>>, vector<2x8x8x32xf32>,
    %cst_17 = arith.constant 0.000000e+00 : f32
    %13 = vector.broadcast %cst_17 : f32 to vector<128x128xf32>
    %c0_18 = arith.constant 0 : index
    %c0_19 = arith.constant 0 : index
    %c0_20 = arith.constant 0 : index
    %c0_21 = arith.constant 0 : index
    %14 = vector.load %arg6[%c0_18, %c0_19, %c0_20, %c0_21] : memref<2x10x10x32xf32, #tpu.memory_space<vmem>>, vector<2x8x8x32xf32>
    %15 = vector.shape_cast %14 : vector<2x8x8x32xf32> to vector<128x32xf32>
    %16 = arith.truncf %15 : vector<128x32xf32> to vector<128x32xbf16>
    %c0_22 = arith.constant 0 : index
    %c0_23 = arith.constant 0 : index
    %c0_24 = arith.constant 0 : index
    %17 = vector.load %arg2[%c0_22, %c0_23, %c0_24] : memref<9x32x128xbf16, #tpu.memory_space<vmem>>, vector<1x32x128xbf16>
    %18 = vector.shape_cast %17 : vector<1x32x128xbf16> to vector<32x128xbf16>
    %cst_25 = arith.constant dense<0.000000e+00> : vector<128x128xf32>
    %19 = tpu.matmul %16, %18, %cst_25 {dimension_numbers = #tpu.dot_dimension_numbers<[1], [0], [0], [1], [0, 0, 1, 1], [], []>} : vector<128x32xbf16>, vector<32x128xbf16>, vector<128x128xf32> -> vector<128x128xf32>
    %20 = arith.addf %13, %19 : vector<128x128xf32>
    %c0_26 = arith.constant 0 : index
    %c0_27 = arith.constant 0 : index
    %c1_28 = arith.constant 1 : index
    %c0_29 = arith.constant 0 : index
    %21 = vector.load %arg6[%c0_26, %c0_27, %c1_28, %c0_29] : memref<2x10x10x32xf32, #tpu.memory_space<vmem>>, vector<2x8x8x32xf32>
    %22 = vector.shape_cast %21 : vector<2x8x8x32xf32> to vector<128x32xf32>
    %23 = arith.truncf %22 : vector<128x32xf32> to vector<128x32xbf16>
    %c1_30 = arith.constant 1 : index
    %c0_31 = arith.constant 0 : index
    %c0_32 = arith.constant 0 : index
    %24 = vector.load %arg2[%c1_30, %c0_31, %c0_32] : memref<9x32x128xbf16, #tpu.memory_space<vmem>>, vector<1x32x128xbf16>
    %25 = vector.shape_cast %24 : vector<1x32x128xbf16> to vector<32x128xbf16>
    %cst_33 = arith.constant dense<0.000000e+00> : vector<128x128xf32>
    %26 = tpu.matmul %23, %25, %cst_33 {dimension_numbers = #tpu.dot_dimension_numbers<[1], [0], [0], [1], [0, 0, 1, 1], [], []>} : vector<128x32xbf16>, vector<32x128xbf16>, vector<128x128xf32> -> vector<128x128xf32>
    %27 = arith.addf %20, %26 : vector<128x128xf32>
    %c0_34 = arith.constant 0 : index
    %c0_35 = arith.constant 0 : index
    %c2_36 = arith.constant 2 : index
    %c0_37 = arith.constant 0 : index
    %28 = vector.load %arg6[%c0_34, %c0_35, %c2_36, %c0_37] : memref<2x10x10x32xf32, #tpu.memory_space<vmem>>, vector<2x8x8x32xf32>
    %29 = vector.shape_cast %28 : vector<2x8x8x32xf32> to vector<128x32xf32>
    %30 = arith.truncf %29 : vector<128x32xf32> to vector<128x32xbf16>
    %c2_38 = arith.constant 2 : index
    %c0_39 = arith.constant 0 : index
    %c0_40 = arith.constant 0 : index
    %31 = vector.load %arg2[%c2_38, %c0_39, %c0_40] : memref<9x32x128xbf16, #tpu.memory_space<vmem>>, vector<1x32x128xbf16>
    %32 = vector.shape_cast %31 : vector<1x32x128xbf16> to vector<32x128xbf16>
    %cst_41 = arith.constant dense<0.000000e+00> : vector<128x128xf32>
    %33 = tpu.matmul %30, %32, %cst_41 {dimension_numbers = #tpu.dot_dimension_numbers<[1], [0], [0], [1], [0, 0, 1, 1], [], []>} : vector<128x32xbf16>, vector<32x128xbf16>, vector<128x128xf32> -> vector<128x128xf32>
    %34 = arith.addf %27, %33 : vector<128x128xf32>
    %c0_42 = arith.constant 0 : index
    %c1_43 = arith.constant 1 : index
    %c0_44 = arith.constant 0 : index
    %c0_45 = arith.constant 0 : index
    %35 = vector.load %arg6[%c0_42, %c1_43, %c0_44, %c0_45] : memref<2x10x10x32xf32, #tpu.memory_space<vmem>>, vector<2x8x8x32xf32>
    %36 = vector.shape_cast %35 : vector<2x8x8x32xf32> to vector<128x32xf32>
    %37 = arith.truncf %36 : vector<128x32xf32> to vector<128x32xbf16>
    %c3_46 = arith.constant 3 : index
    %c0_47 = arith.constant 0 : index
    %c0_48 = arith.constant 0 : index
    %38 = vector.load %arg2[%c3_46, %c0_47, %c0_48] : memref<9x32x128xbf16, #tpu.memory_space<vmem>>, vector<1x32x128xbf16>
    %39 = vector.shape_cast %38 : vector<1x32x128xbf16> to vector<32x128xbf16>
    %cst_49 = arith.constant dense<0.000000e+00> : vector<128x128xf32>
    %40 = tpu.matmul %37, %39, %cst_49 {dimension_numbers = #tpu.dot_dimension_numbers<[1], [0], [0], [1], [0, 0, 1, 1], [], []>} : vector<128x32xbf16>, vector<32x128xbf16>, vector<128x128xf32> -> vector<128x128xf32>
    %41 = arith.addf %34, %40 : vector<128x128xf32>
    %c0_50 = arith.constant 0 : index
    %c1_51 = arith.constant 1 : index
    %c1_52 = arith.constant 1 : index
    %c0_53 = arith.constant 0 : index
    %42 = vector.load %arg6[%c0_50, %c1_51, %c1_52, %c0_53] : memref<2x10x10x32xf32, #tpu.memory_space<vmem>>, vector<2x8x8x32xf32>
    %43 = vector.shape_cast %42 : vector<2x8x8x32xf32> to vector<128x32xf32>
    %44 = arith.truncf %43 : vector<128x32xf32> to vector<128x32xbf16>
    %c4_54 = arith.constant 4 : index
    %c0_55 = arith.constant 0 : index
    %c0_56 = arith.constant 0 : index
    %45 = vector.load %arg2[%c4_54, %c0_55, %c0_56] : memref<9x32x128xbf16, #tpu.memory_space<vmem>>, vector<1x32x128xbf16>
    %46 = vector.shape_cast %45 : vector<1x32x128xbf16> to vector<32x128xbf16>
    %cst_57 = arith.constant dense<0.000000e+00> : vector<128x128xf32>
    %47 = tpu.matmul %44, %46, %cst_57 {dimension_numbers = #tpu.dot_dimension_numbers<[1], [0], [0], [1], [0, 0, 1, 1], [], []>} : vector<128x32xbf16>, vector<32x128xbf16>, vector<128x128xf32> -> vector<128x128xf32>
    %48 = arith.addf %41, %47 : vector<128x128xf32>
    %c0_58 = arith.constant 0 : index
    %c1_59 = arith.constant 1 : index
    %c2_60 = arith.constant 2 : index
    %c0_61 = arith.constant 0 : index
    %49 = vector.load %arg6[%c0_58, %c1_59, %c2_60, %c0_61] : memref<2x10x10x32xf32, #tpu.memory_space<vmem>>, vector<2x8x8x32xf32>
    %50 = vector.shape_cast %49 : vector<2x8x8x32xf32> to vector<128x32xf32>
    %51 = arith.truncf %50 : vector<128x32xf32> to vector<128x32xbf16>
    %c5_62 = arith.constant 5 : index
    %c0_63 = arith.constant 0 : index
    %c0_64 = arith.constant 0 : index
    %52 = vector.load %arg2[%c5_62, %c0_63, %c0_64] : memref<9x32x128xbf16, #tpu.memory_space<vmem>>, vector<1x32x128xbf16>
    %53 = vector.shape_cast %52 : vector<1x32x128xbf16> to vector<32x128xbf16>
    %cst_65 = arith.constant dense<0.000000e+00> : vector<128x128xf32>
    %54 = tpu.matmul %51, %53, %cst_65 {dimension_numbers = #tpu.dot_dimension_numbers<[1], [0], [0], [1], [0, 0, 1, 1], [], []>} : vector<128x32xbf16>, vector<32x128xbf16>, vector<128x128xf32> -> vector<128x128xf32>
    %55 = arith.addf %48, %54 : vector<128x128xf32>
    %c0_66 = arith.constant 0 : index
    %c2_67 = arith.constant 2 : index
    %c0_68 = arith.constant 0 : index
    %c0_69 = arith.constant 0 : index
    %56 = vector.load %arg6[%c0_66, %c2_67, %c0_68, %c0_69] : memref<2x10x10x32xf32, #tpu.memory_space<vmem>>, vector<2x8x8x32xf32>
    %57 = vector.shape_cast %56 : vector<2x8x8x32xf32> to vector<128x32xf32>
    %58 = arith.truncf %57 : vector<128x32xf32> to vector<128x32xbf16>
    %c6 = arith.constant 6 : index
    %c0_70 = arith.constant 0 : index
    %c0_71 = arith.constant 0 : index
    %59 = vector.load %arg2[%c6, %c0_70, %c0_71] : memref<9x32x128xbf16, #tpu.memory_space<vmem>>, vector<1x32x128xbf16>
    %60 = vector.shape_cast %59 : vector<1x32x128xbf16> to vector<32x128xbf16>
    %cst_72 = arith.constant dense<0.000000e+00> : vector<128x128xf32>
    %61 = tpu.matmul %58, %60, %cst_72 {dimension_numbers = #tpu.dot_dimension_numbers<[1], [0], [0], [1], [0, 0, 1, 1], [], []>} : vector<128x32xbf16>, vector<32x128xbf16>, vector<128x128xf32> -> vector<128x128xf32>
    %62 = arith.addf %55, %61 : vector<128x128xf32>
    %c0_73 = arith.constant 0 : index
    %c2_74 = arith.constant 2 : index
    %c1_75 = arith.constant 1 : index
    %c0_76 = arith.constant 0 : index
    %63 = vector.load %arg6[%c0_73, %c2_74, %c1_75, %c0_76] : memref<2x10x10x32xf32, #tpu.memory_space<vmem>>, vector<2x8x8x32xf32>
    %64 = vector.shape_cast %63 : vector<2x8x8x32xf32> to vector<128x32xf32>
    %65 = arith.truncf %64 : vector<128x32xf32> to vector<128x32xbf16>
    %c7 = arith.constant 7 : index
    %c0_77 = arith.constant 0 : index
    %c0_78 = arith.constant 0 : index
    %66 = vector.load %arg2[%c7, %c0_77, %c0_78] : memref<9x32x128xbf16, #tpu.memory_space<vmem>>, vector<1x32x128xbf16>
    %67 = vector.shape_cast %66 : vector<1x32x128xbf16> to vector<32x128xbf16>
    %cst_79 = arith.constant dense<0.000000e+00> : vector<128x128xf32>
    %68 = tpu.matmul %65, %67, %cst_79 {dimension_numbers = #tpu.dot_dimension_numbers<[1], [0], [0], [1], [0, 0, 1, 1], [], []>} : vector<128x32xbf16>, vector<32x128xbf16>, vector<128x128xf32> -> vector<128x128xf32>
    %69 = arith.addf %62, %68 : vector<128x128xf32>
    %c0_80 = arith.constant 0 : index
    %c2_81 = arith.constant 2 : index
    %c2_82 = arith.constant 2 : index
    %c0_83 = arith.constant 0 : index
    %70 = vector.load %arg6[%c0_80, %c2_81, %c2_82, %c0_83] : memref<2x10x10x32xf32, #tpu.memory_space<vmem>>, vector<2x8x8x32xf32>
    %71 = vector.shape_cast %70 : vector<2x8x8x32xf32> to vector<128x32xf32>
    %72 = arith.truncf %71 : vector<128x32xf32> to vector<128x32xbf16>
    %c8 = arith.constant 8 : index
    %c0_84 = arith.constant 0 : index
    %c0_85 = arith.constant 0 : index
    %73 = vector.load %arg2[%c8, %c0_84, %c0_85] : memref<9x32x128xbf16, #tpu.memory_space<vmem>>, vector<1x32x128xbf16>
    %74 = vector.shape_cast %73 : vector<1x32x128xbf16> to vector<32x128xbf16>
    %cst_86 = arith.constant dense<0.000000e+00> : vector<128x128xf32>
    %75 = tpu.matmul %72, %74, %cst_86 {dimension_numbers = #tpu.dot_dimension_numbers<[1], [0], [0], [1], [0, 0, 1, 1], [], []>} : vector<128x32xbf16>, vector<32x128xbf16>, vector<128x128xf32> -> vector<128x128xf32>
    %76 = arith.addf %69, %75 : vector<128x128xf32>
    %cst_87 = arith.constant dense<0.000000e+00> : vector<128xf32>
    %77 = vector.multi_reduction <add>, %76, %cst_87 [0] : vector<128x128xf32> to vector<128xf32>
    %78 = vector.shape_cast %77 : vector<128xf32> to vector<1x128xf32>
    %cst_88 = arith.constant 7.812500e-03 : f32
    %79 = vector.broadcast %cst_88 : f32 to vector<1x128xf32>
    %80 = arith.mulf %78, %79 : vector<1x128xf32>
    %81 = vector.broadcast %80 : vector<1x128xf32> to vector<128x128xf32>
    %82 = arith.subf %76, %81 : vector<128x128xf32>
    %83 = arith.mulf %82, %82 : vector<128x128xf32>
    %cst_89 = arith.constant dense<0.000000e+00> : vector<128xf32>
    %84 = vector.multi_reduction <add>, %83, %cst_89 [0] : vector<128x128xf32> to vector<128xf32>
    %85 = vector.shape_cast %84 : vector<128xf32> to vector<1x128xf32>
    %cst_90 = arith.constant 7.812500e-03 : f32
    %86 = vector.broadcast %cst_90 : f32 to vector<1x128xf32>
    %87 = arith.mulf %85, %86 : vector<1x128xf32>
    %cst_91 = arith.constant 9.99999974E-6 : f32
    %88 = vector.broadcast %cst_91 : f32 to vector<1x128xf32>
    %89 = arith.addf %87, %88 : vector<1x128xf32>
    %90 = math.rsqrt %89 : vector<1x128xf32>
    %91 = vector.broadcast %90 : vector<1x128xf32> to vector<128x128xf32>
    %92 = arith.mulf %82, %91 : vector<128x128xf32>
    %93 = vector.broadcast %0 : vector<1x128xf32> to vector<128x128xf32>
    %94 = arith.mulf %92, %93 : vector<128x128xf32>
    %95 = vector.broadcast %1 : vector<1x128xf32> to vector<128x128xf32>
    %96 = arith.addf %94, %95 : vector<128x128xf32>
    %cst_92 = arith.constant 0.000000e+00 : f32
    %97 = vector.broadcast %cst_92 : f32 to vector<128x128xf32>
    %98 = arith.maximumf %96, %97 : vector<128x128xf32>
    %99 = vector.extract_strided_slice %98 {offsets = [0, 0], sizes = [128, 32], strides = [1, 1]} : vector<128x128xf32> to vector<128x32xf32>
    %100 = vector.shape_cast %99 : vector<128x32xf32> to vector<2x8x8x32xf32>
    %c0_93 = arith.constant 0 : index
    %c1_94 = arith.constant 1 : index
    %c1_95 = arith.constant 1 : index
    %c0_96 = arith.constant 0 : index
    %101 = vector.load %arg6[%c0_93, %c1_94, %c1_95, %c0_96] : memref<2x10x10x32xf32, #tpu.memory_space<vmem>>, vector<2x8x8x32xf32>
    tpu.vector_store %arg6[%c0_93, %c1_94, %c1_95, %c0_96], %100 {strides = array<i32>} : memref<2x10x10x32xf32, #tpu.memory_space<vmem>>, vector<2x8x8x32xf32>,
    %cst_97 = arith.constant 0.000000e+00 : f32
    %102 = vector.broadcast %cst_97 : f32 to vector<128x128xf32>
    %c0_98 = arith.constant 0 : index
    %c0_99 = arith.constant 0 : index
    %c0_100 = arith.constant 0 : index
    %c0_101 = arith.constant 0 : index
    %103 = vector.load %arg6[%c0_98, %c0_99, %c0_100, %c0_101] : memref<2x10x10x32xf32, #tpu.memory_space<vmem>>, vector<2x8x8x32xf32>
    %104 = vector.shape_cast %103 : vector<2x8x8x32xf32> to vector<128x32xf32>
    %105 = arith.truncf %104 : vector<128x32xf32> to vector<128x32xbf16>
    %c0_102 = arith.constant 0 : index
    %c0_103 = arith.constant 0 : index
    %c0_104 = arith.constant 0 : index
    %106 = vector.load %arg3[%c0_102, %c0_103, %c0_104] : memref<9x32x128xbf16, #tpu.memory_space<vmem>>, vector<1x32x128xbf16>
    %107 = vector.shape_cast %106 : vector<1x32x128xbf16> to vector<32x128xbf16>
    %cst_105 = arith.constant dense<0.000000e+00> : vector<128x128xf32>
    %108 = tpu.matmul %105, %107, %cst_105 {dimension_numbers = #tpu.dot_dimension_numbers<[1], [0], [0], [1], [0, 0, 1, 1], [], []>} : vector<128x32xbf16>, vector<32x128xbf16>, vector<128x128xf32> -> vector<128x128xf32>
    %109 = arith.addf %102, %108 : vector<128x128xf32>
    %c0_106 = arith.constant 0 : index
    %c0_107 = arith.constant 0 : index
    %c1_108 = arith.constant 1 : index
    %c0_109 = arith.constant 0 : index
    %110 = vector.load %arg6[%c0_106, %c0_107, %c1_108, %c0_109] : memref<2x10x10x32xf32, #tpu.memory_space<vmem>>, vector<2x8x8x32xf32>
    %111 = vector.shape_cast %110 : vector<2x8x8x32xf32> to vector<128x32xf32>
    %112 = arith.truncf %111 : vector<128x32xf32> to vector<128x32xbf16>
    %c1_110 = arith.constant 1 : index
    %c0_111 = arith.constant 0 : index
    %c0_112 = arith.constant 0 : index
    %113 = vector.load %arg3[%c1_110, %c0_111, %c0_112] : memref<9x32x128xbf16, #tpu.memory_space<vmem>>, vector<1x32x128xbf16>
    %114 = vector.shape_cast %113 : vector<1x32x128xbf16> to vector<32x128xbf16>
    %cst_113 = arith.constant dense<0.000000e+00> : vector<128x128xf32>
    %115 = tpu.matmul %112, %114, %cst_113 {dimension_numbers = #tpu.dot_dimension_numbers<[1], [0], [0], [1], [0, 0, 1, 1], [], []>} : vector<128x32xbf16>, vector<32x128xbf16>, vector<128x128xf32> -> vector<128x128xf32>
    %116 = arith.addf %109, %115 : vector<128x128xf32>
    %c0_114 = arith.constant 0 : index
    %c0_115 = arith.constant 0 : index
    %c2_116 = arith.constant 2 : index
    %c0_117 = arith.constant 0 : index
    %117 = vector.load %arg6[%c0_114, %c0_115, %c2_116, %c0_117] : memref<2x10x10x32xf32, #tpu.memory_space<vmem>>, vector<2x8x8x32xf32>
    %118 = vector.shape_cast %117 : vector<2x8x8x32xf32> to vector<128x32xf32>
    %119 = arith.truncf %118 : vector<128x32xf32> to vector<128x32xbf16>
    %c2_118 = arith.constant 2 : index
    %c0_119 = arith.constant 0 : index
    %c0_120 = arith.constant 0 : index
    %120 = vector.load %arg3[%c2_118, %c0_119, %c0_120] : memref<9x32x128xbf16, #tpu.memory_space<vmem>>, vector<1x32x128xbf16>
    %121 = vector.shape_cast %120 : vector<1x32x128xbf16> to vector<32x128xbf16>
    %cst_121 = arith.constant dense<0.000000e+00> : vector<128x128xf32>
    %122 = tpu.matmul %119, %121, %cst_121 {dimension_numbers = #tpu.dot_dimension_numbers<[1], [0], [0], [1], [0, 0, 1, 1], [], []>} : vector<128x32xbf16>, vector<32x128xbf16>, vector<128x128xf32> -> vector<128x128xf32>
    %123 = arith.addf %116, %122 : vector<128x128xf32>
    %c0_122 = arith.constant 0 : index
    %c1_123 = arith.constant 1 : index
    %c0_124 = arith.constant 0 : index
    %c0_125 = arith.constant 0 : index
    %124 = vector.load %arg6[%c0_122, %c1_123, %c0_124, %c0_125] : memref<2x10x10x32xf32, #tpu.memory_space<vmem>>, vector<2x8x8x32xf32>
    %125 = vector.shape_cast %124 : vector<2x8x8x32xf32> to vector<128x32xf32>
    %126 = arith.truncf %125 : vector<128x32xf32> to vector<128x32xbf16>
    %c3_126 = arith.constant 3 : index
    %c0_127 = arith.constant 0 : index
    %c0_128 = arith.constant 0 : index
    %127 = vector.load %arg3[%c3_126, %c0_127, %c0_128] : memref<9x32x128xbf16, #tpu.memory_space<vmem>>, vector<1x32x128xbf16>
    %128 = vector.shape_cast %127 : vector<1x32x128xbf16> to vector<32x128xbf16>
    %cst_129 = arith.constant dense<0.000000e+00> : vector<128x128xf32>
    %129 = tpu.matmul %126, %128, %cst_129 {dimension_numbers = #tpu.dot_dimension_numbers<[1], [0], [0], [1], [0, 0, 1, 1], [], []>} : vector<128x32xbf16>, vector<32x128xbf16>, vector<128x128xf32> -> vector<128x128xf32>
    %130 = arith.addf %123, %129 : vector<128x128xf32>
    %c0_130 = arith.constant 0 : index
    %c1_131 = arith.constant 1 : index
    %c1_132 = arith.constant 1 : index
    %c0_133 = arith.constant 0 : index
    %131 = vector.load %arg6[%c0_130, %c1_131, %c1_132, %c0_133] : memref<2x10x10x32xf32, #tpu.memory_space<vmem>>, vector<2x8x8x32xf32>
    %132 = vector.shape_cast %131 : vector<2x8x8x32xf32> to vector<128x32xf32>
    %133 = arith.truncf %132 : vector<128x32xf32> to vector<128x32xbf16>
    %c4_134 = arith.constant 4 : index
    %c0_135 = arith.constant 0 : index
    %c0_136 = arith.constant 0 : index
    %134 = vector.load %arg3[%c4_134, %c0_135, %c0_136] : memref<9x32x128xbf16, #tpu.memory_space<vmem>>, vector<1x32x128xbf16>
    %135 = vector.shape_cast %134 : vector<1x32x128xbf16> to vector<32x128xbf16>
    %cst_137 = arith.constant dense<0.000000e+00> : vector<128x128xf32>
    %136 = tpu.matmul %133, %135, %cst_137 {dimension_numbers = #tpu.dot_dimension_numbers<[1], [0], [0], [1], [0, 0, 1, 1], [], []>} : vector<128x32xbf16>, vector<32x128xbf16>, vector<128x128xf32> -> vector<128x128xf32>
    %137 = arith.addf %130, %136 : vector<128x128xf32>
    %c0_138 = arith.constant 0 : index
    %c1_139 = arith.constant 1 : index
    %c2_140 = arith.constant 2 : index
    %c0_141 = arith.constant 0 : index
    %138 = vector.load %arg6[%c0_138, %c1_139, %c2_140, %c0_141] : memref<2x10x10x32xf32, #tpu.memory_space<vmem>>, vector<2x8x8x32xf32>
    %139 = vector.shape_cast %138 : vector<2x8x8x32xf32> to vector<128x32xf32>
    %140 = arith.truncf %139 : vector<128x32xf32> to vector<128x32xbf16>
    %c5_142 = arith.constant 5 : index
    %c0_143 = arith.constant 0 : index
    %c0_144 = arith.constant 0 : index
    %141 = vector.load %arg3[%c5_142, %c0_143, %c0_144] : memref<9x32x128xbf16, #tpu.memory_space<vmem>>, vector<1x32x128xbf16>
    %142 = vector.shape_cast %141 : vector<1x32x128xbf16> to vector<32x128xbf16>
    %cst_145 = arith.constant dense<0.000000e+00> : vector<128x128xf32>
    %143 = tpu.matmul %140, %142, %cst_145 {dimension_numbers = #tpu.dot_dimension_numbers<[1], [0], [0], [1], [0, 0, 1, 1], [], []>} : vector<128x32xbf16>, vector<32x128xbf16>, vector<128x128xf32> -> vector<128x128xf32>
    %144 = arith.addf %137, %143 : vector<128x128xf32>
    %c0_146 = arith.constant 0 : index
    %c2_147 = arith.constant 2 : index
    %c0_148 = arith.constant 0 : index
    %c0_149 = arith.constant 0 : index
    %145 = vector.load %arg6[%c0_146, %c2_147, %c0_148, %c0_149] : memref<2x10x10x32xf32, #tpu.memory_space<vmem>>, vector<2x8x8x32xf32>
    %146 = vector.shape_cast %145 : vector<2x8x8x32xf32> to vector<128x32xf32>
    %147 = arith.truncf %146 : vector<128x32xf32> to vector<128x32xbf16>
    %c6_150 = arith.constant 6 : index
    %c0_151 = arith.constant 0 : index
    %c0_152 = arith.constant 0 : index
    %148 = vector.load %arg3[%c6_150, %c0_151, %c0_152] : memref<9x32x128xbf16, #tpu.memory_space<vmem>>, vector<1x32x128xbf16>
    %149 = vector.shape_cast %148 : vector<1x32x128xbf16> to vector<32x128xbf16>
    %cst_153 = arith.constant dense<0.000000e+00> : vector<128x128xf32>
    %150 = tpu.matmul %147, %149, %cst_153 {dimension_numbers = #tpu.dot_dimension_numbers<[1], [0], [0], [1], [0, 0, 1, 1], [], []>} : vector<128x32xbf16>, vector<32x128xbf16>, vector<128x128xf32> -> vector<128x128xf32>
    %151 = arith.addf %144, %150 : vector<128x128xf32>
    %c0_154 = arith.constant 0 : index
    %c2_155 = arith.constant 2 : index
    %c1_156 = arith.constant 1 : index
    %c0_157 = arith.constant 0 : index
    %152 = vector.load %arg6[%c0_154, %c2_155, %c1_156, %c0_157] : memref<2x10x10x32xf32, #tpu.memory_space<vmem>>, vector<2x8x8x32xf32>
    %153 = vector.shape_cast %152 : vector<2x8x8x32xf32> to vector<128x32xf32>
    %154 = arith.truncf %153 : vector<128x32xf32> to vector<128x32xbf16>
    %c7_158 = arith.constant 7 : index
    %c0_159 = arith.constant 0 : index
    %c0_160 = arith.constant 0 : index
    %155 = vector.load %arg3[%c7_158, %c0_159, %c0_160] : memref<9x32x128xbf16, #tpu.memory_space<vmem>>, vector<1x32x128xbf16>
    %156 = vector.shape_cast %155 : vector<1x32x128xbf16> to vector<32x128xbf16>
    %cst_161 = arith.constant dense<0.000000e+00> : vector<128x128xf32>
    %157 = tpu.matmul %154, %156, %cst_161 {dimension_numbers = #tpu.dot_dimension_numbers<[1], [0], [0], [1], [0, 0, 1, 1], [], []>} : vector<128x32xbf16>, vector<32x128xbf16>, vector<128x128xf32> -> vector<128x128xf32>
    %158 = arith.addf %151, %157 : vector<128x128xf32>
    %c0_162 = arith.constant 0 : index
    %c2_163 = arith.constant 2 : index
    %c2_164 = arith.constant 2 : index
    %c0_165 = arith.constant 0 : index
    %159 = vector.load %arg6[%c0_162, %c2_163, %c2_164, %c0_165] : memref<2x10x10x32xf32, #tpu.memory_space<vmem>>, vector<2x8x8x32xf32>
    %160 = vector.shape_cast %159 : vector<2x8x8x32xf32> to vector<128x32xf32>
    %161 = arith.truncf %160 : vector<128x32xf32> to vector<128x32xbf16>
    %c8_166 = arith.constant 8 : index
    %c0_167 = arith.constant 0 : index
    %c0_168 = arith.constant 0 : index
    %162 = vector.load %arg3[%c8_166, %c0_167, %c0_168] : memref<9x32x128xbf16, #tpu.memory_space<vmem>>, vector<1x32x128xbf16>
    %163 = vector.shape_cast %162 : vector<1x32x128xbf16> to vector<32x128xbf16>
    %cst_169 = arith.constant dense<0.000000e+00> : vector<128x128xf32>
    %164 = tpu.matmul %161, %163, %cst_169 {dimension_numbers = #tpu.dot_dimension_numbers<[1], [0], [0], [1], [0, 0, 1, 1], [], []>} : vector<128x32xbf16>, vector<32x128xbf16>, vector<128x128xf32> -> vector<128x128xf32>
    %165 = arith.addf %158, %164 : vector<128x128xf32>
    %cst_170 = arith.constant dense<0.000000e+00> : vector<128xf32>
    %166 = vector.multi_reduction <add>, %165, %cst_170 [0] : vector<128x128xf32> to vector<128xf32>
    %167 = vector.shape_cast %166 : vector<128xf32> to vector<1x128xf32>
    %cst_171 = arith.constant 7.812500e-03 : f32
    %168 = vector.broadcast %cst_171 : f32 to vector<1x128xf32>
    %169 = arith.mulf %167, %168 : vector<1x128xf32>
    %170 = vector.broadcast %169 : vector<1x128xf32> to vector<128x128xf32>
    %171 = arith.subf %165, %170 : vector<128x128xf32>
    %172 = arith.mulf %171, %171 : vector<128x128xf32>
    %cst_172 = arith.constant dense<0.000000e+00> : vector<128xf32>
    %173 = vector.multi_reduction <add>, %172, %cst_172 [0] : vector<128x128xf32> to vector<128xf32>
    %174 = vector.shape_cast %173 : vector<128xf32> to vector<1x128xf32>
    %cst_173 = arith.constant 7.812500e-03 : f32
    %175 = vector.broadcast %cst_173 : f32 to vector<1x128xf32>
    %176 = arith.mulf %174, %175 : vector<1x128xf32>
    %cst_174 = arith.constant 9.99999974E-6 : f32
    %177 = vector.broadcast %cst_174 : f32 to vector<1x128xf32>
    %178 = arith.addf %176, %177 : vector<1x128xf32>
    %179 = math.rsqrt %178 : vector<1x128xf32>
    %180 = vector.broadcast %179 : vector<1x128xf32> to vector<128x128xf32>
    %181 = arith.mulf %171, %180 : vector<128x128xf32>
    %182 = vector.broadcast %2 : vector<1x128xf32> to vector<128x128xf32>
    %183 = arith.mulf %181, %182 : vector<128x128xf32>
    %184 = vector.broadcast %3 : vector<1x128xf32> to vector<128x128xf32>
    %185 = arith.addf %183, %184 : vector<128x128xf32>
    %186 = vector.shape_cast %185 : vector<128x128xf32> to vector<2x64x128xf32>
    %cst_175 = arith.constant dense<0.000000e+00> : vector<2x128xf32>
    %187 = vector.multi_reduction <add>, %186, %cst_175 [1] : vector<2x64x128xf32> to vector<2x128xf32>
    %cst_176 = arith.constant 1.562500e-02 : f32
    %188 = vector.broadcast %cst_176 : f32 to vector<2x128xf32>
    %189 = arith.mulf %187, %188 : vector<2x128xf32>
    %cst_177 = arith.constant 0.000000e+00 : f32
    %190 = vector.broadcast %cst_177 : f32 to vector<2x128xf32>
    %c6_178 = arith.constant 6 : index
    %c0_179 = arith.constant 0 : index
    %191 = vector.load %arg4[%c6_178, %c0_179] : memref<16x128xf32, #tpu.memory_space<vmem>>, vector<1x128xf32>
    %c8_180 = arith.constant 8 : index
    %c0_181 = arith.constant 0 : index
    %192 = vector.load %arg4[%c8_180, %c0_181] : memref<16x128xf32, #tpu.memory_space<vmem>>, vector<1x128xf32>
    %193 = vector.broadcast %191 : vector<1x128xf32> to vector<2x128xf32>
    %194 = arith.mulf %189, %193 : vector<2x128xf32>
    %cst_182 = arith.constant dense<0.000000e+00> : vector<2xf32>
    %195 = vector.multi_reduction <add>, %194, %cst_182 [1] : vector<2x128xf32> to vector<2xf32>
    %196 = vector.shape_cast %195 : vector<2xf32> to vector<2x1xf32>
    %197 = vector.extract_strided_slice %4 {offsets = [0, 0], sizes = [1, 1], strides = [1, 1]} : vector<1x128xf32> to vector<1x1xf32>
    %198 = vector.broadcast %197 : vector<1x1xf32> to vector<2x1xf32>
    %199 = arith.addf %196, %198 : vector<2x1xf32>
    %cst_183 = arith.constant 0.000000e+00 : f32
    %200 = vector.broadcast %cst_183 : f32 to vector<2x1xf32>
    %201 = arith.maximumf %199, %200 : vector<2x1xf32>
    %202 = vector.broadcast %201 : vector<2x1xf32> to vector<2x128xf32>
    %203 = vector.broadcast %192 : vector<1x128xf32> to vector<2x128xf32>
    %204 = arith.mulf %202, %203 : vector<2x128xf32>
    %205 = arith.addf %190, %204 : vector<2x128xf32>
    %c7_184 = arith.constant 7 : index
    %c0_185 = arith.constant 0 : index
    %206 = vector.load %arg4[%c7_184, %c0_185] : memref<16x128xf32, #tpu.memory_space<vmem>>, vector<1x128xf32>
    %c9 = arith.constant 9 : index
    %c0_186 = arith.constant 0 : index
    %207 = vector.load %arg4[%c9, %c0_186] : memref<16x128xf32, #tpu.memory_space<vmem>>, vector<1x128xf32>
    %208 = vector.broadcast %206 : vector<1x128xf32> to vector<2x128xf32>
    %209 = arith.mulf %189, %208 : vector<2x128xf32>
    %cst_187 = arith.constant dense<0.000000e+00> : vector<2xf32>
    %210 = vector.multi_reduction <add>, %209, %cst_187 [1] : vector<2x128xf32> to vector<2xf32>
    %211 = vector.shape_cast %210 : vector<2xf32> to vector<2x1xf32>
    %212 = vector.extract_strided_slice %4 {offsets = [0, 1], sizes = [1, 1], strides = [1, 1]} : vector<1x128xf32> to vector<1x1xf32>
    %213 = vector.broadcast %212 : vector<1x1xf32> to vector<2x1xf32>
    %214 = arith.addf %211, %213 : vector<2x1xf32>
    %cst_188 = arith.constant 0.000000e+00 : f32
    %215 = vector.broadcast %cst_188 : f32 to vector<2x1xf32>
    %216 = arith.maximumf %214, %215 : vector<2x1xf32>
    %217 = vector.broadcast %216 : vector<2x1xf32> to vector<2x128xf32>
    %218 = vector.broadcast %207 : vector<1x128xf32> to vector<2x128xf32>
    %219 = arith.mulf %217, %218 : vector<2x128xf32>
    %220 = arith.addf %205, %219 : vector<2x128xf32>
    %221 = vector.broadcast %5 : vector<1x128xf32> to vector<2x128xf32>
    %222 = arith.addf %220, %221 : vector<2x128xf32>
    %223 = arith.negf %222 : vector<2x128xf32>
    %224 = math.exp %223 : vector<2x128xf32>
    %cst_189 = arith.constant 1.000000e+00 : f32
    %225 = vector.broadcast %cst_189 : f32 to vector<2x128xf32>
    %226 = arith.addf %225, %224 : vector<2x128xf32>
    %227 = arith.divf %225, %226 : vector<2x128xf32>
    %228 = vector.shape_cast %227 : vector<2x128xf32> to vector<2x1x128xf32>
    %229 = vector.broadcast %228 : vector<2x1x128xf32> to vector<2x64x128xf32>
    %230 = arith.mulf %186, %229 : vector<2x64x128xf32>
    %c0_190 = arith.constant 0 : index
    %c0_191 = arith.constant 0 : index
    %c0_192 = arith.constant 0 : index
    %231 = vector.load %arg1[%c0_190, %c0_191, %c0_192] : memref<2x64x128xf32, #tpu.memory_space<vmem>>, vector<2x64x128xf32>
    %232 = arith.addf %230, %231 : vector<2x64x128xf32>
    %cst_193 = arith.constant 0.000000e+00 : f32
    %233 = vector.broadcast %cst_193 : f32 to vector<2x64x128xf32>
    %234 = arith.maximumf %232, %233 : vector<2x64x128xf32>
    %c0_194 = arith.constant 0 : index
    %c0_195 = arith.constant 0 : index
    %c0_196 = arith.constant 0 : index
    %235 = vector.load %arg5[%c0_194, %c0_195, %c0_196] : memref<2x64x128xf32, #tpu.memory_space<vmem>>, vector<2x64x128xf32>
    tpu.vector_store %arg5[%c0_194, %c0_195, %c0_196], %234 {strides = array<i32>} : memref<2x64x128xf32, #tpu.memory_space<vmem>>, vector<2x64x128xf32>,
    return
  }
  func.func @transform_0(%arg0: i32) -> (i32, i32, i32) {
    %c0_i32 = arith.constant 0 : i32
    %c0_i32_0 = arith.constant 0 : i32
    %c0_i32_1 = arith.constant 0 : i32
    %c0_i32_2 = arith.constant 0 : i32
    return %c0_i32, %c0_i32_0, %c0_i32_1 : i32, i32, i32
  }
  func.func @transform_1(%arg0: i32) -> (i32, i32, i32) {
    %c0_i32 = arith.constant 0 : i32
    %c0_i32_0 = arith.constant 0 : i32
    %c0_i32_1 = arith.constant 0 : i32
    %c0_i32_2 = arith.constant 0 : i32
    return %c0_i32, %c0_i32_0, %c0_i32_1 : i32, i32, i32
  }
  func.func @transform_2(%arg0: i32) -> (i32, i32, i32) {
    %c0_i32 = arith.constant 0 : i32
    %c0_i32_0 = arith.constant 0 : i32
    %c0_i32_1 = arith.constant 0 : i32
    %c0_i32_2 = arith.constant 0 : i32
    return %c0_i32, %c0_i32_0, %c0_i32_1 : i32, i32, i32
  }
  func.func @transform_3(%arg0: i32) -> (i32, i32) {
    %c0_i32 = arith.constant 0 : i32
    %c0_i32_0 = arith.constant 0 : i32
    %c0_i32_1 = arith.constant 0 : i32
    return %c0_i32, %c0_i32_0 : i32, i32
  }
  func.func @transform_4(%arg0: i32) -> (i32, i32, i32) {
    %c0_i32 = arith.constant 0 : i32
    %c0_i32_0 = arith.constant 0 : i32
    %c0_i32_1 = arith.constant 0 : i32
    %c0_i32_2 = arith.constant 0 : i32
    return %c0_i32, %c0_i32_0, %c0_i32_1 : i32, i32, i32
  }
}

</mosaic_0001>

<bundles_post_ra>
// kernel: residual_block_forward.1
= control target key start
LH: loop header
LB: loop body
LE: loop exit
PB: predicated region body
PF: predicated region fallthrough
CT: control target
= control target key end

     0   :  { %vm24_vm0 = vcmask 261120   ;;  %vm26_vm1 = vcmask 254976   ;;  %v4604_v1 = vmov 0.0   ;;  %vm3577_vm2 = vcmask 1041409   ;;  %s6175_s1 = inlined_call_operand.vmem [shape: bf16[9,32,128], index: 1, kind: input, shape index: {}]   ;;  %s6176_s0 = inlined_call_operand.vmem [shape: f32[2,64,128], index: 0, kind: input, shape index: {}]   ;;  %s6177_s2 = inlined_call_operand.vmem [shape: bf16[9,32,128], index: 2, kind: input, shape index: {}]   ;;  %s6178_s3 = inlined_call_operand.vmem [shape: f32[16,128], index: 3, kind: input, shape index: {}]   ;;  %s6179_s4 = inlined_call_operand.vmem [shape: f32[2,64,128], index: 4, kind: output, shape index: {}]  }
   0x1   :  { %v4560_v0 = vld [vmem:[%s6175_s1 + $0x18] sm:$0xff]   ;;  %25 = vst.msk [vmem:[#allocation2] sm:$0xff] %vm24_vm0, %v4604_v1  ;;  %28 = vst.msk [vmem:[#allocation2 + $0x10] sm:$0xff] %vm24_vm0, %v4604_v1  ;;  %v4561_v2 = vld [vmem:[%s6175_s1 + $0x8] sm:$0xff]   ;;  %vm3580_vm3 = vcmask 1041408  }
   0x2   :  { %27 = vst.msk [vmem:[#allocation2 + $0x8] sm:$0x3] %vm26_vm1, %v4604_v1  ;;  %29 = vst.msk [vmem:[#allocation2 + $0x18] sm:$0x3] %vm26_vm1, %v4604_v1  ;;  %4193 = vmatprep.subr.bf16.mxu0 %v4560_v0  ;;  %v4562_v3 = vld [vmem:[%s6175_s1 + $0x10] sm:$0xff]   ;;  %4213 = vmatprep.subr.bf16.mxu1 %v4561_v2  ;;  %v4563_v4 = vld [vmem:[%s6175_s1] sm:$0xff]  }
   0x3   :  { %30 = vst.msk [vmem:[#allocation2 + $0x20] sm:$0xff] %vm24_vm0, %v4604_v1  ;;  %32 = vst.msk [vmem:[#allocation2 + $0x30] sm:$0xff] %vm24_vm0, %v4604_v1  ;;  %4194 = vmatpush3.bf16.msra.mxu0 %v4560_v0  ;;  %4214 = vmatpush3.bf16.msra.mxu1 %v4561_v2  ;;  %v66_v5 = vld [vmem:[%s6176_s0] sm:$0xff]  ;;  %v4564_v6 = vld [vmem:[%s6175_s1 + $0x28] sm:$0xff]  }
   0x4   :  { %31 = vst.msk [vmem:[#allocation2 + $0x28] sm:$0x3] %vm26_vm1, %v4604_v1  ;;  %33 = vst.msk [vmem:[#allocation2 + $0x38] sm:$0x3] %vm26_vm1, %v4604_v1  ;;  %4195 = vmatprep.subr.bf16.mxu0 %v4562_v3  ;;  %4215 = vmatprep.subr.bf16.mxu1 %v4563_v4  ;;  %v67_v7 = vld [vmem:[%s6176_s0 + $0x8] sm:$0xff]  ;;  %v68_v8 = vld [vmem:[%s6176_s0 + $0x10] sm:$0xff] }
   0x5   :  { %34 = vst.msk [vmem:[#allocation2 + $0x40] sm:$0xff] %vm24_vm0, %v4604_v1  ;;  %36 = vst.msk [vmem:[#allocation2 + $0x50] sm:$0xff] %vm24_vm0, %v4604_v1  ;;  %v69_v9 = vld [vmem:[%s6176_s0 + $0x18] sm:$0xff]  ;;  %v70_v10 = vld [vmem:[%s6176_s0 + $0x20] sm:$0xff] }
   0x6   :  { %35 = vst.msk [vmem:[#allocation2 + $0x48] sm:$0x3] %vm26_vm1, %v4604_v1  ;;  %37 = vst.msk [vmem:[#allocation2 + $0x58] sm:$0x3] %vm26_vm1, %v4604_v1  ;;  %v71_v11 = vld [vmem:[%s6176_s0 + $0x28] sm:$0xff]  ;;  %v72_v12 = vld [vmem:[%s6176_s0 + $0x30] sm:$0xff] }
   0x7   :  { %38 = vst.msk [vmem:[#allocation2 + $0x60] sm:$0xff] %vm24_vm0, %v4604_v1  ;;  %40 = vst.msk [vmem:[#allocation2 + $0x70] sm:$0xff] %vm24_vm0, %v4604_v1  ;;  %4196 = vmatpush3.bf16.msra.mxu0 %v4562_v3  ;;  %4216 = vmatpush3.bf16.msra.mxu1 %v4563_v4  ;;  %v74_v14 = vld [vmem:[%s6176_s0 + $0x40] sm:$0xff]  ;;  %v75_v16 = vld [vmem:[%s6176_s0 + $0x48] sm:$0xff] }
   0x8   :  { %39 = vst.msk [vmem:[#allocation2 + $0x68] sm:$0x3] %vm26_vm1, %v4604_v1  ;;  %41 = vst.msk [vmem:[#allocation2 + $0x78] sm:$0x3] %vm26_vm1, %v4604_v1  ;;  %4233 = vmatprep.subr.bf16.mxu0 %v4564_v6  ;;  %v99_v15 = vld [vmem:[#allocation2] sm:$0xff]  ;;  %v76_v17 = vld [vmem:[%s6176_s0 + $0x50] sm:$0xff] }
   0x9   :  { %42 = vst.msk [vmem:[#allocation2 + $0x80] sm:$0xff] %vm24_vm0, %v4604_v1  ;;  %44 = vst.msk [vmem:[#allocation2 + $0x90] sm:$0xff] %vm24_vm0, %v4604_v1  ;;  %v127_v13 = vld [vmem:[#allocation2 + $0x1] sm:$0xff]  ;;  %v77_v18 = vld [vmem:[%s6176_s0 + $0x58] sm:$0xff] }
   0xa   :  { %43 = vst.msk [vmem:[#allocation2 + $0x88] sm:$0x3] %vm26_vm1, %v4604_v1  ;;  %45 = vst.msk [vmem:[#allocation2 + $0x98] sm:$0x3] %vm26_vm1, %v4604_v1  ;;  %v78_v19 = vld [vmem:[%s6176_s0 + $0x60] sm:$0xff]  ;;  %v79_v20 = vld [vmem:[%s6176_s0 + $0x68] sm:$0xff] }
   0xb   :  { %46 = vst.msk [vmem:[#allocation2 + $0xa0] sm:$0xff] %vm24_vm0, %v4604_v1  ;;  %48 = vst.msk [vmem:[#allocation2 + $0xb0] sm:$0xff] %vm24_vm0, %v4604_v1  ;;  %v80_v21 = vld [vmem:[%s6176_s0 + $0x70] sm:$0xff]  ;;  %v4565_v37 = vld [vmem:[%s6175_s1 + $0x20] sm:$0xff]  }
   0xc   :  { %47 = vst.msk [vmem:[#allocation2 + $0xa8] sm:$0x3] %vm26_vm1, %v4604_v1  ;;  %49 = vst.msk [vmem:[#allocation2 + $0xb8] sm:$0x3] %vm26_vm1, %v4604_v1  ;;  %v4566_v51 = vld [vmem:[%s6175_s1 + $0x38] sm:$0xff]   ;;  %v4567_v52 = vld [vmem:[%s6175_s1 + $0x30] sm:$0xff]  }
   0xd   :  { %50 = vst.msk [vmem:[#allocation2 + $0xc0] sm:$0xff] %vm24_vm0, %v4604_v1  ;;  %52 = vst.msk [vmem:[#allocation2 + $0xd0] sm:$0xff] %vm24_vm0, %v4604_v1  ;;  %4253 = vmatprep.subr.bf16.mxu1 %v4566_v51  ;;  %v4568_v53 = vld [vmem:[%s6175_s1 + $0x48] sm:$0xff]   ;;  %v73_v62 = vld [vmem:[%s6176_s0 + $0x38] sm:$0xff] }
   0xe   :  { %51 = vst.msk [vmem:[#allocation2 + $0xc8] sm:$0x3] %vm26_vm1, %v4604_v1  ;;  %53 = vst.msk [vmem:[#allocation2 + $0xd8] sm:$0x3] %vm26_vm1, %v4604_v1 }
   0xf   :  { %54 = vst.msk [vmem:[#allocation2 + $0xe0] sm:$0xff] %vm24_vm0, %v4604_v1  ;;  %56 = vst.msk [vmem:[#allocation2 + $0xf0] sm:$0xff] %vm24_vm0, %v4604_v1 }
  0x10   :  { %55 = vst.msk [vmem:[#allocation2 + $0xe8] sm:$0x3] %vm26_vm1, %v4604_v1  ;;  %57 = vst.msk [vmem:[#allocation2 + $0xf8] sm:$0x3] %vm26_vm1, %v4604_v1 }
  0x11   :  { %58 = vst.msk [vmem:[#allocation2 + $0x100] sm:$0xff] %vm24_vm0, %v4604_v1  ;;  %60 = vst.msk [vmem:[#allocation2 + $0x110] sm:$0xff] %vm24_vm0, %v4604_v1 }
  0x12   :  { %59 = vst.msk [vmem:[#allocation2 + $0x108] sm:$0x3] %vm26_vm1, %v4604_v1  ;;  %61 = vst.msk [vmem:[#allocation2 + $0x118] sm:$0x3] %vm26_vm1, %v4604_v1  ;;  %v107_v45 = vld [vmem:[#allocation2 + $0xa0] sm:$0xff] }
  0x13   :  { %62 = vst.msk [vmem:[#allocation2 + $0x120] sm:$0xff] %vm24_vm0, %v4604_v1  ;;  %64 = vst.msk [vmem:[#allocation2 + $0x130] sm:$0xff] %vm24_vm0, %v4604_v1  ;;  %v135_v39 = vld [vmem:[#allocation2 + $0xa1] sm:$0xff] }
  0x14   :  { %63 = vst.msk [vmem:[#allocation2 + $0x128] sm:$0x3] %vm26_vm1, %v4604_v1  ;;  %65 = vst.msk [vmem:[#allocation2 + $0x138] sm:$0x3] %vm26_vm1, %v4604_v1 }
  0x15   :  { %83 = vst.msk [vmem:[#allocation2 + $0x11] sm:$0xff] %vm24_vm0, %v66_v5  ;;  %84 = vst.msk [vmem:[#allocation2 + $0x21] sm:$0xff] %vm24_vm0, %v67_v7  ;;  %v81_v5 = vld [vmem:[%s6176_s0 + $0x78] sm:$0xff] }
  0x16   :  { %85 = vst.msk [vmem:[#allocation2 + $0x31] sm:$0xff] %vm24_vm0, %v68_v8  ;;  %86 = vst.msk [vmem:[#allocation2 + $0x41] sm:$0xff] %vm24_vm0, %v69_v9  ;;  %v4570_v8 = vld [vmem:[%s6175_s1 + $0x58] sm:$0xff]   ;;  %v422_v9 = vld [vmem:[#allocation2 + $0x2] sm:$0xff] }
  0x17   :  { %87 = vst.msk [vmem:[#allocation2 + $0x51] sm:$0xff] %vm24_vm0, %v70_v10  ;;  %88 = vst.msk [vmem:[#allocation2 + $0x61] sm:$0xff] %vm24_vm0, %v71_v11 }
  0x18   :  { %89 = vst.msk [vmem:[#allocation2 + $0x71] sm:$0xff] %vm24_vm0, %v72_v12  ;;  %91 = vst.msk [vmem:[#allocation2 + $0xb1] sm:$0xff] %vm24_vm0, %v74_v14 }
  0x19   :  { %92 = vst.msk [vmem:[#allocation2 + $0xc1] sm:$0xff] %vm24_vm0, %v75_v16  ;;  %93 = vst.msk [vmem:[#allocation2 + $0xd1] sm:$0xff] %vm24_vm0, %v76_v17 }
  0x1a   :  { %94 = vst.msk [vmem:[#allocation2 + $0xe1] sm:$0xff] %vm24_vm0, %v77_v18  ;;  %95 = vst.msk [vmem:[#allocation2 + $0xf1] sm:$0xff] %vm24_vm0, %v78_v19 }
  0x1b   :  { %96 = vst.msk [vmem:[#allocation2 + $0x101] sm:$0xff] %vm24_vm0, %v79_v20  ;;  %97 = vst.msk [vmem:[#allocation2 + $0x111] sm:$0xff] %vm24_vm0, %v80_v21 }
  0x1c   :  { %v4741_v22 = vld [vmem:[#allocation2 + $0x11] sm:$0xff]  ;;  %v4750_v26 = vld [vmem:[#allocation2 + $0x21] sm:$0xff]  ;;  %90 = vst.msk [vmem:[#allocation2 + $0x81] sm:$0xff] %vm24_vm0, %v73_v62  ;;  %98 = vst.msk [vmem:[#allocation2 + $0x121] sm:$0xff] %vm24_vm0, %v81_v5 }
  0x1d   :  { %v4743_v23 = vld [vmem:[#allocation2 + $0x10] sm:$0xff]  ;;  %v143_v24 = vpack.c.bf16 %v4741_v22, %v127_v13  ;;  %v4754_v28 = vld [vmem:[#allocation2 + $0x20] sm:$0xff] }
  0x1e   :  { %v115_v25 = vpack.c.bf16 %v4743_v23, %v99_v15  ;;  %v4752_v27 = vld [vmem:[#allocation2 + $0x31] sm:$0xff]  ;;  %v4762_v31 = vld [vmem:[#allocation2 + $0x41] sm:$0xff]  ;;  %v616_v14 = vpack.c.bf16 %v4754_v28, %v4743_v23 }
  0x1f   :  { %v4758_v29 = vpack.c.bf16 %v4752_v27, %v4750_v26  ;;  %v4760_v30 = vld [vmem:[#allocation2 + $0x30] sm:$0xff]  ;;  %4197 = vmatprep.mubr.msk.bf16.mxu0 %vm24_vm0, %v143_v24  ;;  %v4776_v35 = vld [vmem:[#allocation2 + $0x40] sm:$0xff] }
  0x20   :  { %v4764_v32 = vld [vmem:[#allocation2 + $0x51] sm:$0xff]  ;;  %4217 = vmatprep.mubr.msk.bf16.mxu1 %vm24_vm0, %v115_v25  ;;  %v4770_v33 = vpack.c.bf16 %v4760_v30, %v4754_v28  ;;  %v4791_v40 = vld [vmem:[#allocation2 + $0x61] sm:$0xff]  ;;  %v617_v20 = vpack.c.bf16 %v4776_v35, %v4760_v30 }
  0x21   :  { %v4774_v34 = vpack.c.bf16 %v4764_v32, %v4762_v31  ;;  %v4778_v36 = vld [vmem:[#allocation2 + $0x50] sm:$0xff]  ;;  %4198 = vmatmul.mubr.msk.bf16.vlgmr.msra.gmra.mxu0 %vm24_vm0, %v4758_v29  ;;  %v4799_v42 = vld [vmem:[#allocation2 + $0x60] sm:$0xff] }
  0x22   :  { %v4787_v38 = vpack.c.bf16 %v4778_v36, %v4776_v35  ;;  %4218 = vmatmul.mubr.msk.bf16.vlgmr.msra.gmra.mxu1 %vm24_vm0, %v4770_v33  ;;  %4234 = vmatpush3.bf16.msra.mxu0 %v4564_v6  ;;  %v4793_v41 = vld [vmem:[#allocation2 + $0x71] sm:$0xff]  ;;  %v4831_v54 = vld [vmem:[#allocation2 + $0xc1] sm:$0xff]  ;;  %v618_v23 = vpack.c.bf16 %v4799_v42, %v4778_v36 }
  0x23   :  { %4201 = vmatprep.mubr.msk.bf16.mxu0 %vm24_vm0, %v4774_v34  ;;  %v4801_v43 = vld [vmem:[#allocation2 + $0x70] sm:$0xff]  ;;  %4235 = vmatprep.subr.bf16.mxu0 %v4565_v37  ;;  %v4809_v47 = vpack.c.bf16 %v4793_v41, %v4791_v40  ;;  %v4835_v56 = vld [vmem:[#allocation2 + $0xc0] sm:$0xff] }
  0x24   :  { %4221 = vmatprep.mubr.msk.bf16.mxu1 %vm24_vm0, %v4787_v38  ;;  %v4803_v44 = vld [vmem:[#allocation2 + $0xb1] sm:$0xff]  ;;  %v4813_v48 = vpack.c.bf16 %v4801_v43, %v4799_v42  ;;  %v4840_v58 = vld [vmem:[#allocation2 + $0xe1] sm:$0xff]  ;;  %4254 = vmatpush3.bf16.msra.mxu1 %v4566_v51 }
  0x25   :  { %v4805_v46 = vld [vmem:[#allocation2 + $0xb0] sm:$0xff]  ;;  %v147_v49 = vpack.c.bf16 %v4803_v44, %v135_v39  ;;  %v4844_v60 = vld [vmem:[#allocation2 + $0xe0] sm:$0xff]  ;;  %4255 = vmatprep.subr.bf16.mxu1 %v4567_v52  ;;  %v4572_v39 = vld [vmem:[%s6175_s1 + $0x68] sm:$0xff]  }
  0x26   :  { %4236 = vmatpush3.bf16.msra.mxu0 %v4565_v37  ;;  %v119_v50 = vpack.c.bf16 %v4805_v46, %v107_v45  ;;  %v4833_v55 = vld [vmem:[#allocation2 + $0xd1] sm:$0xff]  ;;  %v4868_v3 = vld [vmem:[#allocation2 + $0x101] sm:$0xff]  ;;  %v620_v51 = vpack.c.bf16 %v4835_v56, %v4805_v46 }
  0x27   :  { %v4838_v57 = vld [vmem:[#allocation2 + $0xd0] sm:$0xff]  ;;  %4273 = vmatprep.subr.bf16.mxu0 %v4568_v53  ;;  %v4853_v63 = vpack.c.bf16 %v4833_v55, %v4831_v54  ;;  %v4877_v6 = vld [vmem:[#allocation2 + $0x100] sm:$0xff]  ;;  %v4574_v45 = vld [vmem:[%s6175_s1 + $0x78] sm:$0xff]  }
  0x28   :  { %v4842_v59 = vld [vmem:[#allocation2 + $0xf1] sm:$0xff]  ;;  %v4858_v0 = vpack.c.bf16 %v4838_v57, %v4835_v56  ;;  %4256 = vmatpush3.bf16.msra.mxu1 %v4567_v52  ;;  %v4906_v15 = vld [vmem:[#allocation2 + $0x22] sm:$0xff]  ;;  %v621_v46 = vpack.c.bf16 %v4844_v60, %v4838_v57 }
  0x29   :  { %4202 = vmatmul.mubr.msk.bf16.gmra.mxu0 %vm24_vm0, %v4809_v47  ;;  %v4846_v61 = vld [vmem:[#allocation2 + $0xf0] sm:$0xff]  ;;  %v4862_v1 = vpack.c.bf16 %v4842_v59, %v4840_v58  ;;  %4293 = vmatprep.subr.bf16.mxu1 %v4570_v8  ;;  %v4914_v17 = vld [vmem:[#allocation2 + $0x42] sm:$0xff] }
  0x2a   :  { %4222 = vmatmul.mubr.msk.bf16.gmra.mxu1 %vm24_vm0, %v4813_v48  ;;  %4205 = vmatprep.mubr.msk.bf16.mxu0 %vm24_vm0, %v147_v49  ;;  %v4866_v2 = vpack.c.bf16 %v4846_v61, %v4844_v60  ;;  %v4870_v4 = vld [vmem:[#allocation2 + $0x111] sm:$0xff]  ;;  %v4569_v24 = vld [vmem:[%s6175_s1 + $0x40] sm:$0xff]  }
  0x2b   :  { %4225 = vmatprep.mubr.msk.bf16.mxu1 %vm24_vm0, %v119_v50  ;;  %v4879_v7 = vld [vmem:[#allocation2 + $0x110] sm:$0xff]  ;;  %v4895_v11 = vpack.c.bf16 %v4870_v4, %v4868_v3  ;;  %v428_v28 = vld [vmem:[#allocation2 + $0x62] sm:$0xff] }
  0x2c   :  { %v4891_v10 = vld [vmem:[#allocation2 + $0x12] sm:$0xff]  ;;  %v4899_v12 = vpack.c.bf16 %v4879_v7, %v4877_v6  ;;  %v430_v35 = vld [vmem:[#allocation2 + $0xa2] sm:$0xff] }
  0x2d   :  { %v438_v13 = vpack.c.bf16 %v4891_v10, %v422_v9  ;;  %v4911_v16 = vld [vmem:[#allocation2 + $0x32] sm:$0xff]  ;;  %v4944_v36 = vld [vmem:[#allocation2 + $0x80] sm:$0xff] }
  0x2e   :  { %v4916_v18 = vld [vmem:[#allocation2 + $0x52] sm:$0xff]  ;;  %v4920_v19 = vpack.c.bf16 %v4911_v16, %v4906_v15  ;;  %v619_v49 = vpack.c.bf16 %v4944_v36, %v4801_v43  ;;  %v432_v52 = vld [vmem:[#allocation2 + $0xc2] sm:$0xff] }
  0x2f   :  { %v4926_v21 = vpack.c.bf16 %v4916_v18, %v4914_v17  ;;  %v4571_v25 = vld [vmem:[%s6175_s1 + $0x50] sm:$0xff]   ;;  %v434_v43 = vld [vmem:[#allocation2 + $0xe2] sm:$0xff] }
  0x30   :  { %v4939_v30 = vld [vmem:[#allocation2 + $0x72] sm:$0xff]  ;;  %v436_v9 = vld [vmem:[#allocation2 + $0x102] sm:$0xff] }
  0x31   :  { %4206 = vmatmul.mubr.msk.bf16.gmra.mxu0 %vm24_vm0, %v4853_v63  ;;  %v4946_v37 = vld [vmem:[#allocation2 + $0xb2] sm:$0xff]  ;;  %v4952_v42 = vpack.c.bf16 %v4939_v30, %v428_v28 }
  0x32   :  { %4226 = vmatmul.mubr.msk.bf16.gmra.mxu1 %vm24_vm0, %v4858_v0  ;;  %4209 = vmatprep.mubr.msk.bf16.mxu0 %vm24_vm0, %v4862_v1  ;;  %v442_v50 = vpack.c.bf16 %v4946_v37, %v430_v35  ;;  %v435_v62 = vld [vmem:[#allocation2 + $0xf2] sm:$0xff] }
  0x33   :  { %4229 = vmatprep.mubr.msk.bf16.mxu1 %vm24_vm0, %v4866_v2  ;;  %v4971_v56 = vpack.c.bf16 %v435_v62, %v434_v43 }
  0x39   :  { %4210 = vmatmul.mubr.msk.bf16.gmra.mxu0 %vm24_vm0, %v4895_v11 }
  0x3a   :  { %4230 = vmatmul.mubr.msk.bf16.gmra.mxu1 %vm24_vm0, %v4899_v12  ;;  %4237 = vmatprep.mubr.msk.bf16.mxu0 %vm24_vm0, %v438_v13  ;;  %v437_v13 = vld [vmem:[#allocation2 + $0x112] sm:$0xff] }
  0x3b   :  { %4257 = vmatprep.mubr.msk.bf16.mxu1 %vm24_vm0, %v616_v14  ;;  %v4981_v14 = vld [vmem:[#allocation2 + $0x120] sm:$0xff]  ;;  %v4983_v57 = vpack.c.bf16 %v437_v13, %v436_v9 }
  0x3c   :  { %v623_v60 = vpack.c.bf16 %v4981_v14, %v4879_v7  ;;  %v973_v7 = vpack.c.bf16 %v4914_v17, %v4911_v16  ;;  %v798_v17 = vpack.c.bf16 %v4831_v54, %v4803_v44  ;;  %v800_v44 = vpack.c.bf16 %v4868_v3, %v4842_v59 }
  0x3d   :  { %v978_v54 = vpack.c.bf16 %v436_v9, %v435_v62 }
  0x41   :  { %4238 = vmatmul.mubr.msk.bf16.vlgmr.msra.gmra.mxu0 %vm24_vm0, %v4920_v19 }
  0x42   :  { %4274 = vmatpush3.bf16.msra.mxu0 %v4568_v53  ;;  %4258 = vmatmul.mubr.msk.bf16.vlgmr.msra.gmra.mxu1 %vm24_vm0, %v617_v20  ;;  %v433_v53 = vld [vmem:[#allocation2 + $0xd2] sm:$0xff]  ;;  %v795_v20 = vpack.c.bf16 %v4762_v31, %v4752_v27  ;;  %v785_v27 = vld [vmem:[#allocation2 + $0x81] sm:$0xff] }
  0x43   :  { %4241 = vmatprep.mubr.msk.bf16.mxu0 %vm24_vm0, %v4926_v21  ;;  %4261 = vmatprep.mubr.msk.bf16.mxu1 %vm24_vm0, %v618_v23  ;;  %v4967_v5 = vpack.c.bf16 %v433_v53, %v432_v52  ;;  %v5013_v31 = vld [vmem:[#allocation2 + $0x82] sm:$0xff]  ;;  %v977_v23 = vpack.c.bf16 %v434_v43, %v433_v53 }
  0x44   :  { %4275 = vmatprep.subr.bf16.mxu0 %v4569_v24  ;;  %4294 = vmatpush3.bf16.msra.mxu1 %v4570_v8  ;;  %v622_v8 = vpack.c.bf16 %v4877_v6, %v4846_v61  ;;  %v794_v61 = vpack.c.bf16 %v4750_v26, %v4741_v22  ;;  %v972_v6 = vpack.c.bf16 %v4906_v15, %v4891_v10  ;;  %v4573_v10 = vld [vmem:[%s6175_s1 + $0x60] sm:$0xff]   ;;  %v4575_v15 = vld [vmem:[%s6175_s1 + $0x70] sm:$0xff]  }
  0x45   :  { %4295 = vmatprep.subr.bf16.mxu1 %v4571_v25  ;;  %v796_v22 = vpack.c.bf16 %v4791_v40, %v4764_v32  ;;  %v974_v26 = vpack.c.bf16 %v428_v28, %v4916_v18  ;;  %v4576_v32 = vld [vmem:[%s6175_s1 + $0x88] sm:$0xff]   ;;  %v797_v40 = vpack.c.bf16 %v785_v27, %v4793_v41  ;;  %v975_v16 = vpack.c.bf16 %v5013_v31, %v4939_v30 }
  0x46   :  { %4276 = vmatpush3.bf16.msra.mxu0 %v4569_v24  ;;  %v976_v18 = vpack.c.bf16 %v432_v52, %v4946_v37  ;;  %v799_v41 = vpack.c.bf16 %v4840_v58, %v4833_v55  ;;  %v793_v24 = vld [vmem:[#allocation2 + $0x121] sm:$0xff]  ;;  %v1142_v58 = vld [vmem:[#allocation2 + $0x90] sm:$0xff] }
  0x47   :  { %4313 = vmatprep.subr.bf16.mxu0 %v4572_v39  ;;  %v801_v28 = vpack.c.bf16 %v793_v24, %v4870_v4  ;;  %v4577_v55 = vld [vmem:[%s6175_s1 + $0x80] sm:$0xff]  }
  0x48   :  { %4296 = vmatpush3.bf16.msra.mxu1 %v4571_v25  ;;  %v971_v25 = vld [vmem:[#allocation2 + $0x122] sm:$0xff] }
  0x49   :  { %4242 = vmatmul.mubr.msk.bf16.gmra.mxu0 %vm24_vm0, %v4952_v42  ;;  %4333 = vmatprep.subr.bf16.mxu1 %v4574_v45  ;;  %v979_v30 = vpack.c.bf16 %v971_v25, %v437_v13 }
  0x4a   :  { %4262 = vmatmul.mubr.msk.bf16.gmra.mxu1 %vm24_vm0, %v619_v49  ;;  %4245 = vmatprep.mubr.msk.bf16.mxu0 %vm24_vm0, %v442_v50 }
  0x4b   :  { %4265 = vmatprep.mubr.msk.bf16.mxu1 %vm24_vm0, %v620_v51 }
  0x51   :  { %4246 = vmatmul.mubr.msk.bf16.gmra.mxu0 %vm24_vm0, %v4967_v5 }
  0x52   :  { %4266 = vmatmul.mubr.msk.bf16.gmra.mxu1 %vm24_vm0, %v621_v46  ;;  %4249 = vmatprep.mubr.msk.bf16.mxu0 %vm24_vm0, %v4971_v56 }
  0x53   :  { %4269 = vmatprep.mubr.msk.bf16.mxu1 %vm24_vm0, %v622_v8 }
  0x59   :  { %4250 = vmatmul.mubr.msk.bf16.gmra.mxu0 %vm24_vm0, %v4983_v57 }
  0x5a   :  { %4270 = vmatmul.mubr.msk.bf16.gmra.mxu1 %vm24_vm0, %v623_v60  ;;  %4277 = vmatprep.mubr.msk.bf16.mxu0 %vm24_vm0, %v794_v61 }
  0x5b   :  { %4297 = vmatprep.mubr.msk.bf16.mxu1 %vm24_vm0, %v972_v6 }
  0x61   :  { %4278 = vmatmul.mubr.msk.bf16.vlgmr.msra.gmra.mxu0 %vm24_vm0, %v795_v20 }
  0x62   :  { %4314 = vmatpush3.bf16.msra.mxu0 %v4572_v39  ;;  %4298 = vmatmul.mubr.msk.bf16.vlgmr.msra.gmra.mxu1 %vm24_vm0, %v973_v7 }
  0x63   :  { %4281 = vmatprep.mubr.msk.bf16.mxu0 %vm24_vm0, %v796_v22  ;;  %4301 = vmatprep.mubr.msk.bf16.mxu1 %vm24_vm0, %v974_v26 }
  0x64   :  { %4315 = vmatprep.subr.bf16.mxu0 %v4573_v10  ;;  %4334 = vmatpush3.bf16.msra.mxu1 %v4574_v45 }
  0x65   :  { %4335 = vmatprep.subr.bf16.mxu1 %v4575_v15 }
  0x66   :  { %4316 = vmatpush3.bf16.msra.mxu0 %v4573_v10 }
  0x67   :  { %4353 = vmatprep.subr.bf16.mxu0 %v4576_v32 }
  0x68   :  { %4336 = vmatpush3.bf16.msra.mxu1 %v4575_v15 }
  0x69   :  { %4282 = vmatmul.mubr.msk.bf16.gmra.mxu0 %vm24_vm0, %v797_v40 }
  0x6a   :  { %4302 = vmatmul.mubr.msk.bf16.gmra.mxu1 %vm24_vm0, %v975_v16  ;;  %4285 = vmatprep.mubr.msk.bf16.mxu0 %vm24_vm0, %v798_v17 }
  0x6b   :  { %4305 = vmatprep.mubr.msk.bf16.mxu1 %vm24_vm0, %v976_v18 }
  0x71   :  { %4286 = vmatmul.mubr.msk.bf16.gmra.mxu0 %vm24_vm0, %v799_v41 }
  0x72   :  { %4306 = vmatmul.mubr.msk.bf16.gmra.mxu1 %vm24_vm0, %v977_v23  ;;  %4289 = vmatprep.mubr.msk.bf16.mxu0 %vm24_vm0, %v800_v44 }
  0x73   :  { %4309 = vmatprep.mubr.msk.bf16.mxu1 %vm24_vm0, %v978_v54 }
  0x79   :  { %4290 = vmatmul.mubr.msk.bf16.gmra.mxu0 %vm24_vm0, %v801_v28 }
  0x7a   :  { %4310 = vmatmul.mubr.msk.bf16.gmra.mxu1 %vm24_vm0, %v979_v30  ;;  %4317 = vmatprep.mubr.msk.bf16.mxu0 %vm24_vm0, %v4770_v33  ;;  %v1320_v33 = vld [vmem:[#allocation2 + $0x91] sm:$0xff] }
  0x7b   :  { %4337 = vmatprep.mubr.msk.bf16.mxu1 %vm24_vm0, %v4758_v29  ;;  %v1154_v29 = vpack.c.bf16 %v1142_v58, %v4944_v36  ;;  %v1332_v59 = vpack.c.bf16 %v1320_v33, %v785_v27 }
  0x81   :  { %4318 = vmatmul.mubr.msk.bf16.vlgmr.msra.gmra.mxu0 %vm24_vm0, %v4787_v38  ;;  %v1328_v38 = vld [vmem:[#allocation2 + $0x131] sm:$0xff] }
  0x82   :  { %4354 = vmatpush3.bf16.msra.mxu0 %v4576_v32  ;;  %4338 = vmatmul.mubr.msk.bf16.vlgmr.msra.gmra.mxu1 %vm24_vm0, %v4774_v34  ;;  %v1150_v34 = vld [vmem:[#allocation2 + $0x130] sm:$0xff] }
  0x83   :  { %4321 = vmatprep.mubr.msk.bf16.mxu0 %vm24_vm0, %v4813_v48  ;;  %4341 = vmatprep.mubr.msk.bf16.mxu1 %vm24_vm0, %v4809_v47  ;;  %v1158_v47 = vpack.c.bf16 %v1150_v34, %v4981_v14  ;;  %v1336_v48 = vpack.c.bf16 %v1328_v38, %v793_v24 }
  0x84   :  { %4355 = vmatprep.subr.bf16.mxu0 %v4577_v55 }
  0x86   :  { %4356 = vmatpush3.bf16.msra.mxu0 %v4577_v55 }
  0x89   :  { %4322 = vmatmul.mubr.msk.bf16.gmra.mxu0 %vm24_vm0, %v1154_v29 }
  0x8a   :  { %4342 = vmatmul.mubr.msk.bf16.gmra.mxu1 %vm24_vm0, %v1332_v59  ;;  %4325 = vmatprep.mubr.msk.bf16.mxu0 %vm24_vm0, %v4858_v0 }
  0x8b   :  { %4345 = vmatprep.mubr.msk.bf16.mxu1 %vm24_vm0, %v4853_v63  ;;  %v1498_v63 = vld [vmem:[#allocation2 + $0x92] sm:$0xff] }
  0x8c   :  { %v1510_v0 = vpack.c.bf16 %v1498_v63, %v5013_v31 }
  0x91   :  { %4326 = vmatmul.mubr.msk.bf16.gmra.mxu0 %vm24_vm0, %v4866_v2 }
  0x92   :  { %4346 = vmatmul.mubr.msk.bf16.gmra.mxu1 %vm24_vm0, %v4862_v1  ;;  %4329 = vmatprep.mubr.msk.bf16.mxu0 %vm24_vm0, %v4899_v12  ;;  %v1506_v1 = vld [vmem:[#allocation2 + $0x132] sm:$0xff] }
  0x93   :  { %4349 = vmatprep.mubr.msk.bf16.mxu1 %vm24_vm0, %v4895_v11  ;;  %v1514_v2 = vpack.c.bf16 %v1506_v1, %v971_v25 }
  0x99   :  { %4330 = vmatmul.mubr.msk.bf16.gmra.mxu0 %vm24_vm0, %v1158_v47 }
  0x9a   :  { %4350 = vmatmul.mubr.msk.bf16.gmra.mxu1 %vm24_vm0, %v1336_v48  ;;  %4357 = vmatprep.mubr.msk.bf16.mxu0 %vm24_vm0, %v4920_v19 }
  0xa1   :  { %4358 = vmatmul.mubr.msk.bf16.vlgmr.msra.gmra.mxu0 %vm24_vm0, %v4926_v21 }
  0xa2   :  { %4361 = vmatprep.mubr.msk.bf16.mxu0 %vm24_vm0, %v4952_v42 }
  0xa9   :  { %4362 = vmatmul.mubr.msk.bf16.gmra.mxu0 %vm24_vm0, %v1510_v0 }
  0xaa   :  { %4365 = vmatprep.mubr.msk.bf16.mxu0 %vm24_vm0, %v4967_v5 }
  0xb1   :  { %4366 = vmatmul.mubr.msk.bf16.gmra.mxu0 %vm24_vm0, %v4971_v56 }
  0xb2   :  { %4369 = vmatprep.mubr.msk.bf16.mxu0 %vm24_vm0, %v4983_v57 }
  0xb9   :  { %4370 = vmatmul.mubr.msk.bf16.gmra.mxu0 %vm24_vm0, %v1514_v2 }
  0xe1   :  { %v4199_v3 = vpop.f32.mrf.mxu0 }
  0xe2   :  { %v4219_v4 = vpop.f32.mrf.mxu1 }
  0xe3   :  { %v368_v11 = vadd.f32 %v4219_v4, %v4199_v3  ;;  %v226_v12 = vpop.f32.mrf.mxu0 }
  0xe4   :  { %v359_v19 = vpop.f32.mrf.mxu1 }
  0xe5   :  { %v360_v21 = vadd.f32 %v359_v19, %v226_v12  ;;  %v4200_v35 = vpop.f32.mrf.mxu0 }
  0xe6   :  { %v4220_v36 = vpop.f32.mrf.mxu1 }
  0xe7   :  { %v371_v37 = vadd.f32 %v4220_v36, %v4200_v35  ;;  %v5087_v39 = vpop.f32.mrf.mxu0 }
  0xe8   :  { %v5089_v42 = vpop.f32.mrf.mxu1 }
  0xe9   :  { %v4203_v45 = vpop.f32.mrf.mxu0 }
  0xea   :  { %v4223_v49 = vpop.f32.mrf.mxu1 }
  0xeb   :  { %v384_v50 = vadd.f32 %v4223_v49, %v4203_v45  ;;  %v242_v51 = vpop.f32.mrf.mxu0 }
  0xec   :  { %v375_v52 = vpop.f32.mrf.mxu1 }
  0xed   :  { %v376_v53 = vadd.f32 %v375_v52, %v242_v51  ;;  %v4204_v43 = vpop.f32.mrf.mxu0 }
  0xee   :  { %v4224_v62 = vpop.f32.mrf.mxu1 }
  0xef   :  { %v387_v5 = vadd.f32 %v4224_v62, %v4204_v43  ;;  %v5091_v46 = vpop.f32.mrf.mxu0 }
  0xf0   :  { %v5093_v56 = vpop.f32.mrf.mxu1 }
  0xf1   :  { %v4207_v8 = vpop.f32.mrf.mxu0 }
  0xf2   :  { %v4227_v9 = vpop.f32.mrf.mxu1 }
  0xf3   :  { %v400_v13 = vadd.f32 %v4227_v9, %v4207_v8  ;;  %v258_v14 = vpop.f32.mrf.mxu0 }
  0xf4   :  { %v391_v57 = vpop.f32.mrf.mxu1 }
  0xf5   :  { %v392_v60 = vadd.f32 %v391_v57, %v258_v14  ;;  %v4208_v61 = vpop.f32.mrf.mxu0 }
  0xf6   :  { %v4228_v6 = vpop.f32.mrf.mxu1 }
  0xf7   :  { %v403_v20 = vadd.f32 %v4228_v6, %v4208_v61  ;;  %v5095_v7 = vpop.f32.mrf.mxu0 }
  0xf8   :  { %v5097_v22 = vpop.f32.mrf.mxu1 }
  0xf9   :  { %v4211_v26 = vpop.f32.mrf.mxu0 }
  0xfa   :  { %v4231_v10 = vpop.f32.mrf.mxu1 }
  0xfb   :  { %v416_v15 = vadd.f32 %v4231_v10, %v4211_v26  ;;  %v274_v27 = vpop.f32.mrf.mxu0 }
  0xfc   :  { %v407_v31 = vpop.f32.mrf.mxu1 }
  0xfd   :  { %v408_v32 = vadd.f32 %v407_v31, %v274_v27  ;;  %v4212_v40 = vpop.f32.mrf.mxu0 }
  0xfe   :  { %v4232_v16 = vpop.f32.mrf.mxu1 }
  0xff   :  { %v419_v17 = vadd.f32 %v4232_v16, %v4212_v40  ;;  %v5099_v18 = vpop.f32.mrf.mxu0 }
 0x100   :  { %v5101_v41 = vpop.f32.mrf.mxu1 }
 0x101   :  { %v4239_v23 = vpop.f32.mrf.mxu0 }
 0x102   :  { %v586_v44 = vadd.f32 %v4239_v23, %v368_v11  ;;  %v4259_v54 = vpop.f32.mrf.mxu1 }
 0x103   :  { %v521_v24 = vpop.f32.mrf.mxu0 }
 0x104   :  { %v5103_v25 = vadd.f32 %v521_v24, %v360_v21  ;;  %v764_v28 = vadd.f32 %v4259_v54, %v586_v44  ;;  %v5105_v30 = vpop.f32.mrf.mxu1 }
 0x105   :  { %v4240_v55 = vpop.f32.mrf.mxu0 }
 0x106   :  { %v5107_v58 = vadd.f32 %v4240_v55, %v371_v37  ;;  %v5109_v33 = vpop.f32.mrf.mxu1 }
 0x107   :  { %v5111_v29 = vpop.f32.mrf.mxu0 }
 0x108   :  { %v5113_v59 = vpop.f32.mrf.mxu1 }
 0x109   :  { %v4243_v34 = vpop.f32.mrf.mxu0 }
 0x10a   :  { %v590_v38 = vadd.f32 %v4243_v34, %v384_v50  ;;  %v4263_v47 = vpop.f32.mrf.mxu1 }
 0x10b   :  { %v537_v48 = vpop.f32.mrf.mxu0 }
 0x10c   :  { %v5115_v63 = vadd.f32 %v537_v48, %v376_v53  ;;  %v768_v0 = vadd.f32 %v4263_v47, %v590_v38  ;;  %v5117_v1 = vpop.f32.mrf.mxu1 }
 0x10d   :  { %v4244_v2 = vpop.f32.mrf.mxu0 }
 0x10e   :  { %v5119_v3 = vadd.f32 %v4244_v2, %v387_v5  ;;  %v5121_v4 = vpop.f32.mrf.mxu1 }
 0x10f   :  { %v5123_v11 = vpop.f32.mrf.mxu0 }
 0x110   :  { %v5125_v12 = vpop.f32.mrf.mxu1 }
 0x111   :  { %v4247_v19 = vpop.f32.mrf.mxu0 }
 0x112   :  { %v594_v21 = vadd.f32 %v4247_v19, %v400_v13  ;;  %v4267_v35 = vpop.f32.mrf.mxu1 }
 0x113   :  { %v553_v36 = vpop.f32.mrf.mxu0 }
 0x114   :  { %v5127_v37 = vadd.f32 %v553_v36, %v392_v60  ;;  %v772_v45 = vadd.f32 %v4267_v35, %v594_v21  ;;  %v5129_v49 = vpop.f32.mrf.mxu1 }
 0x115   :  { %v4248_v50 = vpop.f32.mrf.mxu0 }
 0x116   :  { %v5131_v51 = vadd.f32 %v4248_v50, %v403_v20  ;;  %v5133_v52 = vpop.f32.mrf.mxu1 }
 0x117   :  { %6181 = vst [vmem:[#allocation4_spill] sm:$0xff] %v5133_v52  ;;  %v5135_v53 = vpop.f32.mrf.mxu0 }
 0x118   :  { %6180 = vst [vmem:[#allocation3_spill] sm:$0xff] %v5131_v51  ;;  %v5137_v43 = vpop.f32.mrf.mxu1 }
 0x119   :  { %v4251_v62 = vpop.f32.mrf.mxu0 }
 0x11a   :  { %v598_v5 = vadd.f32 %v4251_v62, %v416_v15  ;;  %v4271_v8 = vpop.f32.mrf.mxu1 }
 0x11b   :  { %v569_v9 = vpop.f32.mrf.mxu0 }
 0x11c   :  { %v5139_v13 = vadd.f32 %v569_v9, %v408_v32  ;;  %v776_v14 = vadd.f32 %v4271_v8, %v598_v5  ;;  %v5141_v57 = vpop.f32.mrf.mxu1 }
 0x11d   :  { %6183 = vst [vmem:[#allocation6_spill] sm:$0xff] %v5141_v57  ;;  %v4252_v60 = vpop.f32.mrf.mxu0  ;;  %v363_v57 = vadd.f32 %v5089_v42, %v5087_v39 }
 0x11e   :  { %6182 = vst [vmem:[#allocation5_spill] sm:$0xff] %v5139_v13  ;;  %v5143_v61 = vadd.f32 %v4252_v60, %v419_v17  ;;  %v5145_v6 = vpop.f32.mrf.mxu1 }
 0x11f   :  { %6185 = vst [vmem:[#allocation8_spill] sm:$0xff] %v5145_v6  ;;  %v5147_v20 = vpop.f32.mrf.mxu0 }
 0x120   :  { %6184 = vst [vmem:[#allocation7_spill] sm:$0xff] %v5143_v61  ;;  %6186 = vst [vmem:[#allocation9_spill] sm:$0xff] %v5147_v20  ;;  %v5149_v26 = vpop.f32.mrf.mxu1 }
 0x121   :  { %6187 = vst [vmem:[#allocation10_spill] sm:$0xff] %v5149_v26  ;;  %v4279_v10 = vpop.f32.mrf.mxu0 }
 0x122   :  { %v5151_v27 = vadd.f32 %v4279_v10, %v764_v28  ;;  %v5153_v15 = vpop.f32.mrf.mxu1 }
 0x123   :  { %v877_v31 = vpop.f32.mrf.mxu0 }
 0x124   :  { %v5155_v32 = vpop.f32.mrf.mxu1 }
 0x125   :  { %v5157_v40 = vpop.f32.mrf.mxu0 }
 0x126   :  { %v5159_v16 = vpop.f32.mrf.mxu1 }
 0x127   :  { %v880_v17 = vpop.f32.mrf.mxu0 }
 0x128   :  { %v5161_v23 = vpop.f32.mrf.mxu1 }
 0x129   :  { %v4283_v44 = vpop.f32.mrf.mxu0 }
 0x12a   :  { %v5163_v54 = vadd.f32 %v4283_v44, %v768_v0  ;;  %v5165_v24 = vpop.f32.mrf.mxu1 }
 0x12b   :  { %v5167_v55 = vpop.f32.mrf.mxu0 }
 0x12c   :  { %v5169_v28 = vpop.f32.mrf.mxu1 }
 0x12d   :  { %v5171_v34 = vpop.f32.mrf.mxu0 }
 0x12e   :  { %v5173_v38 = vpop.f32.mrf.mxu1 }
 0x12f   :  { %v5175_v47 = vpop.f32.mrf.mxu0 }
 0x130   :  { %v5177_v48 = vpop.f32.mrf.mxu1 }
 0x131   :  { %v4287_v2 = vpop.f32.mrf.mxu0 }
 0x132   :  { %v5179_v19 = vadd.f32 %v4287_v2, %v772_v45  ;;  %v5181_v21 = vpop.f32.mrf.mxu1 }
 0x133   :  { %6189 = vst [vmem:[#allocation12_spill] sm:$0xff] %v5181_v21  ;;  %v5183_v0 = vpop.f32.mrf.mxu0 }
 0x134   :  { %6188 = vst [vmem:[#allocation11_spill] sm:$0xff] %v5179_v19  ;;  %v5185_v35 = vpop.f32.mrf.mxu1 }
 0x135   :  { %6190 = vst [vmem:[#allocation13_spill] sm:$0xff] %v5185_v35  ;;  %v5187_v36 = vpop.f32.mrf.mxu0  ;;  %v585_v35 = vadd.f32 %v5111_v29, %v363_v57 }
 0x136   :  { %6191 = vst [vmem:[#allocation14_spill] sm:$0xff] %v5187_v36  ;;  %v5189_v50 = vpop.f32.mrf.mxu1 }
 0x137   :  { %6192 = vst [vmem:[#allocation15_spill] sm:$0xff] %v5189_v50  ;;  %v5191_v62 = vpop.f32.mrf.mxu0 }
 0x138   :  { %v5193_v5 = vpop.f32.mrf.mxu1 }
 0x139   :  { %6193 = vst [vmem:[#allocation16_spill] sm:$0xff] %v5193_v5  ;;  %v4291_v8 = vpop.f32.mrf.mxu0 }
 0x13a   :  { %v5195_v9 = vadd.f32 %v4291_v8, %v776_v14  ;;  %v5197_v60 = vpop.f32.mrf.mxu1 }
 0x13b   :  { %6195 = vst [vmem:[#allocation18_spill] sm:$0xff] %v5197_v60  ;;  %v5199_v45 = vpop.f32.mrf.mxu0 }
 0x13c   :  { %6194 = vst [vmem:[#allocation17_spill] sm:$0xff] %v5195_v9  ;;  %6196 = vst [vmem:[#allocation19_spill] sm:$0xff] %v5199_v45  ;;  %v5201_v10 = vpop.f32.mrf.mxu1 }
 0x13d   :  { %6197 = vst [vmem:[#allocation20_spill] sm:$0xff] %v5201_v10  ;;  %v5203_v44 = vpop.f32.mrf.mxu0 }
 0x13e   :  { %6198 = vst [vmem:[#allocation21_spill] sm:$0xff] %v5203_v44  ;;  %v5205_v2 = vpop.f32.mrf.mxu1 }
 0x13f   :  { %6199 = vst [vmem:[#allocation22_spill] sm:$0xff] %v5205_v2  ;;  %v5207_v6 = vpop.f32.mrf.mxu0 }
 0x140   :  { %6200 = vst [vmem:[#allocation23_spill] sm:$0xff] %v5207_v6  ;;  %v5209_v61 = vpop.f32.mrf.mxu1 }
 0x141   :  { %6201 = vst [vmem:[#allocation24_spill] sm:$0xff] %v5209_v61  ;;  %v4319_v50 = vpop.f32.mrf.mxu0 }
 0x142   :  { %v4339_v21 = vpop.f32.mrf.mxu1 }
 0x143   :  { %v1234_v19 = vpop.f32.mrf.mxu0 }
 0x144   :  { %v1412_v26 = vpop.f32.mrf.mxu1 }
 0x145   :  { %v4320_v14 = vpop.f32.mrf.mxu0 }
 0x146   :  { %v5211_v9 = vpop.f32.mrf.mxu1 }
 0x147   :  { %v1237_v8 = vpop.f32.mrf.mxu0 }
 0x148   :  { %v1415_v45 = vpop.f32.mrf.mxu1 }
 0x149   :  { %v5213_v60 = vpop.f32.mrf.mxu0 }
 0x14a   :  { %v5217_v44 = vpop.f32.mrf.mxu1 }
 0x14b   :  { %v1250_v10 = vpop.f32.mrf.mxu0  ;;  %6203 = vst [vmem:[#allocation26_spill] sm:$0xff] %v5217_v44  ;;  %v763_v44 = vadd.f32 %v5113_v59, %v585_v35  ;;  %v395_v35 = vadd.f32 %v5097_v22, %v5095_v7  ;;  %v770_v7 = vadd.f32 %v5129_v49, %v5127_v37 }
 0x14c   :  { %v5221_v61 = vpop.f32.mrf.mxu1 }
 0x14d   :  { %v5215_v5 = vpop.f32.mrf.mxu0  ;;  %v941_v29 = vadd.f32 %v880_v17, %v763_v44  ;;  %v948_v37 = vadd.f32 %v5183_v0, %v770_v7  ;;  %v6220_v7 = vld [vmem:[#allocation10_spill] sm:$0xff] }
 0x14e   :  { %6202 = vst [vmem:[#allocation25_spill] sm:$0xff] %v5215_v5  ;;  %v5230_v20 = vpop.f32.mrf.mxu1 }
 0x14f   :  { %v1253_v2 = vpop.f32.mrf.mxu0  ;;  %v1119_v59 = vadd.f32 %v5161_v23, %v941_v29  ;;  %v6209_v29 = vld [vmem:[#allocation3_spill] sm:$0xff] }
 0x150   :  { %v5241_v51 = vpop.f32.mrf.mxu1 }
 0x151   :  { %v5219_v6 = vpop.f32.mrf.mxu0  ;;  %v1298_v17 = vadd.f32 %v1237_v8, %v1119_v59 }
 0x152   :  { %6204 = vst [vmem:[#allocation27_spill] sm:$0xff] %v5219_v6  ;;  %v762_v6 = vadd.f32 %v5105_v30, %v5103_v25 }
 0x153   :  { %v5223_v36 = vpop.f32.mrf.mxu0 }
 0x154   :  { %6205 = vst [vmem:[#allocation28_spill] sm:$0xff] %v5223_v36  ;;  %v379_v36 = vadd.f32 %v5093_v56, %v5091_v46  ;;  %v940_v42 = vadd.f32 %v877_v31, %v762_v6  ;;  %v766_v46 = vadd.f32 %v5117_v1, %v5115_v63  ;;  %v1120_v31 = vadd.f32 %v5153_v15, %v5151_v27 }
 0x155   :  { %v5227_v13 = vpop.f32.mrf.mxu0  ;;  %v593_v27 = vadd.f32 %v5135_v53, %v395_v35  ;;  %v6216_v35 = vld [vmem:[#allocation14_spill] sm:$0xff] }
 0x156   :  { %6206 = vst [vmem:[#allocation29_spill] sm:$0xff] %v5227_v13  ;;  %v589_v57 = vadd.f32 %v5123_v11, %v379_v36  ;;  %v1118_v30 = vadd.f32 %v5155_v32, %v940_v42  ;;  %v1299_v23 = vadd.f32 %v4319_v50, %v1120_v31  ;;  %v4578_v42 = vld [vmem:[%s6177_s2 + $0x18] sm:$0xff]   ;;  %v4580_v31 = vld [vmem:[%s6177_s2 + $0x8] sm:$0xff]  }
 0x157   :  { %v5232_v52 = vpop.f32.mrf.mxu0  ;;  %4373 = vmatprep.subr.bf16.mxu1 %v4578_v42  ;;  %4393 = vmatprep.subr.bf16.mxu0 %v4580_v31 }
 0x158   :  { %6207 = vst [vmem:[#allocation30_spill] sm:$0xff] %v5232_v52  ;;  %v5250_v52 = vpop.f32.mrf.mxu1  ;;  %v767_v11 = vadd.f32 %v5125_v12, %v589_v57  ;;  %v769_v12 = vadd.f32 %v5121_v4, %v5119_v3  ;;  %v1477_v44 = vadd.f32 %v4339_v21, %v1299_v23  ;;  %v6218_v23 = vld [vmem:[#allocation26_spill] sm:$0xff]  ;;  %4374 = vmatpush3.bf16.msra.mxu1 %v4578_v42 }
 0x159   :  { %v5234_v5 = vpop.f32.mrf.mxu0  ;;  %4394 = vmatpush3.bf16.msra.mxu0 %v4580_v31 }
 0x15a   :  { %6208 = vst [vmem:[#allocation31_spill] sm:$0xff] %v5234_v5  ;;  %v765_v5 = vadd.f32 %v5109_v33, %v5107_v58  ;;  %v944_v58 = vadd.f32 %v5167_v55, %v766_v46  ;;  %v1297_v33 = vadd.f32 %v1234_v19, %v1118_v30  ;;  %v945_v63 = vadd.f32 %v5175_v47, %v767_v11  ;;  %v5266_v1 = vpop.f32.mrf.mxu1 }
 0x15b   :  { %v5243_v39 = vpop.f32.mrf.mxu0  ;;  %v947_v22 = vadd.f32 %v5171_v34, %v769_v12 }
 0x15c   :  { %v943_v56 = vadd.f32 %v5157_v40, %v765_v5  ;;  %v1122_v55 = vadd.f32 %v5169_v28, %v944_v58  ;;  %v1475_v36 = vadd.f32 %v1412_v26, %v1297_v33  ;;  %v1476_v5 = vadd.f32 %v1415_v45, %v1298_v17  ;;  %v6214_v58 = vld [vmem:[#allocation5_spill] sm:$0xff]  ;;  %v6215_v33 = vld [vmem:[#allocation6_spill] sm:$0xff] }
 0x15d   :  { %v5246_v13 = vpop.f32.mrf.mxu0  ;;  %v1123_v47 = vadd.f32 %v5177_v48, %v945_v63  ;;  %v771_v28 = vadd.f32 %v5137_v43, %v593_v27  ;;  %v1124_v26 = vadd.f32 %v5165_v24, %v5163_v54  ;;  %v1125_v24 = vadd.f32 %v5173_v38, %v947_v22  ;;  %v6213_v38 = vld [vmem:[#allocation25_spill] sm:$0xff] }
 0x15e   :  { %v1121_v40 = vadd.f32 %v5159_v16, %v943_v56  ;;  %v5277_v16 = vpop.f32.mrf.mxu1  ;;  %v1301_v3 = vadd.f32 %v1250_v10, %v1122_v55  ;;  %v411_v10 = vadd.f32 %v5101_v41, %v5099_v18  ;;  %v6210_v18 = vld [vmem:[#allocation4_spill] sm:$0xff]  ;;  %v774_v17 = vadd.f32 %v6215_v33, %v6214_v58  ;;  %v6232_v33 = vld [vmem:[#allocation21_spill] sm:$0xff] }
 0x15f   :  { %v5252_v25 = vpop.f32.mrf.mxu0  ;;  %v1302_v48 = vadd.f32 %v1253_v2, %v1123_v47  ;;  %v1303_v43 = vadd.f32 %v5213_v60, %v1124_v26  ;;  %v773_v41 = vadd.f32 %v6210_v18, %v6209_v29  ;;  %v6212_v60 = vld [vmem:[#allocation13_spill] sm:$0xff]  ;;  %v1304_v30 = vadd.f32 %v6213_v38, %v1125_v24  ;;  %v6219_v55 = vld [vmem:[#allocation28_spill] sm:$0xff]  ;;  %v6221_v47 = vld [vmem:[#allocation11_spill] sm:$0xff] }
 0x160   :  { %v1300_v19 = vadd.f32 %v4320_v14, %v1121_v40  ;;  %v949_v14 = vadd.f32 %v5191_v62, %v771_v28  ;;  %v1447_v8 = vpop.f32.mrf.mxu1  ;;  %v1479_v0 = vadd.f32 %v5221_v61, %v1301_v3  ;;  %v6211_v62 = vld [vmem:[#allocation9_spill] sm:$0xff]  ;;  %v1126_v46 = vadd.f32 %v6212_v60, %v948_v37  ;;  %v6223_v3 = vld [vmem:[#allocation19_spill] sm:$0xff] }
 0x161   :  { %v4359_v6 = vpop.f32.mrf.mxu0  ;;  %v597_v57 = vadd.f32 %v6211_v62, %v411_v10  ;;  %v4579_v61 = vld [vmem:[%s6177_s2 + $0x10] sm:$0xff]   ;;  %v1480_v59 = vadd.f32 %v5241_v51, %v1302_v48  ;;  %v951_v63 = vadd.f32 %v6216_v35, %v773_v41  ;;  %v1481_v12 = vadd.f32 %v6218_v23, %v1303_v43  ;;  %v6225_v43 = vld [vmem:[#allocation15_spill] sm:$0xff] }
 0x162   :  { %v1478_v34 = vadd.f32 %v5211_v9, %v1300_v19  ;;  %v5288_v45 = vadd.f32 %v4359_v6, %v1477_v44  ;;  %v5324_v27 = vpop.f32.mrf.mxu1  ;;  %v1305_v19 = vadd.f32 %v6219_v55, %v1126_v46  ;;  %4375 = vmatprep.subr.bf16.mxu1 %v4579_v61  ;;  %v952_v28 = vadd.f32 %v6223_v3, %v774_v17  ;;  %v6226_v24 = vld [vmem:[#allocation23_spill] sm:$0xff]  ;;  %v6230_v46 = vld [vmem:[#allocation20_spill] sm:$0xff] }
 0x163   :  { %v1590_v32 = vpop.f32.mrf.mxu0  ;;  %v775_v22 = vadd.f32 %v6220_v7, %v597_v57  ;;  %v1482_v37 = vadd.f32 %v5230_v20, %v1304_v30  ;;  %4376 = vmatpush3.bf16.msra.mxu1 %v4579_v61  ;;  %v6227_v20 = vld [vmem:[#allocation27_spill] sm:$0xff]  ;;  %v6229_v57 = vld [vmem:[#allocation8_spill] sm:$0xff] }
 0x164   :  { %v5279_v4 = vadd.f32 %v1590_v32, %v1475_v36  ;;  %v6217_v32 = vld [vmem:[#allocation16_spill] sm:$0xff]  ;;  %v6228_v62 = vld [vmem:[#allocation7_spill] sm:$0xff]  ;;  %v1130_v38 = vadd.f32 %v6230_v46, %v952_v28 }
 0x165   :  { %v4360_v15 = vpop.f32.mrf.mxu0  ;;  %v1127_v40 = vadd.f32 %v6217_v32, %v949_v14  ;;  %v5345_v14 = vld [vmem:[%s6177_s2 + $0x28] sm:$0xff]   ;;  %v777_v60 = vadd.f32 %v6229_v57, %v6228_v62  ;;  %v6237_v3 = vld [vmem:[#allocation31_spill] sm:$0xff] }
 0x166   :  { %v5298_v9 = vadd.f32 %v4360_v15, %v1478_v34  ;;  %v4581_v15 = vld [vmem:[%s6177_s2] sm:$0xff]   ;;  %v6224_v34 = vld [vmem:[#allocation30_spill] sm:$0xff]  ;;  %4413 = vmatprep.subr.bf16.mxu1 %v5345_v14 }
 0x167   :  { %v1593_v50 = vpop.f32.mrf.mxu0  ;;  %v1306_v48 = vadd.f32 %v6224_v34, %v1127_v40  ;;  %4395 = vmatprep.subr.bf16.mxu0 %v4581_v15  ;;  %v955_v17 = vadd.f32 %v6232_v33, %v777_v60  ;;  %v1309_v40 = vadd.f32 %v5243_v39, %v1130_v38 }
 0x168   :  { %v5281_v53 = vadd.f32 %v1593_v50, %v1476_v5  ;;  %v6222_v50 = vld [vmem:[#allocation12_spill] sm:$0xff]  ;;  %4396 = vmatpush3.bf16.msra.mxu0 %v4581_v15  ;;  %v6235_v15 = vld [vmem:[#allocation18_spill] sm:$0xff] }
 0x169   :  { %v4363_v49 = vpop.f32.mrf.mxu0  ;;  %v1128_v44 = vadd.f32 %v6222_v50, %v6221_v47  ;;  %v1484_v31 = vadd.f32 %v1447_v8, %v1306_v48  ;;  %v6236_v47 = vld [vmem:[#allocation22_spill] sm:$0xff] }
 0x16a   :  { %v1669_v21 = vadd.f32 %v5281_v53, %v5279_v4  ;;  %v1133_v50 = vadd.f32 %v6236_v47, %v955_v17 }
 0x16b   :  { %v1606_v54 = vpop.f32.mrf.mxu0  ;;  %v1307_v29 = vadd.f32 %v6227_v20, %v1128_v44 }
 0x16c   :  { %v1670_v2 = vadd.f32 %v1669_v21, %v5288_v45  ;;  %v5313_v11 = vadd.f32 %v1606_v54, %v1479_v0  ;;  %v5339_v21 = vadd.f32 %v4363_v49, %v1481_v12  ;;  %v1129_v54 = vadd.f32 %v6225_v43, %v951_v63 }
 0x16d   :  { %v4364_v56 = vpop.f32.mrf.mxu0  ;;  %v953_v0 = vadd.f32 %v6226_v24, %v775_v22  ;;  %v1483_v49 = vadd.f32 %v5266_v1, %v1305_v19  ;;  %v6233_v1 = vld [vmem:[#allocation24_spill] sm:$0xff]  ;;  %v1485_v32 = vadd.f32 %v5250_v52, %v1307_v29 }
 0x16e   :  { %v1671_v6 = vadd.f32 %v1670_v2, %v5298_v9  ;;  %v1460_v2 = vpop.f32.mrf.mxu1  ;;  %v1660_v18 = vadd.f32 %v4364_v56, %v1482_v37 }
 0x16f   :  { %v1609_v51 = vpop.f32.mrf.mxu0  ;;  %v1131_v56 = vadd.f32 %v6233_v1, %v953_v0  ;;  %v1487_v28 = vadd.f32 %v1460_v2, %v1309_v40 }
 0x170   :  { %v1672_v36 = vadd.f32 %v1671_v6, %v5313_v11  ;;  %v5331_v5 = vadd.f32 %v1609_v51, %v1480_v59  ;;  %v6231_v59 = vld [vmem:[#allocation29_spill] sm:$0xff]  ;;  %v4352_v35 = vpop.f32.mrf.mxu1 }
 0x171   :  { %v4367_v26 = vpop.f32.mrf.mxu0  ;;  %v1308_v6 = vadd.f32 %v6231_v59, %v1129_v54  ;;  %v6234_v51 = vld [vmem:[#allocation17_spill] sm:$0xff] }
 0x172   :  { %v1673_v10 = vadd.f32 %v1672_v36, %v5331_v5  ;;  %v1132_v55 = vadd.f32 %v6235_v15, %v6234_v51  ;;  %v1310_v36 = vadd.f32 %v5252_v25, %v1131_v56  ;;  %v1663_v7 = vadd.f32 %v4367_v26, %v1485_v32  ;;  %v1463_v44 = vpop.f32.mrf.mxu1 }
 0x173   :  { %v1622_v42 = vpop.f32.mrf.mxu0  ;;  %v1486_v8 = vadd.f32 %v5277_v16, %v1308_v6 }
 0x174   :  { %v1674_v41 = vadd.f32 %v1673_v10, %v5339_v21  ;;  %v1661_v61 = vadd.f32 %v1622_v42, %v1483_v49  ;;  %v1311_v39 = vadd.f32 %v6237_v3, %v1132_v55  ;;  %v1312_v10 = vadd.f32 %v5246_v13, %v1133_v50  ;;  %v5375_v13 = vld [vmem:[%s6177_s2 + $0x38] sm:$0xff]  }
 0x175   :  { %v4368_v30 = vpop.f32.mrf.mxu0  ;;  %v1488_v43 = vadd.f32 %v1463_v44, %v1310_v36  ;;  %4433 = vmatprep.subr.bf16.mxu0 %v5375_v13 }
 0x176   :  { %v1675_v58 = vadd.f32 %v1674_v41, %v1660_v18  ;;  %v1664_v37 = vadd.f32 %v4368_v30, %v1486_v8  ;;  %v1489_v25 = vadd.f32 %v5324_v27, %v1311_v39  ;;  %v1490_v42 = vadd.f32 %v4352_v35, %v1312_v10 }
 0x177   :  { %v1625_v63 = vpop.f32.mrf.mxu0 }
 0x178   :  { %v1676_v23 = vadd.f32 %v1675_v58, %v1661_v61  ;;  %v5361_v12 = vadd.f32 %v1625_v63, %v1484_v31 }
 0x179   :  { %v4371_v19 = vpop.f32.mrf.mxu0 }
 0x17a   :  { %v1677_v22 = vadd.f32 %v1676_v23, %v5361_v12  ;;  %v1667_v20 = vadd.f32 %v4371_v19, %v1489_v25 }
 0x17b   :  { %v1638_v52 = vpop.f32.mrf.mxu0 }
 0x17c   :  { %v1678_v34 = vadd.f32 %v1677_v22, %v1663_v7  ;;  %v1665_v54 = vadd.f32 %v1638_v52, %v1487_v28 }
 0x17d   :  { %v4372_v48 = vpop.f32.mrf.mxu0 }
 0x17e   :  { %v1679_v16 = vadd.f32 %v1678_v34, %v1664_v37  ;;  %v1668_v49 = vadd.f32 %v4372_v48, %v1490_v42 }
 0x17f   :  { %v1641_v24 = vpop.f32.mrf.mxu0 }
 0x180   :  { %v1680_v26 = vadd.f32 %v1679_v16, %v1665_v54  ;;  %v1666_v0 = vadd.f32 %v1641_v24, %v1488_v43 }
 0x182   :  { %v1681_v29 = vadd.f32 %v1680_v26, %v1666_v0 }
 0x184   :  { %v1682_v41 = vadd.f32 %v1681_v29, %v1667_v20 }
 0x186   :  { %v1683_v62 = vadd.f32 %v1682_v41, %v1668_v49 }
 0x188   :  { %v1684_v2 = vrot.slane %v1683_v62, 4 }
 0x18a   :  { %v1685_v57 = vadd.f32 %v1684_v2, %v1683_v62 }
 0x18c   :  { %v1686_v60 = vrot.slane %v1685_v57, 2 }
 0x18e   :  { %v1687_v46 = vadd.f32 %v1686_v60, %v1685_v57 }
 0x190   :  { %v1688_v27 = vrot.slane %v1687_v46, 1 }
 0x192   :  { %v1689_v38 = vadd.f32 %v1688_v27, %v1687_v46 }
 0x194   :  { %v1690_v30 = vmul.f32 0.0078125, %v1689_v38  ;;  %v3880_v38 = vld [vmem:[%s6178_s3] ss:$0 sm:$0xff] }
 0x196   :  { %v1691_v59 = vsub.f32 %v5279_v4, %v1690_v30  ;;  %v1692_v6 = vsub.f32 %v5281_v53, %v1690_v30  ;;  %v1693_v31 = vsub.f32 %v5288_v45, %v1690_v30  ;;  %v1694_v58 = vsub.f32 %v5298_v9, %v1690_v30 }
 0x197   :  { %v1695_v33 = vsub.f32 %v5313_v11, %v1690_v30  ;;  %v1697_v17 = vsub.f32 %v5339_v21, %v1690_v30  ;;  %v1698_v1 = vsub.f32 %v1660_v18, %v1690_v30  ;;  %v1699_v56 = vsub.f32 %v1661_v61, %v1690_v30 }
 0x198   :  { %v1701_v35 = vsub.f32 %v1663_v7, %v1690_v30  ;;  %v1702_v63 = vsub.f32 %v1664_v37, %v1690_v30  ;;  %v1703_v32 = vsub.f32 %v1665_v54, %v1690_v30  ;;  %v1705_v40 = vsub.f32 %v1667_v20, %v1690_v30 }
 0x199   :  { %v1706_v23 = vsub.f32 %v1668_v49, %v1690_v30  ;;  %v1707_v51 = vmul.f32 %v1691_v59, %v1691_v59  ;;  %v1708_v15 = vmul.f32 %v1692_v6, %v1692_v6  ;;  %v1709_v4 = vmul.f32 %v1693_v31, %v1693_v31 }
 0x19a   :  { %v1696_v53 = vsub.f32 %v5331_v5, %v1690_v30  ;;  %v1710_v45 = vmul.f32 %v1694_v58, %v1694_v58  ;;  %v1711_v9 = vmul.f32 %v1695_v33, %v1695_v33  ;;  %v1713_v21 = vmul.f32 %v1697_v17, %v1697_v17 }
 0x19b   :  { %v1723_v55 = vadd.f32 %v1708_v15, %v1707_v51  ;;  %v1700_v61 = vsub.f32 %v5361_v12, %v1690_v30  ;;  %v1714_v7 = vmul.f32 %v1698_v1, %v1698_v1  ;;  %v1715_v47 = vmul.f32 %v1699_v56, %v1699_v56 }
 0x19c   :  { %v1712_v11 = vmul.f32 %v1696_v53, %v1696_v53  ;;  %v1717_v3 = vmul.f32 %v1701_v35, %v1701_v35  ;;  %v1704_v28 = vsub.f32 %v1666_v0, %v1690_v30  ;;  %v1718_v5 = vmul.f32 %v1702_v63, %v1702_v63 }
 0x19d   :  { %v1724_v19 = vadd.f32 %v1723_v55, %v1709_v4  ;;  %v1716_v44 = vmul.f32 %v1700_v61, %v1700_v61  ;;  %v1719_v34 = vmul.f32 %v1703_v32, %v1703_v32  ;;  %v1721_v54 = vmul.f32 %v1705_v40, %v1705_v40 }
 0x19e   :  { %v1720_v10 = vmul.f32 %v1704_v28, %v1704_v28  ;;  %v1722_v24 = vmul.f32 %v1706_v23, %v1706_v23 }
 0x19f   :  { %v1725_v8 = vadd.f32 %v1724_v19, %v1710_v45 }
 0x1a1   :  { %v1726_v36 = vadd.f32 %v1725_v8, %v1711_v9 }
 0x1a3   :  { %v1727_v18 = vadd.f32 %v1726_v36, %v1712_v11 }
 0x1a5   :  { %v1728_v22 = vadd.f32 %v1727_v18, %v1713_v21  ;;  %v3881_v18 = vld [vmem:[%s6178_s3 + $0x1] ss:$0 sm:$0xff] }
 0x1a7   :  { %v1729_v50 = vadd.f32 %v1728_v22, %v1714_v7 }
 0x1a9   :  { %v1730_v52 = vadd.f32 %v1729_v50, %v1715_v47 }
 0x1ab   :  { %v1731_v39 = vadd.f32 %v1730_v52, %v1716_v44 }
 0x1ad   :  { %v1732_v37 = vadd.f32 %v1731_v39, %v1717_v3 }
 0x1af   :  { %v1733_v48 = vadd.f32 %v1732_v37, %v1718_v5 }
 0x1b1   :  { %v1734_v43 = vadd.f32 %v1733_v48, %v1719_v34 }
 0x1b3   :  { %v1735_v16 = vadd.f32 %v1734_v43, %v1720_v10 }
 0x1b5   :  { %v1736_v25 = vadd.f32 %v1735_v16, %v1721_v54 }
 0x1b7   :  { %v1737_v12 = vadd.f32 %v1736_v25, %v1722_v24 }
 0x1b9   :  { %v1738_v26 = vrot.slane %v1737_v12, 4 }
 0x1bb   :  { %v1739_v42 = vadd.f32 %v1738_v26, %v1737_v12 }
 0x1bd   :  { %v1740_v20 = vrot.slane %v1739_v42, 2 }
 0x1bf   :  { %v1741_v29 = vadd.f32 %v1740_v20, %v1739_v42 }
 0x1c1   :  { %v1742_v49 = vrot.slane %v1741_v29, 1 }
 0x1c3   :  { %v1743_v41 = vadd.f32 %v1742_v49, %v1741_v29 }
 0x1c5   :  { %v1744_v62 = vmul.f32 0.0078125, %v1743_v41 }
 0x1c7   :  { %v1745_v2 = vadd.f32 1e-05, %v1744_v62 }
 0x1c9   :  { %4596 = vrsqrt.f32 %v1745_v2 }
 0x1d6   :  { %v4597_v0 = vpop.eup %4596 }
 0x1d7   :  { %v1747_v57 = vmul.f32 %v4597_v0, %v1691_v59  ;;  %v1748_v60 = vmul.f32 %v4597_v0, %v1692_v6  ;;  %v1749_v46 = vmul.f32 %v4597_v0, %v1693_v31  ;;  %v1750_v27 = vmul.f32 %v4597_v0, %v1694_v58 }
 0x1d8   :  { %v1751_v30 = vmul.f32 %v4597_v0, %v1695_v33  ;;  %v1752_v51 = vmul.f32 %v4597_v0, %v1696_v53  ;;  %v1753_v15 = vmul.f32 %v4597_v0, %v1697_v17  ;;  %v1754_v4 = vmul.f32 %v4597_v0, %v1698_v1 }
 0x1d9   :  { %v1755_v55 = vmul.f32 %v4597_v0, %v1699_v56  ;;  %v1756_v45 = vmul.f32 %v4597_v0, %v1700_v61  ;;  %v1757_v19 = vmul.f32 %v4597_v0, %v1701_v35  ;;  %v1758_v9 = vmul.f32 %v4597_v0, %v1702_v63 }
 0x1da   :  { %v1759_v8 = vmul.f32 %v4597_v0, %v1703_v32  ;;  %v1760_v11 = vmul.f32 %v4597_v0, %v1704_v28  ;;  %v1761_v36 = vmul.f32 %v4597_v0, %v1705_v40  ;;  %v1762_v21 = vmul.f32 %v4597_v0, %v1706_v23 }
 0x1db   :  { %v1767_v59 = vmul.f32 %v3880_v38, %v1747_v57  ;;  %v1768_v6 = vmul.f32 %v3880_v38, %v1748_v60  ;;  %v1769_v31 = vmul.f32 %v3880_v38, %v1749_v46  ;;  %v1770_v58 = vmul.f32 %v3880_v38, %v1750_v27 }
 0x1dc   :  { %v1771_v33 = vmul.f32 %v3880_v38, %v1751_v30  ;;  %v1772_v53 = vmul.f32 %v3880_v38, %v1752_v51  ;;  %v1773_v17 = vmul.f32 %v3880_v38, %v1753_v15  ;;  %v1774_v1 = vmul.f32 %v3880_v38, %v1754_v4  ;;  %v1835_v30 = vld [vmem:[#allocation2] sm:$0xff] }
 0x1dd   :  { %v1775_v56 = vmul.f32 %v3880_v38, %v1755_v55  ;;  %v1776_v61 = vmul.f32 %v3880_v38, %v1756_v45  ;;  %v1777_v35 = vmul.f32 %v3880_v38, %v1757_v19  ;;  %v1778_v63 = vmul.f32 %v3880_v38, %v1758_v9  ;;  %v4583_v55 = vld [vmem:[%s6177_s2 + $0x20] sm:$0xff]  }
 0x1de   :  { %v1779_v32 = vmul.f32 %v3880_v38, %v1759_v8  ;;  %v1780_v7 = vmul.f32 %v3880_v38, %v1760_v11  ;;  %v1781_v40 = vmul.f32 %v3880_v38, %v1761_v36  ;;  %v1782_v23 = vmul.f32 %v3880_v38, %v1762_v21  ;;  %v1863_v38 = vld [vmem:[#allocation2 + $0x1] sm:$0xff] }
 0x1df   :  { %v1787_v22 = vadd.f32 %v3881_v18, %v1767_v59  ;;  %v1788_v47 = vadd.f32 %v3881_v18, %v1768_v6  ;;  %v1789_v50 = vadd.f32 %v3881_v18, %v1769_v31  ;;  %v1790_v44 = vadd.f32 %v3881_v18, %v1770_v58 }
 0x1e0   :  { %v1791_v52 = vadd.f32 %v3881_v18, %v1771_v33  ;;  %v1792_v3 = vadd.f32 %v3881_v18, %v1772_v53  ;;  %v1793_v39 = vadd.f32 %v3881_v18, %v1773_v17  ;;  %v1794_v28 = vadd.f32 %v3881_v18, %v1774_v1  ;;  %v4585_v53 = vld [vmem:[%s6177_s2 + $0x30] sm:$0xff]   ;;  %v1871_v1 = vld [vmem:[#allocation2 + $0xa1] sm:$0xff] }
 0x1e1   :  { %v1795_v5 = vadd.f32 %v3881_v18, %v1775_v56  ;;  %v1796_v37 = vadd.f32 %v3881_v18, %v1776_v61  ;;  %v1797_v34 = vadd.f32 %v3881_v18, %v1777_v35  ;;  %v1798_v48 = vadd.f32 %v3881_v18, %v1778_v63  ;;  %v5468_v56 = vld [vmem:[%s6177_s2 + $0x48] sm:$0xff]  }
 0x1e2   :  { %v1799_v10 = vadd.f32 %v3881_v18, %v1779_v32  ;;  %v1800_v43 = vadd.f32 %v3881_v18, %v1780_v7  ;;  %v1801_v54 = vadd.f32 %v3881_v18, %v1781_v40  ;;  %v1802_v16 = vadd.f32 %v3881_v18, %v1782_v23  ;;  %v1843_v32 = vld [vmem:[#allocation2 + $0xa0] sm:$0xff] }
 0x1e3   :  { %v1803_v24 = vmax.f32 %v1787_v22, 0.0  ;;  %v1804_v25 = vmax.f32 %v1788_v47, 0.0  ;;  %v1805_v12 = vmax.f32 %v1789_v50, 0.0  ;;  %v1806_v26 = vmax.f32 %v1790_v44, 0.0 }
 0x1e4   :  { %v1807_v42 = vmax.f32 %v1791_v52, 0.0  ;;  %v1808_v20 = vmax.f32 %v1792_v3, 0.0  ;;  %v1809_v29 = vmax.f32 %v1793_v39, 0.0  ;;  %v1810_v49 = vmax.f32 %v1794_v28, 0.0 }
 0x1e5   :  { %v1811_v41 = vmax.f32 %v1795_v5, 0.0  ;;  %v1812_v62 = vmax.f32 %v1796_v37, 0.0  ;;  %v1813_v2 = vmax.f32 %v1797_v34, 0.0  ;;  %v1814_v0 = vmax.f32 %v1798_v48, 0.0  ;;  %1819 = vst.msk [vmem:[#allocation2 + $0x11] sm:$0xff] %vm24_vm0, %v1803_v24  ;;  %1820 = vst.msk [vmem:[#allocation2 + $0x21] sm:$0xff] %vm24_vm0, %v1804_v25 }
 0x1e6   :  { %1821 = vst.msk [vmem:[#allocation2 + $0x31] sm:$0xff] %vm24_vm0, %v1805_v12  ;;  %1822 = vst.msk [vmem:[#allocation2 + $0x41] sm:$0xff] %vm24_vm0, %v1806_v26  ;;  %v1815_v57 = vmax.f32 %v1799_v10, 0.0  ;;  %v1816_v60 = vmax.f32 %v1800_v43, 0.0  ;;  %v1817_v46 = vmax.f32 %v1801_v54, 0.0  ;;  %v1818_v27 = vmax.f32 %v1802_v16, 0.0 }
 0x1e7   :  { %1823 = vst.msk [vmem:[#allocation2 + $0x51] sm:$0xff] %vm24_vm0, %v1807_v42  ;;  %1824 = vst.msk [vmem:[#allocation2 + $0x61] sm:$0xff] %vm24_vm0, %v1808_v20  ;;  %v2158_v12 = vld [vmem:[#allocation2 + $0x2] sm:$0xff] }
 0x1e8   :  { %1825 = vst.msk [vmem:[#allocation2 + $0x71] sm:$0xff] %vm24_vm0, %v1809_v29  ;;  %1826 = vst.msk [vmem:[#allocation2 + $0x81] sm:$0xff] %vm24_vm0, %v1810_v49 }
 0x1e9   :  { %1827 = vst.msk [vmem:[#allocation2 + $0xb1] sm:$0xff] %vm24_vm0, %v1811_v41  ;;  %1828 = vst.msk [vmem:[#allocation2 + $0xc1] sm:$0xff] %vm24_vm0, %v1812_v62 }
 0x1ea   :  { %1829 = vst.msk [vmem:[#allocation2 + $0xd1] sm:$0xff] %vm24_vm0, %v1813_v2  ;;  %1830 = vst.msk [vmem:[#allocation2 + $0xe1] sm:$0xff] %vm24_vm0, %v1814_v0 }
 0x1eb   :  { %1831 = vst.msk [vmem:[#allocation2 + $0xf1] sm:$0xff] %vm24_vm0, %v1815_v57  ;;  %1832 = vst.msk [vmem:[#allocation2 + $0x101] sm:$0xff] %vm24_vm0, %v1816_v60 }
 0x1ec   :  { %1833 = vst.msk [vmem:[#allocation2 + $0x111] sm:$0xff] %vm24_vm0, %v1817_v46  ;;  %1834 = vst.msk [vmem:[#allocation2 + $0x121] sm:$0xff] %vm24_vm0, %v1818_v27  ;;  %v5408_v51 = vld [vmem:[#allocation2 + $0x11] sm:$0xff]  ;;  %v5412_v4 = vld [vmem:[#allocation2 + $0x21] sm:$0xff] }
 0x1ed   :  { %v5410_v15 = vld [vmem:[#allocation2 + $0x10] sm:$0xff]  ;;  %v1879_v45 = vpack.c.bf16 %v5408_v51, %v1863_v38  ;;  %v5421_v8 = vld [vmem:[#allocation2 + $0x20] sm:$0xff] }
 0x1ee   :  { %v1851_v19 = vpack.c.bf16 %v5410_v15, %v1835_v30  ;;  %v5419_v9 = vld [vmem:[#allocation2 + $0x31] sm:$0xff]  ;;  %v5433_v59 = vld [vmem:[#allocation2 + $0x41] sm:$0xff]  ;;  %v2352_v49 = vpack.c.bf16 %v5421_v8, %v5410_v15 }
 0x1ef   :  { %v5423_v11 = vld [vmem:[#allocation2 + $0x30] sm:$0xff]  ;;  %v5427_v36 = vpack.c.bf16 %v5419_v9, %v5412_v4  ;;  %v5437_v31 = vld [vmem:[#allocation2 + $0x40] sm:$0xff]  ;;  %4377 = vmatprep.mubr.msk.bf16.mxu1 %vm24_vm0, %v1879_v45  ;;  %v4590_v15 = vld [vmem:[%s6177_s2 + $0x68] sm:$0xff]  }
 0x1f0   :  { %v5431_v21 = vpack.c.bf16 %v5423_v11, %v5421_v8  ;;  %v5435_v6 = vld [vmem:[#allocation2 + $0x51] sm:$0xff]  ;;  %4397 = vmatprep.mubr.msk.bf16.mxu0 %vm24_vm0, %v1851_v19  ;;  %v5463_v17 = vld [vmem:[#allocation2 + $0x61] sm:$0xff]  ;;  %v2353_v60 = vpack.c.bf16 %v5437_v31, %v5423_v11 }
 0x1f1   :  { %v5443_v58 = vpack.c.bf16 %v5435_v6, %v5433_v59  ;;  %v5445_v18 = vld [vmem:[#allocation2 + $0x50] sm:$0xff]  ;;  %4378 = vmatmul.mubr.msk.bf16.vlgmr.msra.gmra.mxu1 %vm24_vm0, %v5427_v36  ;;  %v5472_v35 = vld [vmem:[#allocation2 + $0x60] sm:$0xff] }
 0x1f2   :  { %4398 = vmatmul.mubr.msk.bf16.vlgmr.msra.gmra.mxu0 %vm24_vm0, %v5431_v21  ;;  %v5453_v33 = vpack.c.bf16 %v5445_v18, %v5437_v31  ;;  %4414 = vmatpush3.bf16.msra.mxu1 %v5345_v14  ;;  %v5470_v61 = vld [vmem:[#allocation2 + $0x71] sm:$0xff]  ;;  %v5501_v50 = vld [vmem:[#allocation2 + $0xc1] sm:$0xff]  ;;  %v2354_v38 = vpack.c.bf16 %v5472_v35, %v5445_v18 }
 0x1f3   :  { %4381 = vmatprep.mubr.msk.bf16.mxu1 %vm24_vm0, %v5443_v58  ;;  %4415 = vmatprep.subr.bf16.mxu1 %v4583_v55  ;;  %v5474_v14 = vld [vmem:[#allocation2 + $0x70] sm:$0xff]  ;;  %v5483_v40 = vpack.c.bf16 %v5470_v61, %v5463_v17  ;;  %v5505_v52 = vld [vmem:[#allocation2 + $0xc0] sm:$0xff] }
 0x1f4   :  { %4401 = vmatprep.mubr.msk.bf16.mxu0 %vm24_vm0, %v5453_v33  ;;  %4434 = vmatpush3.bf16.msra.mxu0 %v5375_v13  ;;  %v5477_v63 = vld [vmem:[#allocation2 + $0xb1] sm:$0xff]  ;;  %v5487_v23 = vpack.c.bf16 %v5474_v14, %v5472_v35  ;;  %v5509_v39 = vld [vmem:[#allocation2 + $0xe1] sm:$0xff] }
 0x1f5   :  { %v5479_v7 = vld [vmem:[#allocation2 + $0xb0] sm:$0xff]  ;;  %4435 = vmatprep.subr.bf16.mxu0 %v4585_v53  ;;  %v4588_v13 = vld [vmem:[%s6177_s2 + $0x58] sm:$0xff]   ;;  %v1883_v22 = vpack.c.bf16 %v5477_v63, %v1871_v1  ;;  %v5513_v5 = vld [vmem:[#allocation2 + $0xe0] sm:$0xff] }
 0x1f6   :  { %4416 = vmatpush3.bf16.msra.mxu1 %v4583_v55  ;;  %v1855_v47 = vpack.c.bf16 %v5479_v7, %v1843_v32  ;;  %v5503_v44 = vld [vmem:[#allocation2 + $0xd1] sm:$0xff]  ;;  %v5541_v54 = vld [vmem:[#allocation2 + $0x101] sm:$0xff] }
 0x1f7   :  { %4453 = vmatprep.subr.bf16.mxu1 %v5468_v56  ;;  %v5507_v3 = vld [vmem:[#allocation2 + $0xd0] sm:$0xff]  ;;  %v5519_v34 = vpack.c.bf16 %v5503_v44, %v5501_v50  ;;  %v1849_v24 = vld [vmem:[#allocation2 + $0x100] sm:$0xff] }
 0x1f8   :  { %4436 = vmatpush3.bf16.msra.mxu0 %v4585_v53  ;;  %v5511_v28 = vld [vmem:[#allocation2 + $0xf1] sm:$0xff]  ;;  %v5523_v48 = vpack.c.bf16 %v5507_v3, %v5505_v52  ;;  %v2160_v41 = vld [vmem:[#allocation2 + $0x22] sm:$0xff] }
 0x1f9   :  { %4382 = vmatmul.mubr.msk.bf16.gmra.mxu1 %vm24_vm0, %v5483_v40  ;;  %4473 = vmatprep.subr.bf16.mxu0 %v4588_v13  ;;  %v5515_v37 = vld [vmem:[#allocation2 + $0xf0] sm:$0xff]  ;;  %v5527_v10 = vpack.c.bf16 %v5511_v28, %v5509_v39  ;;  %v5567_v2 = vld [vmem:[#allocation2 + $0x42] sm:$0xff]  ;;  %v4592_v53 = vld [vmem:[%s6177_s2 + $0x78] sm:$0xff]  }
 0x1fa   :  { %4402 = vmatmul.mubr.msk.bf16.gmra.mxu0 %vm24_vm0, %v5487_v23  ;;  %4385 = vmatprep.mubr.msk.bf16.mxu1 %vm24_vm0, %v1883_v22  ;;  %v5531_v43 = vpack.c.bf16 %v5515_v37, %v5513_v5  ;;  %v5543_v16 = vld [vmem:[#allocation2 + $0x111] sm:$0xff]  ;;  %v4587_v46 = vld [vmem:[%s6177_s2 + $0x40] sm:$0xff]  }
 0x1fb   :  { %4405 = vmatprep.mubr.msk.bf16.mxu0 %vm24_vm0, %v1855_v47  ;;  %v5545_v25 = vld [vmem:[#allocation2 + $0x110] sm:$0xff]  ;;  %v5551_v42 = vpack.c.bf16 %v5543_v16, %v5541_v54  ;;  %v2164_v55 = vld [vmem:[#allocation2 + $0x62] sm:$0xff] }
 0x1fc   :  { %v5547_v26 = vld [vmem:[#allocation2 + $0x12] sm:$0xff]  ;;  %v5554_v20 = vpack.c.bf16 %v5545_v25, %v1849_v24  ;;  %v5600_v19 = vld [vmem:[#allocation2 + $0x80] sm:$0xff] }
 0x1fd   :  { %v2174_v29 = vpack.c.bf16 %v5547_v26, %v2158_v12  ;;  %v5565_v62 = vld [vmem:[#allocation2 + $0x32] sm:$0xff]  ;;  %v2166_v8 = vld [vmem:[#allocation2 + $0xa2] sm:$0xff]  ;;  %v2355_v18 = vpack.c.bf16 %v5600_v19, %v5474_v14 }
 0x1fe   :  { %v5569_v0 = vld [vmem:[#allocation2 + $0x52] sm:$0xff]  ;;  %v5572_v57 = vpack.c.bf16 %v5565_v62, %v2160_v41  ;;  %v2168_v35 = vld [vmem:[#allocation2 + $0xc2] sm:$0xff] }
 0x1ff   :  { %v5581_v27 = vpack.c.bf16 %v5569_v0, %v5567_v2  ;;  %v4589_v30 = vld [vmem:[%s6177_s2 + $0x50] sm:$0xff]   ;;  %v2170_v32 = vld [vmem:[#allocation2 + $0xe2] sm:$0xff] }
 0x200   :  { %v5598_v45 = vld [vmem:[#allocation2 + $0x72] sm:$0xff]  ;;  %v2172_v12 = vld [vmem:[#allocation2 + $0x102] sm:$0xff] }
 0x201   :  { %4386 = vmatmul.mubr.msk.bf16.gmra.mxu1 %vm24_vm0, %v5519_v34  ;;  %v5602_v11 = vld [vmem:[#allocation2 + $0xb2] sm:$0xff]  ;;  %v5605_v31 = vpack.c.bf16 %v5598_v45, %v2164_v55 }
 0x202   :  { %4406 = vmatmul.mubr.msk.bf16.gmra.mxu0 %vm24_vm0, %v5523_v48  ;;  %4389 = vmatprep.mubr.msk.bf16.mxu1 %vm24_vm0, %v5527_v10  ;;  %v2178_v1 = vpack.c.bf16 %v5602_v11, %v2166_v8  ;;  %v2169_v14 = vld [vmem:[#allocation2 + $0xd2] sm:$0xff] }
 0x203   :  { %4409 = vmatprep.mubr.msk.bf16.mxu0 %vm24_vm0, %v5531_v43  ;;  %v5620_v22 = vpack.c.bf16 %v2169_v14, %v2168_v35 }
 0x209   :  { %4390 = vmatmul.mubr.msk.bf16.gmra.mxu1 %vm24_vm0, %v5551_v42 }
 0x20a   :  { %4410 = vmatmul.mubr.msk.bf16.gmra.mxu0 %vm24_vm0, %v5554_v20  ;;  %4417 = vmatprep.mubr.msk.bf16.mxu1 %vm24_vm0, %v2174_v29  ;;  %v2173_v29 = vld [vmem:[#allocation2 + $0x112] sm:$0xff] }
 0x20b   :  { %4437 = vmatprep.mubr.msk.bf16.mxu0 %vm24_vm0, %v2352_v49  ;;  %v5633_v49 = vld [vmem:[#allocation2 + $0x120] sm:$0xff] }
 0x211   :  { %4418 = vmatmul.mubr.msk.bf16.vlgmr.msra.gmra.mxu1 %vm24_vm0, %v5572_v57 }
 0x212   :  { %4438 = vmatmul.mubr.msk.bf16.vlgmr.msra.gmra.mxu0 %vm24_vm0, %v2353_v60  ;;  %4454 = vmatpush3.bf16.msra.mxu1 %v5468_v56  ;;  %v2356_v56 = vpack.c.bf16 %v5505_v52, %v5479_v7  ;;  %v2357_v7 = vpack.c.bf16 %v5513_v5, %v5507_v3  ;;  %v2358_v52 = vpack.c.bf16 %v1849_v24, %v5515_v37 }
 0x213   :  { %4421 = vmatprep.mubr.msk.bf16.mxu1 %vm24_vm0, %v5581_v27  ;;  %4441 = vmatprep.mubr.msk.bf16.mxu0 %vm24_vm0, %v2354_v38  ;;  %v5635_v60 = vpack.c.bf16 %v2173_v29, %v2172_v12  ;;  %v2359_v3 = vpack.c.bf16 %v5633_v49, %v5545_v25  ;;  %v2530_v5 = vpack.c.bf16 %v5412_v4, %v5408_v51  ;;  %v4591_v51 = vld [vmem:[%s6177_s2 + $0x60] sm:$0xff]  }
 0x214   :  { %4455 = vmatprep.subr.bf16.mxu1 %v4587_v46  ;;  %4474 = vmatpush3.bf16.msra.mxu0 %v4588_v13  ;;  %v2171_v13 = vld [vmem:[#allocation2 + $0xf2] sm:$0xff]  ;;  %v2708_v37 = vpack.c.bf16 %v2160_v41, %v5547_v26  ;;  %v2531_v24 = vpack.c.bf16 %v5433_v59, %v5419_v9  ;;  %v2709_v25 = vpack.c.bf16 %v5567_v2, %v5565_v62  ;;  %v4594_v59 = vld [vmem:[%s6177_s2 + $0x88] sm:$0xff]  }
 0x215   :  { %4475 = vmatprep.subr.bf16.mxu0 %v4589_v30  ;;  %v5624_v47 = vpack.c.bf16 %v2171_v13, %v2170_v32  ;;  %v2532_v4 = vpack.c.bf16 %v5463_v17, %v5435_v6  ;;  %v2710_v26 = vpack.c.bf16 %v2164_v55, %v5569_v0  ;;  %v4593_v9 = vld [vmem:[%s6177_s2 + $0x70] sm:$0xff]   ;;  %v2521_v6 = vld [vmem:[#allocation2 + $0x81] sm:$0xff]  ;;  %v2534_v2 = vpack.c.bf16 %v5501_v50, %v5477_v63 }
 0x216   :  { %4456 = vmatpush3.bf16.msra.mxu1 %v4587_v46  ;;  %v2699_v17 = vld [vmem:[#allocation2 + $0x82] sm:$0xff]  ;;  %v2533_v41 = vpack.c.bf16 %v2521_v6, %v5470_v61  ;;  %v2712_v0 = vpack.c.bf16 %v2168_v35, %v5602_v11  ;;  %v2535_v61 = vpack.c.bf16 %v5509_v39, %v5503_v44  ;;  %v2713_v46 = vpack.c.bf16 %v2170_v32, %v2169_v14 }
 0x217   :  { %4493 = vmatprep.subr.bf16.mxu1 %v4590_v15  ;;  %v2711_v62 = vpack.c.bf16 %v2699_v17, %v5598_v45  ;;  %v2536_v38 = vpack.c.bf16 %v5541_v54, %v5511_v28  ;;  %v2529_v63 = vld [vmem:[#allocation2 + $0x121] sm:$0xff] }
 0x218   :  { %4476 = vmatpush3.bf16.msra.mxu0 %v4589_v30  ;;  %v2714_v30 = vpack.c.bf16 %v2172_v12, %v2171_v13  ;;  %v2707_v50 = vld [vmem:[#allocation2 + $0x122] sm:$0xff] }
 0x219   :  { %4422 = vmatmul.mubr.msk.bf16.gmra.mxu1 %vm24_vm0, %v5605_v31  ;;  %4513 = vmatprep.subr.bf16.mxu0 %v4592_v53  ;;  %v2715_v55 = vpack.c.bf16 %v2707_v50, %v2173_v29  ;;  %v4595_v44 = vld [vmem:[%s6177_s2 + $0x80] sm:$0xff]  }
 0x21a   :  { %4442 = vmatmul.mubr.msk.bf16.gmra.mxu0 %vm24_vm0, %v2355_v18  ;;  %4425 = vmatprep.mubr.msk.bf16.mxu1 %vm24_vm0, %v2178_v1 }
 0x21b   :  { %4445 = vmatprep.mubr.msk.bf16.mxu0 %vm24_vm0, %v2356_v56 }
 0x221   :  { %4426 = vmatmul.mubr.msk.bf16.gmra.mxu1 %vm24_vm0, %v5620_v22 }
 0x222   :  { %4446 = vmatmul.mubr.msk.bf16.gmra.mxu0 %vm24_vm0, %v2357_v7  ;;  %4429 = vmatprep.mubr.msk.bf16.mxu1 %vm24_vm0, %v5624_v47 }
 0x223   :  { %4449 = vmatprep.mubr.msk.bf16.mxu0 %vm24_vm0, %v2358_v52 }
 0x229   :  { %4430 = vmatmul.mubr.msk.bf16.gmra.mxu1 %vm24_vm0, %v5635_v60 }
 0x22a   :  { %4450 = vmatmul.mubr.msk.bf16.gmra.mxu0 %vm24_vm0, %v2359_v3  ;;  %4457 = vmatprep.mubr.msk.bf16.mxu1 %vm24_vm0, %v2530_v5 }
 0x22b   :  { %4477 = vmatprep.mubr.msk.bf16.mxu0 %vm24_vm0, %v2708_v37 }
 0x231   :  { %4458 = vmatmul.mubr.msk.bf16.vlgmr.msra.gmra.mxu1 %vm24_vm0, %v2531_v24 }
 0x232   :  { %4478 = vmatmul.mubr.msk.bf16.vlgmr.msra.gmra.mxu0 %vm24_vm0, %v2709_v25  ;;  %4494 = vmatpush3.bf16.msra.mxu1 %v4590_v15  ;;  %v2537_v15 = vpack.c.bf16 %v2529_v63, %v5543_v16 }
 0x233   :  { %4461 = vmatprep.mubr.msk.bf16.mxu1 %vm24_vm0, %v2532_v4  ;;  %4481 = vmatprep.mubr.msk.bf16.mxu0 %vm24_vm0, %v2710_v26 }
 0x234   :  { %4495 = vmatprep.subr.bf16.mxu1 %v4591_v51  ;;  %4514 = vmatpush3.bf16.msra.mxu0 %v4592_v53 }
 0x235   :  { %4515 = vmatprep.subr.bf16.mxu0 %v4593_v9 }
 0x236   :  { %4496 = vmatpush3.bf16.msra.mxu1 %v4591_v51 }
 0x237   :  { %4533 = vmatprep.subr.bf16.mxu1 %v4594_v59 }
 0x238   :  { %4516 = vmatpush3.bf16.msra.mxu0 %v4593_v9 }
 0x239   :  { %4462 = vmatmul.mubr.msk.bf16.gmra.mxu1 %vm24_vm0, %v2533_v41 }
 0x23a   :  { %4482 = vmatmul.mubr.msk.bf16.gmra.mxu0 %vm24_vm0, %v2711_v62  ;;  %4465 = vmatprep.mubr.msk.bf16.mxu1 %vm24_vm0, %v2534_v2 }
 0x23b   :  { %4485 = vmatprep.mubr.msk.bf16.mxu0 %vm24_vm0, %v2712_v0 }
 0x241   :  { %4466 = vmatmul.mubr.msk.bf16.gmra.mxu1 %vm24_vm0, %v2535_v61 }
 0x242   :  { %4486 = vmatmul.mubr.msk.bf16.gmra.mxu0 %vm24_vm0, %v2713_v46  ;;  %4469 = vmatprep.mubr.msk.bf16.mxu1 %vm24_vm0, %v2536_v38 }
 0x243   :  { %4489 = vmatprep.mubr.msk.bf16.mxu0 %vm24_vm0, %v2714_v30 }
 0x249   :  { %4470 = vmatmul.mubr.msk.bf16.gmra.mxu1 %vm24_vm0, %v2537_v15 }
 0x24a   :  { %4490 = vmatmul.mubr.msk.bf16.gmra.mxu0 %vm24_vm0, %v2715_v55  ;;  %4497 = vmatprep.mubr.msk.bf16.mxu1 %vm24_vm0, %v5431_v21  ;;  %v2877_v21 = vld [vmem:[#allocation2 + $0x90] sm:$0xff] }
 0x24b   :  { %4517 = vmatprep.mubr.msk.bf16.mxu0 %vm24_vm0, %v5427_v36  ;;  %v3055_v36 = vld [vmem:[#allocation2 + $0x91] sm:$0xff]  ;;  %v2889_v39 = vpack.c.bf16 %v2877_v21, %v5600_v19 }
 0x24c   :  { %v3067_v28 = vpack.c.bf16 %v3055_v36, %v2521_v6 }
 0x251   :  { %4498 = vmatmul.mubr.msk.bf16.vlgmr.msra.gmra.mxu1 %vm24_vm0, %v5453_v33  ;;  %v3063_v33 = vld [vmem:[#allocation2 + $0x131] sm:$0xff] }
 0x252   :  { %4518 = vmatmul.mubr.msk.bf16.vlgmr.msra.gmra.mxu0 %vm24_vm0, %v5443_v58  ;;  %4534 = vmatpush3.bf16.msra.mxu1 %v4594_v59  ;;  %v2885_v58 = vld [vmem:[#allocation2 + $0x130] sm:$0xff] }
 0x253   :  { %4501 = vmatprep.mubr.msk.bf16.mxu1 %vm24_vm0, %v5487_v23  ;;  %4521 = vmatprep.mubr.msk.bf16.mxu0 %vm24_vm0, %v5483_v40  ;;  %v2893_v40 = vpack.c.bf16 %v2885_v58, %v5633_v49  ;;  %v3071_v23 = vpack.c.bf16 %v3063_v33, %v2529_v63 }
 0x254   :  { %4535 = vmatprep.subr.bf16.mxu1 %v4595_v44 }
 0x256   :  { %4536 = vmatpush3.bf16.msra.mxu1 %v4595_v44 }
 0x259   :  { %4502 = vmatmul.mubr.msk.bf16.gmra.mxu1 %vm24_vm0, %v2889_v39 }
 0x25a   :  { %4522 = vmatmul.mubr.msk.bf16.gmra.mxu0 %vm24_vm0, %v3067_v28  ;;  %4505 = vmatprep.mubr.msk.bf16.mxu1 %vm24_vm0, %v5523_v48 }
 0x25b   :  { %4525 = vmatprep.mubr.msk.bf16.mxu0 %vm24_vm0, %v5519_v34  ;;  %v3233_v34 = vld [vmem:[#allocation2 + $0x92] sm:$0xff] }
 0x25c   :  { %v3245_v48 = vpack.c.bf16 %v3233_v34, %v2699_v17 }
 0x261   :  { %4506 = vmatmul.mubr.msk.bf16.gmra.mxu1 %vm24_vm0, %v5531_v43 }
 0x262   :  { %4526 = vmatmul.mubr.msk.bf16.gmra.mxu0 %vm24_vm0, %v5527_v10  ;;  %4509 = vmatprep.mubr.msk.bf16.mxu1 %vm24_vm0, %v5554_v20  ;;  %v3241_v10 = vld [vmem:[#allocation2 + $0x132] sm:$0xff] }
 0x263   :  { %4529 = vmatprep.mubr.msk.bf16.mxu0 %vm24_vm0, %v5551_v42  ;;  %v3249_v43 = vpack.c.bf16 %v3241_v10, %v2707_v50 }
 0x269   :  { %4510 = vmatmul.mubr.msk.bf16.gmra.mxu1 %vm24_vm0, %v2893_v40 }
 0x26a   :  { %4530 = vmatmul.mubr.msk.bf16.gmra.mxu0 %vm24_vm0, %v3071_v23  ;;  %4537 = vmatprep.mubr.msk.bf16.mxu1 %vm24_vm0, %v5572_v57 }
 0x271   :  { %4538 = vmatmul.mubr.msk.bf16.vlgmr.msra.gmra.mxu1 %vm24_vm0, %v5581_v27 }
 0x272   :  { %4541 = vmatprep.mubr.msk.bf16.mxu1 %vm24_vm0, %v5605_v31 }
 0x279   :  { %4542 = vmatmul.mubr.msk.bf16.gmra.mxu1 %vm24_vm0, %v3245_v48 }
 0x27a   :  { %4545 = vmatprep.mubr.msk.bf16.mxu1 %vm24_vm0, %v5620_v22 }
 0x281   :  { %4546 = vmatmul.mubr.msk.bf16.gmra.mxu1 %vm24_vm0, %v5624_v47 }
 0x282   :  { %4549 = vmatprep.mubr.msk.bf16.mxu1 %vm24_vm0, %v5635_v60 }
 0x289   :  { %4550 = vmatmul.mubr.msk.bf16.gmra.mxu1 %vm24_vm0, %v3249_v43 }
 0x2b1   :  { %v4379_v54 = vpop.f32.mrf.mxu1 }
 0x2b2   :  { %v4399_v16 = vpop.f32.mrf.mxu0 }
 0x2b3   :  { %v2104_v42 = vadd.f32 %v4399_v16, %v4379_v54  ;;  %v1962_v20 = vpop.f32.mrf.mxu1 }
 0x2b4   :  { %v2095_v57 = vpop.f32.mrf.mxu0 }
 0x2b5   :  { %v2096_v27 = vadd.f32 %v2095_v57, %v1962_v20  ;;  %v4380_v45 = vpop.f32.mrf.mxu1 }
 0x2b6   :  { %v4400_v19 = vpop.f32.mrf.mxu0 }
 0x2b7   :  { %v2107_v8 = vadd.f32 %v4400_v19, %v4380_v45  ;;  %v1965_v11 = vpop.f32.mrf.mxu1 }
 0x2b8   :  { %v2098_v31 = vpop.f32.mrf.mxu0 }
 0x2b9   :  { %v2099_v18 = vadd.f32 %v2098_v31, %v1965_v11  ;;  %v4383_v53 = vpop.f32.mrf.mxu1 }
 0x2ba   :  { %v4403_v1 = vpop.f32.mrf.mxu0 }
 0x2bb   :  { %v2120_v56 = vadd.f32 %v4403_v1, %v4383_v53  ;;  %v1978_v35 = vpop.f32.mrf.mxu1 }
 0x2bc   :  { %v2111_v14 = vpop.f32.mrf.mxu0 }
 0x2bd   :  { %v2112_v32 = vadd.f32 %v2111_v14, %v1978_v35  ;;  %v4384_v13 = vpop.f32.mrf.mxu1 }
 0x2be   :  { %v4404_v22 = vpop.f32.mrf.mxu0 }
 0x2bf   :  { %v2123_v7 = vadd.f32 %v4404_v22, %v4384_v13  ;;  %v1981_v47 = vpop.f32.mrf.mxu1 }
 0x2c0   :  { %v2114_v52 = vpop.f32.mrf.mxu0 }
 0x2c1   :  { %v2115_v12 = vadd.f32 %v2114_v52, %v1981_v47  ;;  %v4387_v29 = vpop.f32.mrf.mxu1 }
 0x2c2   :  { %v4407_v49 = vpop.f32.mrf.mxu0 }
 0x2c3   :  { %v2136_v60 = vadd.f32 %v4407_v49, %v4387_v29  ;;  %v1994_v3 = vpop.f32.mrf.mxu1 }
 0x2c4   :  { %v2127_v5 = vpop.f32.mrf.mxu0 }
 0x2c5   :  { %v2128_v37 = vadd.f32 %v2127_v5, %v1994_v3  ;;  %v4388_v24 = vpop.f32.mrf.mxu1 }
 0x2c6   :  { %v4408_v25 = vpop.f32.mrf.mxu0 }
 0x2c7   :  { %v2139_v51 = vadd.f32 %v4408_v25, %v4388_v24  ;;  %v1997_v4 = vpop.f32.mrf.mxu1 }
 0x2c8   :  { %v2130_v26 = vpop.f32.mrf.mxu0 }
 0x2c9   :  { %v2131_v9 = vadd.f32 %v2130_v26, %v1997_v4  ;;  %v4391_v59 = vpop.f32.mrf.mxu1 }
 0x2ca   :  { %v4411_v6 = vpop.f32.mrf.mxu0 }
 0x2cb   :  { %v2152_v17 = vadd.f32 %v4411_v6, %v4391_v59  ;;  %v2010_v41 = vpop.f32.mrf.mxu1 }
 0x2cc   :  { %v2143_v62 = vpop.f32.mrf.mxu0 }
 0x2cd   :  { %v2144_v2 = vadd.f32 %v2143_v62, %v2010_v41  ;;  %v4392_v0 = vpop.f32.mrf.mxu1 }
 0x2ce   :  { %v4412_v61 = vpop.f32.mrf.mxu0 }
 0x2cf   :  { %v2155_v46 = vadd.f32 %v4412_v61, %v4392_v0  ;;  %v2013_v38 = vpop.f32.mrf.mxu1 }
 0x2d0   :  { %v2146_v30 = vpop.f32.mrf.mxu0 }
 0x2d1   :  { %v2147_v63 = vadd.f32 %v2146_v30, %v2013_v38  ;;  %v4419_v50 = vpop.f32.mrf.mxu1 }
 0x2d2   :  { %v4439_v15 = vpop.f32.mrf.mxu0  ;;  %v2322_v55 = vadd.f32 %v4419_v50, %v2104_v42 }
 0x2d3   :  { %v2257_v44 = vpop.f32.mrf.mxu1 }
 0x2d4   :  { %v5734_v21 = vpop.f32.mrf.mxu0  ;;  %v2500_v36 = vadd.f32 %v4439_v15, %v2322_v55  ;;  %v5736_v39 = vadd.f32 %v2257_v44, %v2096_v27 }
 0x2d5   :  { %v4420_v28 = vpop.f32.mrf.mxu1 }
 0x2d6   :  { %v5738_v58 = vpop.f32.mrf.mxu0  ;;  %v5740_v33 = vadd.f32 %v4420_v28, %v2107_v8 }
 0x2d7   :  { %v2260_v40 = vpop.f32.mrf.mxu1 }
 0x2d8   :  { %v5742_v23 = vpop.f32.mrf.mxu0  ;;  %v5744_v34 = vadd.f32 %v2260_v40, %v2099_v18 }
 0x2d9   :  { %v4423_v48 = vpop.f32.mrf.mxu1 }
 0x2da   :  { %v4443_v10 = vpop.f32.mrf.mxu0  ;;  %v2326_v43 = vadd.f32 %v4423_v48, %v2120_v56 }
 0x2db   :  { %v2273_v54 = vpop.f32.mrf.mxu1 }
 0x2dc   :  { %v5746_v16 = vpop.f32.mrf.mxu0  ;;  %v2504_v42 = vadd.f32 %v4443_v10, %v2326_v43  ;;  %v5748_v20 = vadd.f32 %v2273_v54, %v2112_v32 }
 0x2dd   :  { %v4424_v57 = vpop.f32.mrf.mxu1 }
 0x2de   :  { %v5750_v27 = vpop.f32.mrf.mxu0  ;;  %v5752_v45 = vadd.f32 %v4424_v57, %v2123_v7 }
 0x2df   :  { %v2276_v19 = vpop.f32.mrf.mxu1 }
 0x2e0   :  { %v5754_v8 = vpop.f32.mrf.mxu0  ;;  %v5756_v11 = vadd.f32 %v2276_v19, %v2115_v12 }
 0x2e1   :  { %v4427_v31 = vpop.f32.mrf.mxu1 }
 0x2e2   :  { %v4447_v18 = vpop.f32.mrf.mxu0  ;;  %v2330_v53 = vadd.f32 %v4427_v31, %v2136_v60 }
 0x2e3   :  { %v2289_v1 = vpop.f32.mrf.mxu1 }
 0x2e4   :  { %v5758_v56 = vpop.f32.mrf.mxu0  ;;  %v2508_v35 = vadd.f32 %v4447_v18, %v2330_v53  ;;  %v5760_v14 = vadd.f32 %v2289_v1, %v2128_v37 }
 0x2e5   :  { %v4428_v32 = vpop.f32.mrf.mxu1 }
 0x2e6   :  { %v5762_v13 = vpop.f32.mrf.mxu0  ;;  %v5764_v22 = vadd.f32 %v4428_v32, %v2139_v51 }
 0x2e7   :  { %v2292_v7 = vpop.f32.mrf.mxu1 }
 0x2e8   :  { %v5766_v47 = vpop.f32.mrf.mxu0  ;;  %v5768_v52 = vadd.f32 %v2292_v7, %v2131_v9 }
 0x2e9   :  { %v4431_v12 = vpop.f32.mrf.mxu1 }
 0x2ea   :  { %v4451_v29 = vpop.f32.mrf.mxu0  ;;  %v2334_v49 = vadd.f32 %v4431_v12, %v2152_v17 }
 0x2eb   :  { %v2305_v60 = vpop.f32.mrf.mxu1 }
 0x2ec   :  { %v5770_v3 = vpop.f32.mrf.mxu0  ;;  %v2512_v5 = vadd.f32 %v4451_v29, %v2334_v49  ;;  %v5772_v24 = vadd.f32 %v2305_v60, %v2144_v2 }
 0x2ed   :  { %v4432_v37 = vpop.f32.mrf.mxu1 }
 0x2ee   :  { %v5774_v25 = vpop.f32.mrf.mxu0  ;;  %v5776_v4 = vadd.f32 %v4432_v37, %v2155_v46 }
 0x2ef   :  { %6238 = vst [vmem:[#allocation3_spill] sm:$0xff] %v5774_v25  ;;  %v2308_v51 = vpop.f32.mrf.mxu1 }
 0x2f0   :  { %6239 = vst [vmem:[#allocation4_spill] sm:$0xff] %v5776_v4  ;;  %v5778_v26 = vpop.f32.mrf.mxu0  ;;  %v5780_v59 = vadd.f32 %v2308_v51, %v2147_v63 }
 0x2f1   :  { %6240 = vst [vmem:[#allocation9_spill] sm:$0xff] %v5778_v26  ;;  %v4459_v9 = vpop.f32.mrf.mxu1  ;;  %v2499_v26 = vadd.f32 %v5742_v23, %v5744_v34  ;;  %v2503_v23 = vadd.f32 %v5754_v8, %v5756_v11 }
 0x2f2   :  { %6241 = vst [vmem:[#allocation13_spill] sm:$0xff] %v5780_v59  ;;  %v5782_v6 = vpop.f32.mrf.mxu0  ;;  %v5784_v17 = vadd.f32 %v4459_v9, %v2500_v36 }
 0x2f3   :  { %v2613_v41 = vpop.f32.mrf.mxu1 }
 0x2f4   :  { %v2791_v62 = vpop.f32.mrf.mxu0 }
 0x2f5   :  { %v4460_v0 = vpop.f32.mrf.mxu1 }
 0x2f6   :  { %v5786_v2 = vpop.f32.mrf.mxu0 }
 0x2f7   :  { %v2616_v61 = vpop.f32.mrf.mxu1 }
 0x2f8   :  { %v2794_v38 = vpop.f32.mrf.mxu0 }
 0x2f9   :  { %v4463_v30 = vpop.f32.mrf.mxu1 }
 0x2fa   :  { %v5788_v46 = vpop.f32.mrf.mxu0  ;;  %v5790_v50 = vadd.f32 %v4463_v30, %v2504_v42 }
 0x2fb   :  { %v2629_v15 = vpop.f32.mrf.mxu1 }
 0x2fc   :  { %v5792_v63 = vpop.f32.mrf.mxu0 }
 0x2fd   :  { %v5794_v55 = vpop.f32.mrf.mxu1 }
 0x2fe   :  { %v5796_v44 = vpop.f32.mrf.mxu0 }
 0x2ff   :  { %v2632_v36 = vpop.f32.mrf.mxu1 }
 0x300   :  { %v5798_v28 = vpop.f32.mrf.mxu0 }
 0x301   :  { %v4467_v40 = vpop.f32.mrf.mxu1 }
 0x302   :  { %v5800_v48 = vpop.f32.mrf.mxu0  ;;  %v5802_v10 = vadd.f32 %v4467_v40, %v2508_v35 }
 0x303   :  { %6242 = vst [vmem:[#allocation25_spill] sm:$0xff] %v5800_v48  ;;  %v5804_v43 = vpop.f32.mrf.mxu1 }
 0x304   :  { %6243 = vst [vmem:[#allocation5_spill] sm:$0xff] %v5802_v10  ;;  %v5806_v54 = vpop.f32.mrf.mxu0  ;;  %v2498_v10 = vadd.f32 %v5734_v21, %v5736_v39 }
 0x305   :  { %v5808_v42 = vpop.f32.mrf.mxu1 }
 0x306   :  { %v5810_v57 = vpop.f32.mrf.mxu0 }
 0x307   :  { %6244 = vst [vmem:[#allocation6_spill] sm:$0xff] %v5810_v57  ;;  %v5812_v19 = vpop.f32.mrf.mxu1 }
 0x308   :  { %v5814_v31 = vpop.f32.mrf.mxu0 }
 0x309   :  { %6245 = vst [vmem:[#allocation14_spill] sm:$0xff] %v5814_v31  ;;  %v4471_v18 = vpop.f32.mrf.mxu1 }
 0x30a   :  { %v5816_v53 = vpop.f32.mrf.mxu0  ;;  %v5818_v1 = vadd.f32 %v4471_v18, %v2512_v5 }
 0x30b   :  { %6246 = vst [vmem:[#allocation16_spill] sm:$0xff] %v5816_v53  ;;  %v5820_v32 = vpop.f32.mrf.mxu1 }
 0x30c   :  { %6247 = vst [vmem:[#allocation26_spill] sm:$0xff] %v5818_v1  ;;  %6248 = vst [vmem:[#allocation28_spill] sm:$0xff] %v5820_v32  ;;  %v5822_v35 = vpop.f32.mrf.mxu0 }
 0x30d   :  { %6249 = vst [vmem:[#allocation10_spill] sm:$0xff] %v5822_v35  ;;  %v5824_v7 = vpop.f32.mrf.mxu1 }
 0x30e   :  { %6250 = vst [vmem:[#allocation11_spill] sm:$0xff] %v5824_v7  ;;  %v5826_v12 = vpop.f32.mrf.mxu0 }
 0x30f   :  { %6251 = vst [vmem:[#allocation12_spill] sm:$0xff] %v5826_v12  ;;  %v5828_v29 = vpop.f32.mrf.mxu1 }
 0x310   :  { %6252 = vst [vmem:[#allocation19_spill] sm:$0xff] %v5828_v29  ;;  %v5830_v49 = vpop.f32.mrf.mxu0 }
 0x311   :  { %6253 = vst [vmem:[#allocation30_spill] sm:$0xff] %v5830_v49  ;;  %v4499_v60 = vpop.f32.mrf.mxu1 }
 0x312   :  { %v4519_v37 = vpop.f32.mrf.mxu0 }
 0x313   :  { %v2969_v51 = vpop.f32.mrf.mxu1 }
 0x314   :  { %v3147_v9 = vpop.f32.mrf.mxu0 }
 0x315   :  { %v4500_v30 = vpop.f32.mrf.mxu1 }
 0x316   :  { %v4520_v5 = vpop.f32.mrf.mxu0 }
 0x317   :  { %v2972_v40 = vpop.f32.mrf.mxu1 }
 0x318   :  { %v3150_v1 = vpop.f32.mrf.mxu0 }
 0x319   :  { %v5832_v18 = vpop.f32.mrf.mxu1 }
 0x31a   :  { %v5836_v25 = vpop.f32.mrf.mxu0 }
 0x31b   :  { %v2985_v53 = vpop.f32.mrf.mxu1  ;;  %6254 = vst [vmem:[#allocation15_spill] sm:$0xff] %v5836_v25  ;;  %v2677_v25 = vadd.f32 %v2616_v61, %v2499_v26 }
 0x31c   :  { %v3163_v49 = vpop.f32.mrf.mxu0 }
 0x31d   :  { %v5834_v35 = vpop.f32.mrf.mxu1  ;;  %v2855_v39 = vadd.f32 %v2794_v38, %v2677_v25 }
 0x31e   :  { %v5846_v32 = vpop.f32.mrf.mxu0 }
 0x31f   :  { %v2988_v7 = vpop.f32.mrf.mxu1  ;;  %6259 = vst [vmem:[#allocation20_spill] sm:$0xff] %v5846_v32 }
 0x321   :  { %v5838_v12 = vpop.f32.mrf.mxu1 }
 0x322   :  { %6255 = vst [vmem:[#allocation23_spill] sm:$0xff] %v5838_v12  ;;  %v2676_v12 = vadd.f32 %v2613_v41, %v2498_v10  ;;  %v2856_v41 = vadd.f32 %v5782_v6, %v5784_v17  ;;  %v2506_v6 = vadd.f32 %v5758_v56, %v5760_v14 }
 0x323   :  { %v5840_v4 = vpop.f32.mrf.mxu1 }
 0x324   :  { %6256 = vst [vmem:[#allocation27_spill] sm:$0xff] %v5840_v4  ;;  %v3166_v4 = vpop.f32.mrf.mxu0  ;;  %v2854_v32 = vadd.f32 %v2791_v62, %v2676_v12 }
 0x325   :  { %v5842_v29 = vpop.f32.mrf.mxu1 }
 0x326   :  { %6257 = vst [vmem:[#allocation7_spill] sm:$0xff] %v5842_v29  ;;  %v2501_v29 = vadd.f32 %v5738_v58, %v5740_v33  ;;  %v5866_v34 = vpop.f32.mrf.mxu0  ;;  %v3032_v10 = vadd.f32 %v2969_v51, %v2854_v32  ;;  %v3033_v58 = vadd.f32 %v2972_v40, %v2855_v39  ;;  %v2681_v33 = vadd.f32 %v2632_v36, %v2503_v23  ;;  %v6263_v40 = vld [vmem:[#allocation14_spill] sm:$0xff]  ;;  %v6267_v23 = vld [vmem:[#allocation9_spill] sm:$0xff] }
 0x327   :  { %v5844_v57 = vpop.f32.mrf.mxu1 }
 0x328   :  { %6258 = vst [vmem:[#allocation8_spill] sm:$0xff] %v5844_v57  ;;  %v2679_v21 = vadd.f32 %v4460_v0, %v2501_v29  ;;  %v3179_v25 = vpop.f32.mrf.mxu0  ;;  %v3210_v11 = vadd.f32 %v3147_v9, %v3032_v10  ;;  %v3211_v38 = vadd.f32 %v3150_v1, %v3033_v58 }
 0x329   :  { %v5848_v48 = vpop.f32.mrf.mxu1 }
 0x32a   :  { %6260 = vst [vmem:[#allocation29_spill] sm:$0xff] %v5848_v48  ;;  %v2502_v48 = vadd.f32 %v5746_v16, %v5748_v20  ;;  %v3034_v16 = vadd.f32 %v4499_v60, %v2856_v41  ;;  %v2505_v20 = vadd.f32 %v5750_v27, %v5752_v45  ;;  %v2507_v45 = vadd.f32 %v5766_v47, %v5768_v52  ;;  %v5887_v56 = vpop.f32.mrf.mxu0  ;;  %v6268_v41 = vld [vmem:[#allocation5_spill] sm:$0xff] }
 0x32b   :  { %v5854_v59 = vpop.f32.mrf.mxu1 }
 0x32c   :  { %v2680_v61 = vadd.f32 %v2629_v15, %v2502_v48  ;;  %v2683_v17 = vadd.f32 %v5794_v55, %v2505_v20  ;;  %v2859_v15 = vadd.f32 %v5798_v28, %v2681_v33  ;;  %v2685_v12 = vadd.f32 %v5812_v19, %v2507_v45  ;;  %v3182_v60 = vpop.f32.mrf.mxu0  ;;  %v6271_v33 = vld [vmem:[#allocation20_spill] sm:$0xff] }
 0x32d   :  { %v5856_v31 = vpop.f32.mrf.mxu1 }
 0x32e   :  { %6261 = vst [vmem:[#allocation21_spill] sm:$0xff] %v5856_v31  ;;  %v2858_v8 = vadd.f32 %v5792_v63, %v2680_v61  ;;  %v2860_v63 = vadd.f32 %v5788_v46, %v5790_v50  ;;  %v3037_v28 = vadd.f32 %v2988_v7, %v2859_v15  ;;  %v2509_v7 = vadd.f32 %v5762_v13, %v5764_v22  ;;  %v6264_v13 = vld [vmem:[#allocation15_spill] sm:$0xff]  ;;  %v6269_v61 = vld [vmem:[#allocation25_spill] sm:$0xff] }
 0x32f   :  { %v5860_v57 = vpop.f32.mrf.mxu1  ;;  %v2864_v10 = vadd.f32 %v6269_v61, %v6268_v41  ;;  %v6272_v20 = vld [vmem:[#allocation8_spill] sm:$0xff] }
 0x330   :  { %6262 = vst [vmem:[#allocation24_spill] sm:$0xff] %v5860_v57  ;;  %v2857_v57 = vadd.f32 %v5786_v2, %v2679_v21  ;;  %v3212_v2 = vadd.f32 %v4519_v37, %v3034_v16  ;;  %v3036_v48 = vadd.f32 %v2985_v53, %v2858_v8  ;;  %v2861_v53 = vadd.f32 %v5796_v44, %v2683_v17 }
 0x331   :  { %v4539_v26 = vpop.f32.mrf.mxu1  ;;  %v3038_v52 = vadd.f32 %v5832_v18, %v2860_v63  ;;  %v3215_v44 = vadd.f32 %v3166_v4, %v3037_v28  ;;  %v6266_v4 = vld [vmem:[#allocation13_spill] sm:$0xff] }
 0x332   :  { %v3035_v0 = vadd.f32 %v4500_v30, %v2857_v57  ;;  %v2684_v57 = vadd.f32 %v5804_v43, %v2506_v6  ;;  %v5889_v1 = vadd.f32 %v4539_v26, %v3212_v2  ;;  %v3214_v46 = vadd.f32 %v3163_v49, %v3036_v48  ;;  %v6274_v6 = vld [vmem:[#allocation19_spill] sm:$0xff] }
 0x333   :  { %v3325_v31 = vpop.f32.mrf.mxu1  ;;  %v3039_v51 = vadd.f32 %v5834_v35, %v2861_v53  ;;  %v2510_v49 = vadd.f32 %v5770_v3, %v5772_v24  ;;  %v2687_v30 = vadd.f32 %v5808_v42, %v2509_v7  ;;  %v3216_v22 = vadd.f32 %v6264_v13, %v3038_v52  ;;  %v6270_v3 = vld [vmem:[#allocation28_spill] sm:$0xff]  ;;  %v4531_v42 = vpop.f32.mrf.mxu0 }
 0x334   :  { %v5878_v32 = vadd.f32 %v3325_v31, %v3210_v11  ;;  %v3213_v55 = vadd.f32 %v4520_v5, %v3035_v0  ;;  %v2862_v29 = vadd.f32 %v5806_v54, %v2684_v57  ;;  %v2863_v5 = vadd.f32 %v6263_v40, %v2685_v12  ;;  %v6265_v54 = vld [vmem:[#allocation27_spill] sm:$0xff]  ;;  %v6273_v0 = vld [vmem:[#allocation6_spill] sm:$0xff]  ;;  %v6276_v57 = vld [vmem:[#allocation4_spill] sm:$0xff] }
 0x335   :  { %v4540_v62 = vpop.f32.mrf.mxu1  ;;  %v2511_v26 = vadd.f32 %v6267_v23, %v6266_v4  ;;  %v2688_v24 = vadd.f32 %v6270_v3, %v2510_v49  ;;  %v3217_v16 = vadd.f32 %v6271_v33, %v3039_v51 }
 0x336   :  { %v5896_v50 = vadd.f32 %v4540_v62, %v3213_v55  ;;  %v3040_v21 = vadd.f32 %v6265_v54, %v2862_v29  ;;  %v3041_v62 = vadd.f32 %v6272_v20, %v2863_v5  ;;  %v6277_v55 = vld [vmem:[#allocation3_spill] sm:$0xff]  ;;  %v6282_v5 = vld [vmem:[#allocation26_spill] sm:$0xff]  ;;  %v6287_v20 = vld [vmem:[#allocation21_spill] sm:$0xff] }
 0x337   :  { %v3328_v36 = vpop.f32.mrf.mxu1  ;;  %v2689_v17 = vadd.f32 %v6274_v6, %v2511_v26  ;;  %v2513_v28 = vadd.f32 %v6277_v55, %v6276_v57  ;;  %v6280_v29 = vld [vmem:[#allocation11_spill] sm:$0xff]  ;;  %v6285_v26 = vld [vmem:[#allocation12_spill] sm:$0xff] }
 0x338   :  { %v5880_v27 = vadd.f32 %v3328_v36, %v3211_v38  ;;  %v2865_v38 = vadd.f32 %v6273_v0, %v2687_v30  ;;  %v6275_v36 = vld [vmem:[#allocation23_spill] sm:$0xff]  ;;  %v3218_v48 = vadd.f32 %v3179_v25, %v3040_v21  ;;  %v6284_v21 = vld [vmem:[#allocation24_spill] sm:$0xff] }
 0x339   :  { %v4543_v14 = vpop.f32.mrf.mxu1  ;;  %v3042_v2 = vadd.f32 %v6275_v36, %v2864_v10  ;;  %v2691_v51 = vadd.f32 %v6280_v29, %v2513_v28  ;;  %v6286_v10 = vld [vmem:[#allocation29_spill] sm:$0xff] }
 0x33a   :  { %v3404_v31 = vadd.f32 %v5880_v27, %v5878_v32  ;;  %v5922_v8 = vadd.f32 %v4543_v14, %v3216_v22  ;;  %v3195_v14 = vpop.f32.mrf.mxu0 }
 0x33b   :  { %v3341_v47 = vpop.f32.mrf.mxu1  ;;  %v2869_v41 = vadd.f32 %v6285_v26, %v2691_v51 }
 0x33c   :  { %v3405_v43 = vadd.f32 %v3404_v31, %v5889_v1  ;;  %v5903_v9 = vadd.f32 %v3341_v47, %v3214_v46  ;;  %v6278_v31 = vld [vmem:[#allocation10_spill] sm:$0xff]  ;;  %v6279_v47 = vld [vmem:[#allocation7_spill] sm:$0xff]  ;;  %v3219_v46 = vadd.f32 %v3182_v60, %v3041_v62  ;;  %v4532_v22 = vpop.f32.mrf.mxu0 }
 0x33d   :  { %v4544_v37 = vpop.f32.mrf.mxu1  ;;  %v2866_v53 = vadd.f32 %v6278_v31, %v2688_v24  ;;  %v3043_v52 = vadd.f32 %v6279_v47, %v2865_v38  ;;  %v3047_v62 = vadd.f32 %v6287_v20, %v2869_v41 }
 0x33e   :  { %v3406_v19 = vadd.f32 %v3405_v43, %v5896_v50  ;;  %v3395_v45 = vadd.f32 %v4544_v37, %v3217_v16  ;;  %v3220_v37 = vadd.f32 %v5866_v34, %v3042_v2  ;;  %v3198_v33 = vpop.f32.mrf.mxu0 }
 0x33f   :  { %v3344_v18 = vpop.f32.mrf.mxu1  ;;  %v3044_v49 = vadd.f32 %v5854_v59, %v2866_v53  ;;  %v3221_v60 = vadd.f32 %v5887_v56, %v3043_v52 }
 0x340   :  { %v3407_v39 = vadd.f32 %v3406_v19, %v5903_v9  ;;  %v5913_v35 = vadd.f32 %v3344_v18, %v3215_v44  ;;  %v6281_v44 = vld [vmem:[#allocation30_spill] sm:$0xff]  ;;  %v6283_v18 = vld [vmem:[#allocation16_spill] sm:$0xff] }
 0x341   :  { %v4547_v58 = vpop.f32.mrf.mxu1  ;;  %v2867_v19 = vadd.f32 %v6281_v44, %v2689_v17  ;;  %v2868_v13 = vadd.f32 %v6283_v18, %v6282_v5  ;;  %v3222_v3 = vadd.f32 %v3195_v14, %v3044_v49 }
 0x342   :  { %v3408_v11 = vadd.f32 %v3407_v39, %v5913_v35  ;;  %v3398_v4 = vadd.f32 %v4547_v58, %v3220_v37 }
 0x343   :  { %v3357_v15 = vpop.f32.mrf.mxu1  ;;  %v3045_v39 = vadd.f32 %v6284_v21, %v2867_v19  ;;  %v3046_v34 = vadd.f32 %v6286_v10, %v2868_v13 }
 0x344   :  { %v3409_v63 = vadd.f32 %v3408_v11, %v5922_v8  ;;  %v3396_v43 = vadd.f32 %v3357_v15, %v3218_v48  ;;  %v3225_v15 = vadd.f32 %v4532_v22, %v3047_v62 }
 0x345   :  { %v4548_v12 = vpop.f32.mrf.mxu1  ;;  %v3223_v11 = vadd.f32 %v3198_v33, %v3045_v39  ;;  %v3224_v6 = vadd.f32 %v4531_v42, %v3046_v34 }
 0x346   :  { %v3410_v7 = vadd.f32 %v3409_v63, %v3395_v45  ;;  %v3399_v59 = vadd.f32 %v4548_v12, %v3221_v60 }
 0x347   :  { %v3360_v25 = vpop.f32.mrf.mxu1 }
 0x348   :  { %v3411_v30 = vadd.f32 %v3410_v7, %v3396_v43  ;;  %v3397_v40 = vadd.f32 %v3360_v25, %v3219_v46 }
 0x349   :  { %v4551_v54 = vpop.f32.mrf.mxu1 }
 0x34a   :  { %v3412_v23 = vadd.f32 %v3411_v30, %v3397_v40  ;;  %v3402_v36 = vadd.f32 %v4551_v54, %v3224_v6 }
 0x34b   :  { %v3373_v61 = vpop.f32.mrf.mxu1 }
 0x34c   :  { %v3413_v24 = vadd.f32 %v3412_v23, %v3398_v4  ;;  %v3400_v0 = vadd.f32 %v3373_v61, %v3222_v3 }
 0x34d   :  { %v4552_v16 = vpop.f32.mrf.mxu1 }
 0x34e   :  { %v3414_v38 = vadd.f32 %v3413_v24, %v3399_v59  ;;  %v3403_v48 = vadd.f32 %v4552_v16, %v3225_v15 }
 0x34f   :  { %v3376_v56 = vpop.f32.mrf.mxu1 }
 0x350   :  { %v3415_v17 = vadd.f32 %v3414_v38, %v3400_v0  ;;  %v3401_v58 = vadd.f32 %v3376_v56, %v3223_v11 }
 0x352   :  { %v3416_v2 = vadd.f32 %v3415_v17, %v3401_v58 }
 0x354   :  { %v3417_v63 = vadd.f32 %v3416_v2, %v3402_v36 }
 0x356   :  { %v3418_v57 = vadd.f32 %v3417_v63, %v3403_v48 }
 0x358   :  { %v3419_v55 = vrot.slane %v3418_v57, 4 }
 0x35a   :  { %v3420_v28 = vadd.f32 %v3419_v55, %v3418_v57  ;;  %v4004_v57 = vld [vmem:[%s6178_s3 + $0x2] ss:$0 sm:$0xff] }
 0x35c   :  { %v3421_v31 = vrot.slane %v3420_v28, 2 }
 0x35e   :  { %v3422_v53 = vadd.f32 %v3421_v31, %v3420_v28 }
 0x360   :  { %v3423_v14 = vrot.slane %v3422_v53, 1 }
 0x362   :  { %v3424_v12 = vadd.f32 %v3423_v14, %v3422_v53  ;;  %v4005_v14 = vld [vmem:[%s6178_s3 + $0x3] ss:$0 sm:$0xff] }
 0x364   :  { %v3425_v47 = vmul.f32 0.0078125, %v3424_v12 }
 0x366   :  { %v5945_v52 = vsub.f32 %v5878_v32, %v3425_v47  ;;  %v5948_v42 = vsub.f32 %v5880_v27, %v3425_v47  ;;  %v5951_v46 = vsub.f32 %v5889_v1, %v3425_v47  ;;  %v5954_v7 = vsub.f32 %v5896_v50, %v3425_v47 }
 0x367   :  { %v5957_v29 = vsub.f32 %v5903_v9, %v3425_v47  ;;  %v5960_v51 = vsub.f32 %v5913_v35, %v3425_v47  ;;  %v5963_v44 = vsub.f32 %v5922_v8, %v3425_v47  ;;  %v5965_v32 = vsub.f32 %v3395_v45, %v3425_v47 }
 0x368   :  { %v3434_v19 = vsub.f32 %v3396_v43, %v3425_v47  ;;  %v3435_v27 = vsub.f32 %v3397_v40, %v3425_v47  ;;  %v3436_v25 = vsub.f32 %v3398_v4, %v3425_v47  ;;  %v3437_v37 = vsub.f32 %v3399_v59, %v3425_v47 }
 0x369   :  { %v3438_v1 = vsub.f32 %v3400_v0, %v3425_v47  ;;  %v3439_v49 = vsub.f32 %v3401_v58, %v3425_v47  ;;  %v3440_v30 = vsub.f32 %v3402_v36, %v3425_v47  ;;  %v3441_v50 = vsub.f32 %v3403_v48, %v3425_v47 }
 0x36a   :  { %v3442_v9 = vmul.f32 %v5945_v52, %v5945_v52  ;;  %v3443_v35 = vmul.f32 %v5948_v42, %v5948_v42  ;;  %v3444_v8 = vmul.f32 %v5951_v46, %v5951_v46  ;;  %v3445_v45 = vmul.f32 %v5954_v7, %v5954_v7 }
 0x36b   :  { %v3446_v40 = vmul.f32 %v5957_v29, %v5957_v29  ;;  %v3447_v13 = vmul.f32 %v5960_v51, %v5960_v51  ;;  %v3448_v54 = vmul.f32 %v5963_v44, %v5963_v44  ;;  %v3449_v21 = vmul.f32 %v5965_v32, %v5965_v32 }
 0x36c   :  { %v3458_v5 = vadd.f32 %v3443_v35, %v3442_v9  ;;  %v3450_v4 = vmul.f32 %v3434_v19, %v3434_v19  ;;  %v3451_v26 = vmul.f32 %v3435_v27, %v3435_v27  ;;  %v3452_v61 = vmul.f32 %v3436_v25, %v3436_v25 }
 0x36d   :  { %v3453_v34 = vmul.f32 %v3437_v37, %v3437_v37  ;;  %v3454_v59 = vmul.f32 %v3438_v1, %v3438_v1  ;;  %v3455_v33 = vmul.f32 %v3439_v49, %v3439_v49  ;;  %v3456_v20 = vmul.f32 %v3440_v30, %v3440_v30 }
 0x36e   :  { %v3459_v43 = vadd.f32 %v3458_v5, %v3444_v8  ;;  %v3457_v11 = vmul.f32 %v3441_v50, %v3441_v50 }
 0x370   :  { %v3460_v18 = vadd.f32 %v3459_v43, %v3445_v45 }
 0x372   :  { %v3461_v22 = vadd.f32 %v3460_v18, %v3446_v40 }
 0x374   :  { %v3462_v60 = vadd.f32 %v3461_v22, %v3447_v13 }
 0x376   :  { %v3463_v39 = vadd.f32 %v3462_v60, %v3448_v54 }
 0x378   :  { %v3464_v23 = vadd.f32 %v3463_v39, %v3449_v21 }
 0x37a   :  { %v3465_v41 = vadd.f32 %v3464_v23, %v3450_v4 }
 0x37c   :  { %v3466_v10 = vadd.f32 %v3465_v41, %v3451_v26 }
 0x37e   :  { %v3467_v3 = vadd.f32 %v3466_v10, %v3452_v61 }
 0x380   :  { %v3468_v24 = vadd.f32 %v3467_v3, %v3453_v34 }
 0x382   :  { %v3469_v16 = vadd.f32 %v3468_v24, %v3454_v59 }
 0x384   :  { %v3470_v62 = vadd.f32 %v3469_v16, %v3455_v33 }
 0x386   :  { %v3471_v0 = vadd.f32 %v3470_v62, %v3456_v20 }
 0x388   :  { %v3472_v38 = vadd.f32 %v3471_v0, %v3457_v11 }
 0x38a   :  { %v3473_v56 = vrot.slane %v3472_v38, 4 }
 0x38c   :  { %v3474_v6 = vadd.f32 %v3473_v56, %v3472_v38 }
 0x38e   :  { %v3475_v17 = vrot.slane %v3474_v6, 2 }
 0x390   :  { %v3476_v58 = vadd.f32 %v3475_v17, %v3474_v6 }
 0x392   :  { %v3477_v15 = vrot.slane %v3476_v58, 1 }
 0x394   :  { %v3478_v36 = vadd.f32 %v3477_v15, %v3476_v58 }
 0x396   :  { %v3479_v2 = vmul.f32 0.0078125, %v3478_v36 }
 0x398   :  { %v3480_v48 = vadd.f32 1e-05, %v3479_v2 }
 0x39a   :  { %4598 = vrsqrt.f32 %v3480_v48 }
 0x3a7   :  { %v4599_v63 = vpop.eup %4598 }
 0x3a8   :  { %v3490_v55 = vmul.f32 %v4599_v63, %v3434_v19  ;;  %v3491_v28 = vmul.f32 %v4599_v63, %v3435_v27  ;;  %v3492_v31 = vmul.f32 %v4599_v63, %v3436_v25  ;;  %v3493_v53 = vmul.f32 %v4599_v63, %v3437_v37 }
 0x3a9   :  { %v3494_v12 = vmul.f32 %v4599_v63, %v3438_v1  ;;  %v3495_v47 = vmul.f32 %v4599_v63, %v3439_v49  ;;  %v3496_v9 = vmul.f32 %v4599_v63, %v3440_v30  ;;  %v3497_v35 = vmul.f32 %v4599_v63, %v3441_v50 }
 0x3aa   :  { %v3510_v8 = vmul.f32 %v4004_v57, %v3490_v55  ;;  %v3511_v5 = vmul.f32 %v4004_v57, %v3491_v28  ;;  %v3512_v45 = vmul.f32 %v4004_v57, %v3492_v31  ;;  %v3482_v43 = vmul.f32 %v4599_v63, %v5945_v52 }
 0x3ab   :  { %v3513_v40 = vmul.f32 %v4004_v57, %v3493_v53  ;;  %v3514_v27 = vmul.f32 %v4004_v57, %v3494_v12  ;;  %v3483_v37 = vmul.f32 %v4599_v63, %v5948_v42  ;;  %v3484_v49 = vmul.f32 %v4599_v63, %v5951_v46 }
 0x3ac   :  { %v5990_v18 = vadd.f32 %v4005_v14, %v3510_v8  ;;  %v5992_v19 = vadd.f32 %v4005_v14, %v3511_v5  ;;  %v5994_v25 = vadd.f32 %v4005_v14, %v3512_v45  ;;  %v3485_v30 = vmul.f32 %v4599_v63, %v5954_v7  ;;  %v4006_v5 = vld [vmem:[%s6178_s3 + $0x6] ss:$0 sm:$0xff] }
 0x3ad   :  { %v3486_v50 = vmul.f32 %v4599_v63, %v5957_v29  ;;  %v3487_v52 = vmul.f32 %v4599_v63, %v5960_v51  ;;  %v3488_v13 = vmul.f32 %v4599_v63, %v5963_v44  ;;  %v3489_v22 = vmul.f32 %v4599_v63, %v5965_v32 }
 0x3ae   :  { %v3551_v1 = vadd.f32 %v5992_v19, %v5990_v18  ;;  %v3502_v54 = vmul.f32 %v4004_v57, %v3482_v43  ;;  %v3515_v60 = vmul.f32 %v4004_v57, %v3495_v47  ;;  %v6005_v21 = vadd.f32 %v4005_v14, %v3513_v40 }
 0x3af   :  { %v3503_v39 = vmul.f32 %v4004_v57, %v3483_v37  ;;  %v3516_v4 = vmul.f32 %v4004_v57, %v3496_v9  ;;  %v3504_v23 = vmul.f32 %v4004_v57, %v3484_v49  ;;  %v6008_v46 = vadd.f32 %v4005_v14, %v3514_v27 }
 0x3b0   :  { %v3552_v42 = vadd.f32 %v3551_v1, %v5994_v25  ;;  %v6011_v29 = vadd.f32 %v4005_v14, %v3502_v54  ;;  %v3505_v44 = vmul.f32 %v4004_v57, %v3485_v30  ;;  %v6015_v26 = vadd.f32 %v4005_v14, %v3515_v60 }
 0x3b1   :  { %v6013_v51 = vadd.f32 %v4005_v14, %v3503_v39  ;;  %v3517_v41 = vmul.f32 %v4004_v57, %v3497_v35  ;;  %v3506_v61 = vmul.f32 %v4004_v57, %v3486_v50  ;;  %v6018_v10 = vadd.f32 %v4005_v14, %v3504_v23 }
 0x3b2   :  { %v3553_v7 = vadd.f32 %v3552_v42, %v6005_v21  ;;  %v6022_v3 = vadd.f32 %v4005_v14, %v3516_v4  ;;  %v3507_v24 = vmul.f32 %v4004_v57, %v3487_v52  ;;  %v6025_v33 = vadd.f32 %v4005_v14, %v3505_v44  ;;  %v4007_v4 = vld [vmem:[%s6178_s3 + $0x4] ss:$0 sm:$0xff] }
 0x3b3   :  { %v3538_v34 = vadd.f32 %v6013_v51, %v6011_v29  ;;  %v6029_v62 = vadd.f32 %v4005_v14, %v3517_v41  ;;  %v3508_v11 = vmul.f32 %v4004_v57, %v3488_v13  ;;  %v6031_v0 = vadd.f32 %v4005_v14, %v3506_v61 }
 0x3b4   :  { %v3554_v32 = vadd.f32 %v3553_v7, %v6008_v46  ;;  %v3509_v6 = vmul.f32 %v4004_v57, %v3489_v22  ;;  %v6035_v17 = vadd.f32 %v4005_v14, %v3507_v24  ;;  %v4605_v42 = vmov 0   ;;  %v4010_v24 = vld [vmem:[%s6178_s3 + $0x9] ss:$0 sm:$0xff] }
 0x3b5   :  { %v3539_v16 = vadd.f32 %v3538_v34, %v6018_v10  ;;  %v6038_v36 = vadd.f32 %v4005_v14, %v3508_v11  ;;  %4557 = vset.pattern.permute.xlu1 %v4605_v42  ;;  %v4606_v39 = vmov 1   ;;  %v3699_v42 = vld [vmem:[%s6176_s0 + $0x48] sm:$0xff] }
 0x3b6   :  { %v3555_v59 = vadd.f32 %v3554_v32, %v6015_v26  ;;  %v6041_v63 = vadd.f32 %v4005_v14, %v3509_v6  ;;  %v4009_v14 = vld [vmem:[%s6178_s3 + $0x7] ss:$0 sm:$0xff]  ;;  %4559 = vset.pattern.permute.xlu0 %v4606_v39 }
 0x3b7   :  { %v3540_v38 = vadd.f32 %v3539_v16, %v6025_v33 }
 0x3b8   :  { %v3556_v20 = vadd.f32 %v3555_v59, %v6022_v3  ;;  %v4008_v59 = vld [vmem:[%s6178_s3 + $0x8] ss:$0 sm:$0xff] }
 0x3b9   :  { %v3541_v58 = vadd.f32 %v3540_v38, %v6031_v0  ;;  %v4011_v38 = vld [vmem:[%s6178_s3 + $0x5] ss:$0 sm:$0xff] }
 0x3ba   :  { %v3557_v56 = vadd.f32 %v3556_v20, %v6029_v62 }
 0x3bb   :  { %v3542_v2 = vadd.f32 %v3541_v58, %v6035_v17 }
 0x3bc   :  { %v3558_v15 = vrot.slane %v3557_v56, 4 }
 0x3bd   :  { %v3543_v55 = vadd.f32 %v3542_v2, %v6038_v36 }
 0x3be   :  { %v3559_v48 = vadd.f32 %v3558_v15, %v3557_v56 }
 0x3bf   :  { %v3544_v31 = vadd.f32 %v3543_v55, %v6041_v63 }
 0x3c0   :  { %v3560_v28 = vrot.slane %v3559_v48, 2 }
 0x3c1   :  { %v3545_v12 = vrot.slane %v3544_v31, 4 }
 0x3c2   :  { %v3561_v53 = vadd.f32 %v3560_v28, %v3559_v48  ;;  %v4607_v48 = vmov 1966171168   ;;  %v3645_v28 = vlaneseq }
 0x3c3   :  { %v3546_v47 = vadd.f32 %v3545_v12, %v3544_v31  ;;  %v3643_v55 = vunpack.c.l.s4 %v4607_v48 }
 0x3c4   :  { %v3562_v57 = vrot.slane %v3561_v53, 1 }
 0x3c5   :  { %v3547_v35 = vrot.slane %v3546_v47, 2  ;;  %v3644_v31 = vunpack.c.0.s8 %v3643_v55 }
 0x3c6   :  { %v3563_v9 = vadd.f32 %v3562_v57, %v3561_v53  ;;  %v3646_v53 = vshrl.u32 %v3645_v28, 7 }
 0x3c7   :  { %v3548_v45 = vadd.f32 %v3547_v35, %v3546_v47 }
 0x3c8   :  { %v3565_v8 = vmul.f32 0.015625, %v3563_v9  ;;  %v3647_v12 = vsub.s32 %v3644_v31, %v3646_v53  ;;  %v3666_v47 = vsub.s32 0, %v3646_v53 }
 0x3c9   :  { %v3549_v43 = vrot.slane %v3548_v45, 1 }
 0x3ca   :  { %v3573_v40 = vmul.f32 %v4006_v5, %v3565_v8  ;;  %v3608_v37 = vmul.f32 %v4009_v14, %v3565_v8 }
 0x3cb   :  { %v3550_v27 = vadd.f32 %v3549_v43, %v3548_v45  ;;  %v3691_v43 = vld [vmem:[%s6176_s0 + $0x8] sm:$0xff] }
 0x3cc   :  { %v3576_v49 = vrot.slane %v3573_v40, 7  ;;  %v3611_v50 = vrot.slane %v3608_v37, 7  ;;  %v3692_v40 = vld [vmem:[%s6176_s0 + $0x10] sm:$0xff] }
 0x3cd   :  { %v3564_v1 = vmul.f32 0.015625, %v3550_v27 }
 0x3cf   :  { %v3572_v30 = vmul.f32 %v4006_v5, %v3564_v1  ;;  %v3607_v13 = vmul.f32 %v4009_v14, %v3564_v1  ;;  %v3690_v14 = vld [vmem:[%s6176_s0] sm:$0xff] }
 0x3d1   :  { %v3578_v52 = vsel %vm3577_vm2, %v3576_v49, %v3572_v30  ;;  %v3612_v54 = vsel %vm3577_vm2, %v3611_v50, %v3607_v13  ;;  %v3693_v30 = vld [vmem:[%s6176_s0 + $0x18] sm:$0xff]  ;;  %v3694_v50 = vld [vmem:[%s6176_s0 + $0x20] sm:$0xff] }
 0x3d2   :  { %v3581_v22 = vsel %vm3580_vm3, %v3578_v52, 0.0  ;;  %v3614_v60 = vsel %vm3580_vm3, %v3612_v54, 0.0  ;;  %v3695_v52 = vld [vmem:[%s6176_s0 + $0x28] sm:$0xff]  ;;  %v3697_v54 = vld [vmem:[%s6176_s0 + $0x38] sm:$0xff] }
 0x3d3   :  { %3582 = vadd.xlane.f32.xlu0 %v3581_v22  ;;  %v3696_v22 = vld [vmem:[%s6176_s0 + $0x30] sm:$0xff] }
 0x3d7   :  { %3615 = vadd.xlane.f32.xlu0 %v3614_v60  ;;  %v3698_v60 = vld [vmem:[%s6176_s0 + $0x40] sm:$0xff] }
 0x45c   :  { %v3583_v23 = vpop.xlane.xlu0 %3582 }
 0x45d   :  { %v3588_v7 = vadd.f32 %v4007_v4, %v3583_v23  ;;  %v3702_v23 = vld [vmem:[%s6176_s0 + $0x60] sm:$0xff] }
 0x45f   :  { %v3589_v44 = vmax.f32 %v3588_v7, 0.0  ;;  %v3703_v7 = vld [vmem:[%s6176_s0 + $0x68] sm:$0xff] }
 0x460   :  { %v3616_v32 = vpop.xlane.xlu0 %3615 }
 0x461   :  { %v3617_v41 = vadd.f32 %v4007_v4, %v3616_v32  ;;  %3592 = vperm.xlu1 %4557, %v3589_v44   ;;  %v3701_v4 = vld [vmem:[%s6176_s0 + $0x58] sm:$0xff]  ;;  %v3704_v44 = vld [vmem:[%s6176_s0 + $0x70] sm:$0xff] }
 0x463   :  { %v3618_v61 = vmax.f32 %v3617_v41, 0.0 }
 0x465   :  { %4558 = vset.pattern.permute.xlu1 %v4606_v39  ;;  %v3700_v39 = vld [vmem:[%s6176_s0 + $0x50] sm:$0xff] }
 0x466   :  { %3621 = vperm.xlu1 %4558, %v3618_v61  }
 0x4dc   :  { %v3593_v34 = vpop.permute.xlu1 %3592 }
 0x4dd   :  { %v3599_v20 = vmul.f32 %v4008_v59, %v3593_v34 }
 0x4e1   :  { %v3622_v16 = vpop.permute.xlu1 %3621 }
 0x4e2   :  { %v3628_v11 = vmul.f32 %v4010_v24, %v3622_v16 }
 0x4e4   :  { %v3629_v56 = vadd.f32 %v3628_v11, %v3599_v20 }
 0x4e6   :  { %v3634_v6 = vadd.f32 %v4011_v38, %v3629_v56 }
 0x4e8   :  { %v4012_v58 = vmul.f32 -1.442695, %v3634_v6 }
 0x4ea   :  { %4600 = vpow2.f32 %v4012_v58 }
 0x4f7   :  { %v4601_v15 = vpop.eup %4600 }
 0x4f8   :  { %v3638_v2 = vadd.f32 1.0, %v4601_v15 }
 0x4fa   :  { %4602 = vrcp.f32 %v3638_v2 }
 0x507   :  { %v4603_v57 = vpop.eup %4602 }
 0x508   :  { %v3648_v9 = vrot.slane %v4603_v57, %v3647_v12 }
 0x50a   :  { %v3649_v35 = vcombine.high %v3648_v9, %v3648_v9  ;;  %v3656_v8 = vrot.slane %v3648_v9, %v3647_v12 }
 0x50c   :  { %v3663_v5 = vrot.slane %v3649_v35, %v3647_v12  ;;  %v3667_v45 = vrot.slane %v3656_v8, %v3666_v47 }
 0x50e   :  { %v3671_v27 = vrot.slane %v3663_v5, %v3666_v47  ;;  %v3674_v37 = vmul.f32 %v3667_v45, %v6011_v29  ;;  %v3675_v1 = vmul.f32 %v3667_v45, %v6013_v51  ;;  %v3676_v49 = vmul.f32 %v3667_v45, %v6018_v10 }
 0x50f   :  { %v3677_v13 = vmul.f32 %v3667_v45, %v6025_v33  ;;  %v3678_v29 = vmul.f32 %v3667_v45, %v6031_v0  ;;  %v3679_v51 = vmul.f32 %v3667_v45, %v6035_v17  ;;  %v3680_v10 = vmul.f32 %v3667_v45, %v6038_v36 }
 0x510   :  { %v3681_v33 = vmul.f32 %v3667_v45, %v6041_v63  ;;  %v3682_v0 = vmul.f32 %v3671_v27, %v5990_v18  ;;  %v3683_v17 = vmul.f32 %v3671_v27, %v5992_v19  ;;  %v3684_v36 = vmul.f32 %v3671_v27, %v5994_v25 }
 0x511   :  { %v3685_v63 = vmul.f32 %v3671_v27, %v6005_v21  ;;  %v3686_v18 = vmul.f32 %v3671_v27, %v6008_v46  ;;  %v3687_v19 = vmul.f32 %v3671_v27, %v6015_v26  ;;  %v3688_v25 = vmul.f32 %v3671_v27, %v6022_v3  ;;  %v3705_v26 = vld [vmem:[%s6176_s0 + $0x78] sm:$0xff] }
 0x512   :  { %v3689_v21 = vmul.f32 %v3671_v27, %v6029_v62  ;;  %v3706_v32 = vadd.f32 %v3690_v14, %v3674_v37  ;;  %v3707_v46 = vadd.f32 %v3691_v43, %v3675_v1  ;;  %v3708_v41 = vadd.f32 %v3692_v40, %v3676_v49 }
 0x513   :  { %v3709_v3 = vadd.f32 %v3693_v30, %v3677_v13  ;;  %v3710_v61 = vadd.f32 %v3694_v50, %v3678_v29  ;;  %v3711_v34 = vadd.f32 %v3695_v52, %v3679_v51  ;;  %v3712_v59 = vadd.f32 %v3696_v22, %v3680_v10 }
 0x514   :  { %v3713_v24 = vadd.f32 %v3697_v54, %v3681_v33  ;;  %v3714_v16 = vadd.f32 %v3698_v60, %v3682_v0  ;;  %v3715_v20 = vadd.f32 %v3699_v42, %v3683_v17  ;;  %v3716_v11 = vadd.f32 %v3700_v39, %v3684_v36 }
 0x515   :  { %v3717_v38 = vadd.f32 %v3701_v4, %v3685_v63  ;;  %v3718_v56 = vadd.f32 %v3702_v23, %v3686_v18  ;;  %v3719_v6 = vadd.f32 %v3703_v7, %v3687_v19  ;;  %v3720_v58 = vadd.f32 %v3704_v44, %v3688_v25 }
 0x516   :  { %v3721_v62 = vadd.f32 %v3705_v26, %v3689_v21  ;;  %v3722_v15 = vmax.f32 %v3706_v32, 0.0  ;;  %v3723_v2 = vmax.f32 %v3707_v46, 0.0  ;;  %v3724_v48 = vmax.f32 %v3708_v41, 0.0 }
 0x517   :  { %v3725_v55 = vmax.f32 %v3709_v3, 0.0  ;;  %v3726_v28 = vmax.f32 %v3710_v61, 0.0  ;;  %v3727_v31 = vmax.f32 %v3711_v34, 0.0  ;;  %v3728_v53 = vmax.f32 %v3712_v59, 0.0 }
 0x518   :  { %v3729_v12 = vmax.f32 %v3713_v24, 0.0  ;;  %v3730_v57 = vmax.f32 %v3714_v16, 0.0  ;;  %v3731_v47 = vmax.f32 %v3715_v20, 0.0  ;;  %v3732_v9 = vmax.f32 %v3716_v11, 0.0  ;;  %3738 = vst [vmem:[%s6179_s4] sm:$0xff] %v3722_v15  ;;  %3739 = vst [vmem:[%s6179_s4 + $0x8] sm:$0xff] %v3723_v2 }
 0x519   :  { %3740 = vst [vmem:[%s6179_s4 + $0x10] sm:$0xff] %v3724_v48  ;;  %v3733_v35 = vmax.f32 %v3717_v38, 0.0  ;;  %v3734_v8 = vmax.f32 %v3718_v56, 0.0  ;;  %v3735_v5 = vmax.f32 %v3719_v6, 0.0  ;;  %v3736_v45 = vmax.f32 %v3720_v58, 0.0  ;;  %3741 = vst [vmem:[%s6179_s4 + $0x18] sm:$0xff] %v3725_v55 }
 0x51a   :  { %3742 = vst [vmem:[%s6179_s4 + $0x20] sm:$0xff] %v3726_v28  ;;  %3743 = vst [vmem:[%s6179_s4 + $0x28] sm:$0xff] %v3727_v31  ;;  %v3737_v14 = vmax.f32 %v3721_v62, 0.0 }
 0x51b   :  { %3744 = vst [vmem:[%s6179_s4 + $0x30] sm:$0xff] %v3728_v53  ;;  %3745 = vst [vmem:[%s6179_s4 + $0x38] sm:$0xff] %v3729_v12 }
 0x51c   :  { %3746 = vst [vmem:[%s6179_s4 + $0x40] sm:$0xff] %v3730_v57  ;;  %3747 = vst [vmem:[%s6179_s4 + $0x48] sm:$0xff] %v3731_v47 }
 0x51d   :  { %3748 = vst [vmem:[%s6179_s4 + $0x50] sm:$0xff] %v3732_v9  ;;  %3749 = vst [vmem:[%s6179_s4 + $0x58] sm:$0xff] %v3733_v35 }
 0x51e   :  { %3750 = vst [vmem:[%s6179_s4 + $0x60] sm:$0xff] %v3734_v8  ;;  %3751 = vst [vmem:[%s6179_s4 + $0x68] sm:$0xff] %v3735_v5 }
 0x51f   :  { %3752 = vst [vmem:[%s6179_s4 + $0x70] sm:$0xff] %v3736_v45  ;;  %3753 = vst [vmem:[%s6179_s4 + $0x78] sm:$0xff] %v3737_v14 }

</bundles_post_ra>
